<compile_context>
chip_gen: v5e
topology: v5e:2x2
jax: 0.10.0
libtpu: 0.0.40
codegen_flags: <defaults>
</compile_context>

<pallas_src>
import jax
import jax.numpy as jnp
from jax.experimental import pallas as pl
from jax.experimental.pallas import tpu as pltpu


# ---------------------------------------------------------------------------
# Fused forward kernel: one block of B_TILE images per grid step
# ---------------------------------------------------------------------------
def _net_kernel(xe_ref, xo_ref, band1_ref, bias1_ref, band2_ref, bias2_ref,
                fcw1_ref, fcb1_ref, fcw2_ref, fcb2_ref, o_ref):
    f32, bf16 = jnp.float32, jnp.bfloat16
    b = o_ref.shape[0]                                   # images in this block

    # ---- conv1: even / odd output rows as two K-packed MXU matmuls ----------
    # Row r = p*b + img  holds conv1 row (2p [+1]) of image `img`, lanes j*10+c.
    ye = jnp.dot(xe_ref[...], band1_ref[...], preferred_element_type=f32)  # (12b,240)
    yo = jnp.dot(xo_ref[...], band1_ref[...], preferred_element_type=f32)

    # ---- 2x2 max-pool (rows: even/odd pair; cols: +1-column lane rotate),
    #      bias, relu — all VPU/XLU, no MXU ------------------------------------
    rmax = jnp.maximum(ye, yo)
    csh = jnp.concatenate([rmax[:, 10:], rmax[:, :10]], axis=-1)
    p1 = jnp.maximum(jnp.maximum(rmax, csh) + bias1_ref[...], 0.0)         # (12b,240)
    # valid pooled pixels live at lanes 20*q + cin; the stale odd-column lanes
    # are multiplied by zero rows of band2 below.

    # ---- conv2: 5 banded matmuls (pooled-column decimation folded into band2)
    acc = jnp.dot(p1[0:8 * b, :].astype(bf16), band2_ref[0],
                  preferred_element_type=f32)
    for dy in range(1, 5):
        acc = acc + jnp.dot(p1[dy * b:(dy + 8) * b, :].astype(bf16),
                            band2_ref[dy], preferred_element_type=f32)
    # TODO(synk): nn.Dropout2d is identity here (inference mode).
    y2 = acc + bias2_ref[...]                                              # (8b,160)

    # ---- 2x2 max-pool + relu + fc1 (NCHW flatten + column decimation folded
    #      into the fcw1 slabs) ------------------------------------------------
    f1 = fcb1_ref[...]                                                     # (1,50)
    for h in range(4):
        m = jnp.maximum(y2[(2 * h) * b:(2 * h + 1) * b, :],
                        y2[(2 * h + 1) * b:(2 * h + 2) * b, :])            # (b,160)
        m = jnp.maximum(m, jnp.concatenate([m[:, 20:], m[:, :20]], axis=-1))
        m = jnp.maximum(m, 0.0)
        f1 = f1 + jnp.dot(m.astype(bf16), fcw1_ref[h],
                          preferred_element_type=f32)
    f1 = jnp.maximum(f1, 0.0)                                              # (b,50)
    # TODO(synk): F.dropout is identity here (inference mode).

    # ---- fc2 + numerically stable log_softmax --------------------------------
    f2 = jnp.dot(f1, fcw2_ref[...], preferred_element_type=f32) + fcb2_ref[...]
    z = f2 - jnp.max(f2, axis=-1, keepdims=True)
    o_ref[...] = (z - jnp.log(jnp.sum(jnp.exp(z), axis=-1, keepdims=True))
                  ).astype(o_ref.dtype)


# ---------------------------------------------------------------------------
# Host-side weight re-layout (done once, outside the hot path)
# ---------------------------------------------------------------------------
def _conv_band_matrices(w, w_in):
    """w: (Cout, Cin, KH, KW) PyTorch conv weight.
    Returns B of shape (KH, Win*Cin, Wout*Cout) so that, for a feature map F
    laid out as [row, col*Cin + cin]:
      conv_out[i, j*Cout + cout] = sum_dy (F[i+dy, :] @ B[dy])[j*Cout + cout]."""
    c_out, c_in, kh, kw = w.shape
    w_out = w_in - kw + 1
    jw = jnp.arange(w_in)[:, None]                 # input column
    jo = jnp.arange(w_out)[None, :]                # output column
    dx = jw - jo
    valid = (dx >= 0) & (dx < kw)
    dxc = jnp.clip(dx, 0, kw - 1)
    w_t = jnp.transpose(w, (2, 3, 1, 0))           # (KH, KW, Cin, Cout)
    gathered = w_t[:, dxc]                         # (KH, Win, Wout, Cin, Cout)
    band = jnp.where(valid[None, :, :, None, None], gathered, 0.0)
    band = jnp.transpose(band, (0, 1, 3, 2, 4))    # (KH, Win, Cin, Wout, Cout)
    return band.reshape(kh, w_in * c_in, w_out * c_out).astype(jnp.float32)


def pack_params(params):
    f32, bf16 = jnp.float32, jnp.bfloat16

    # conv1: K-pack the 5 kernel-row bands -> (140, 240)
    band1 = _conv_band_matrices(params["conv1_w"], 28)            # (5, 28, 240)
    band1p = band1.reshape(5 * 28, 240).astype(bf16)

    # conv2 bands on the *un-decimated* pooled layout (valid cols at even j):
    # nonzero rows only at lanes 20*q + cin.
    band2s = _conv_band_matrices(params["conv2_w"], 12)           # (5, 120, 160)
    src = jnp.arange(120)
    rows2 = 20 * (src // 10) + (src % 10)
    band2 = jnp.zeros((5, 240, 160), f32).at[:, rows2, :].set(band2s).astype(bf16)

    # fc1: fold PyTorch NCHW flatten (k = c*16 + h*4 + w) and pool2 column
    # decimation into 4 per-row slabs; nonzero rows only at lanes 40*w + c.
    w1 = params["fc1_w"].reshape(50, 20, 4, 4)                    # [n, c, h, w]
    w1 = jnp.transpose(w1, (2, 3, 1, 0)).reshape(4, 80, 50)       # [h, (w,c), n]
    src = jnp.arange(80)
    rows1 = 40 * (src // 20) + (src % 20)
    fcw1 = jnp.zeros((4, 160, 50), f32).at[:, rows1, :].set(w1).astype(bf16)

    return {
        "band1p": band1p,
        "bias1": jnp.tile(params["conv1_b"], 24)[None, :].astype(f32),   # (1,240)
        "band2": band2,
        "bias2": jnp.tile(params["conv2_b"], 8)[None, :].astype(f32),    # (1,160)
        "fcw1": fcw1,
        "fcb1": params["fc1_b"][None, :].astype(f32),
        "fcw2": params["fc2_w"].T.astype(f32),                           # (50,10)
        "fcb2": params["fc2_b"][None, :].astype(f32),
    }


# ---------------------------------------------------------------------------
# Forward pass: one fused pallas_call, grid over batch blocks
# ---------------------------------------------------------------------------
def _round_up(x, m):
    return (x + m - 1) // m * m


def net_forward(packed, x_nchw, *, b_tile=128):
    n = x_nchw.shape[0]
    b_tile = min(b_tile, _round_up(n, 8))      # multiple of 8, <= requested cap
    n_pad = _round_up(n, b_tile)
    g = n_pad // b_tile

    # ---- input layout prep (cheap XLA, outside the kernel) -------------------
    x = x_nchw[:, 0, :, :].astype(jnp.float32)              # (N, 28, 28), Cin == 1
    if n_pad != n:
        x = jnp.pad(x, ((0, n_pad - n), (0, 0), (0, 0)))
    # pack the 5 kernel-row windows along lanes: xw[b, i, dy*28 + col] = x[b, i+dy, col]
    xw = jnp.concatenate([x[:, dy:dy + 24, :] for dy in range(5)], axis=-1)  # (n_pad,24,140)

    def pack(v):
        # (n_pad, 12, 140) -> block-local, pooled-row-major, image-minor rows
        return (v.reshape(g, b_tile, 12, 140)
                 .transpose(0, 2, 1, 3)
                 .reshape(g * 12 * b_tile, 140)
                 .astype(jnp.bfloat16))

    xe = pack(xw[:, 0::2, :])    # even conv1 output rows
    xo = pack(xw[:, 1::2, :])    # odd  conv1 output rows

    out = pl.pallas_call(
        _net_kernel,
        out_shape=jax.ShapeDtypeStruct((n_pad, 10), jnp.float32),
        grid=(g,),
        in_specs=[
            pl.BlockSpec((b_tile * 12, 140), lambda i: (i, 0)),   # conv1 LHS (even rows)
            pl.BlockSpec((b_tile * 12, 140), lambda i: (i, 0)),   # conv1 LHS (odd rows)
            pl.BlockSpec((140, 240), lambda i: (0, 0)),           # K-packed conv1 band
            pl.BlockSpec((1, 240), lambda i: (0, 0)),             # conv1 bias row
            pl.BlockSpec((5, 240, 160), lambda i: (0, 0, 0)),     # conv2 bands
            pl.BlockSpec((1, 160), lambda i: (0, 0)),             # conv2 bias row
            pl.BlockSpec((4, 160, 50), lambda i: (0, 0, 0)),      # fc1 weight slabs
            pl.BlockSpec((1, 50), lambda i: (0, 0)),              # fc1 bias
            pl.BlockSpec((50, 10), lambda i: (0, 0)),             # fc2 weight (K, N)
            pl.BlockSpec((1, 10), lambda i: (0, 0)),              # fc2 bias
        ],
        out_specs=pl.BlockSpec((b_tile, 10), lambda i: (i, 0)),
        compiler_params=pltpu.CompilerParams(
            dimension_semantics=("parallel",),
            vmem_limit_bytes=48 * 1024 * 1024),
    )(xe, xo, packed["band1p"], packed["bias1"], packed["band2"], packed["bias2"],
      packed["fcw1"], packed["fcb1"], packed["fcw2"], packed["fcb2"])
    return out[:n]


# ---------------------------------------------------------------------------
# Parameters (PyTorch-style uniform init, deterministic)
# ---------------------------------------------------------------------------
def init_params(key):
    ks = jax.random.split(key, 8)

    def u(k, shape, fan_in):
        bound = 1.0 / jnp.sqrt(jnp.float32(fan_in))
        return jax.random.uniform(k, shape, jnp.float32, -bound, bound)

    return {
        "conv1_w": u(ks[0], (10, 1, 5, 5), 1 * 5 * 5),
        "conv1_b": u(ks[1], (10,), 1 * 5 * 5),
        "conv2_w": u(ks[2], (20, 10, 5, 5), 10 * 5 * 5),
        "conv2_b": u(ks[3], (20,), 10 * 5 * 5),
        "fc1_w": u(ks[4], (50, 320), 320),
        "fc1_b": u(ks[5], (50,), 320),
        "fc2_w": u(ks[6], (10, 50), 50),
        "fc2_b": u(ks[7], (10,), 50),
    }


# ---------------------------------------------------------------------------
# Pure-JAX reference (eval mode) for correctness checking
# ---------------------------------------------------------------------------
def net_forward_ref(params, x_nchw):
    prec = jax.lax.Precision.HIGHEST
    x = jax.lax.conv_general_dilated(
        x_nchw, params["conv1_w"], (1, 1), "VALID",
        dimension_numbers=("NCHW", "OIHW", "NCHW"), precision=prec)
    x = x + params["conv1_b"][None, :, None, None]
    x = jax.lax.reduce_window(x, -jnp.inf, jax.lax.max,
                              (1, 1, 2, 2), (1, 1, 2, 2), "VALID")
    x = jnp.maximum(x, 0.0)
    x = jax.lax.conv_general_dilated(
        x, params["conv2_w"], (1, 1), "VALID",
        dimension_numbers=("NCHW", "OIHW", "NCHW"), precision=prec)
    x = x + params["conv2_b"][None, :, None, None]
    x = jax.lax.reduce_window(x, -jnp.inf, jax.lax.max,
                              (1, 1, 2, 2), (1, 1, 2, 2), "VALID")
    x = jnp.maximum(x, 0.0)
    x = x.reshape(x.shape[0], 320)
    x = jnp.maximum(jnp.dot(x, params["fc1_w"].T, precision=prec)
                    + params["fc1_b"], 0.0)
    x = jnp.dot(x, params["fc2_w"].T, precision=prec) + params["fc2_b"]
    return jax.nn.log_softmax(x, axis=-1)


if __name__ == "__main__":
    key = jax.random.PRNGKey(0)
    pkey, xkey, xkey2 = jax.random.split(key, 3)
    params = init_params(pkey)
    packed = pack_params(params)            # one-time weight/layout preparation

    # small batch (as in the spec): padded up to one 8-image block internally
    x = jax.random.normal(xkey, (2, 1, 28, 28), jnp.float32)
    out = jax.block_until_ready(jax.jit(net_forward)(packed, x))
    assert out.shape == (2, 10)
    assert jnp.allclose(jnp.sum(jnp.exp(out), axis=1), 1.0, atol=1e-3)
    ref = net_forward_ref(params, x)
    assert jnp.allclose(out, ref, atol=2e-2, rtol=2e-2)

    # multi-block batch exercising padding + the parallel grid (3 steps of 8)
    x2 = jax.random.normal(xkey2, (20, 1, 28, 28), jnp.float32)
    out2 = jax.block_until_ready(
        jax.jit(lambda p, v: net_forward(p, v, b_tile=8))(packed, x2))
    assert out2.shape == (20, 10)
    assert jnp.allclose(out2, net_forward_ref(params, x2), atol=2e-2, rtol=2e-2)

    print("KERNEL_OK")
</pallas_src>

<mosaic_0001>
module attributes {stable_mosaic.version = 11 : i64} {
  func.func @_net_kernel(%arg0: i32, %arg1: memref<96x140xbf16, #tpu.memory_space<vmem>>, %arg2: memref<96x140xbf16, #tpu.memory_space<vmem>>, %arg3: memref<140x240xbf16, #tpu.memory_space<vmem>>, %arg4: memref<1x240xf32, #tpu.memory_space<vmem>>, %arg5: memref<5x240x160xbf16, #tpu.memory_space<vmem>>, %arg6: memref<1x160xf32, #tpu.memory_space<vmem>>, %arg7: memref<4x160x50xbf16, #tpu.memory_space<vmem>>, %arg8: memref<1x50xf32, #tpu.memory_space<vmem>>, %arg9: memref<50x10xf32, #tpu.memory_space<vmem>>, %arg10: memref<1x10xf32, #tpu.memory_space<vmem>>, %arg11: memref<8x10xf32, #tpu.memory_space<vmem>>) attributes {dimension_semantics = [#tpu.dimension_semantics<parallel>], iteration_bounds = array<i64: 1>, scalar_prefetch = 0 : i64, scratch_operands = 0 : i64, tpu.core_type = #tpu.core_type<tc>, window_params = [{transform_indices = @transform_0, window_bounds = array<i64: 96, 140>}, {transform_indices = @transform_1, window_bounds = array<i64: 96, 140>}, {pipeline_mode = #tpu.pipeline_mode<synchronous>, transform_indices = @transform_2, window_bounds = array<i64: 140, 240>}, {pipeline_mode = #tpu.pipeline_mode<synchronous>, transform_indices = @transform_3, window_bounds = array<i64: 1, 240>}, {pipeline_mode = #tpu.pipeline_mode<synchronous>, transform_indices = @transform_4, window_bounds = array<i64: 5, 240, 160>}, {pipeline_mode = #tpu.pipeline_mode<synchronous>, transform_indices = @transform_5, window_bounds = array<i64: 1, 160>}, {pipeline_mode = #tpu.pipeline_mode<synchronous>, transform_indices = @transform_6, window_bounds = array<i64: 4, 160, 50>}, {pipeline_mode = #tpu.pipeline_mode<synchronous>, transform_indices = @transform_7, window_bounds = array<i64: 1, 50>}, {pipeline_mode = #tpu.pipeline_mode<synchronous>, transform_indices = @transform_8, window_bounds = array<i64: 50, 10>}, {pipeline_mode = #tpu.pipeline_mode<synchronous>, transform_indices = @transform_9, window_bounds = array<i64: 1, 10>}, {transform_indices = @transform_10, window_bounds = array<i64: 8, 10>}]} {
    %c0 = arith.constant 0 : index
    %c0_0 = arith.constant 0 : index
    %0 = vector.load %arg1[%c0, %c0_0] : memref<96x140xbf16, #tpu.memory_space<vmem>>, vector<96x140xbf16>
    %c0_1 = arith.constant 0 : index
    %c0_2 = arith.constant 0 : index
    %1 = vector.load %arg3[%c0_1, %c0_2] : memref<140x240xbf16, #tpu.memory_space<vmem>>, vector<140x240xbf16>
    %cst = arith.constant dense<0.000000e+00> : vector<96x240xf32>
    %2 = tpu.matmul %0, %1, %cst {dimension_numbers = #tpu.dot_dimension_numbers<[1], [0], [0], [1], [0, 0, 1, 1], [], []>} : vector<96x140xbf16>, vector<140x240xbf16>, vector<96x240xf32> -> vector<96x240xf32>
    %c0_3 = arith.constant 0 : index
    %c0_4 = arith.constant 0 : index
    %3 = vector.load %arg2[%c0_3, %c0_4] : memref<96x140xbf16, #tpu.memory_space<vmem>>, vector<96x140xbf16>
    %c0_5 = arith.constant 0 : index
    %c0_6 = arith.constant 0 : index
    %4 = vector.load %arg3[%c0_5, %c0_6] : memref<140x240xbf16, #tpu.memory_space<vmem>>, vector<140x240xbf16>
    %cst_7 = arith.constant dense<0.000000e+00> : vector<96x240xf32>
    %5 = tpu.matmul %3, %4, %cst_7 {dimension_numbers = #tpu.dot_dimension_numbers<[1], [0], [0], [1], [0, 0, 1, 1], [], []>} : vector<96x140xbf16>, vector<140x240xbf16>, vector<96x240xf32> -> vector<96x240xf32>
    %6 = arith.maximumf %2, %5 : vector<96x240xf32>
    %7 = vector.extract_strided_slice %6 {offsets = [0, 10], sizes = [96, 230], strides = [1, 1]} : vector<96x240xf32> to vector<96x230xf32>
    %8 = vector.extract_strided_slice %6 {offsets = [0, 0], sizes = [96, 10], strides = [1, 1]} : vector<96x240xf32> to vector<96x10xf32>
    %9 = tpu.concatenate %7, %8 in 1 : vector<96x230xf32>, vector<96x10xf32> -> vector<96x240xf32>
    %10 = arith.maximumf %6, %9 : vector<96x240xf32>
    %c0_8 = arith.constant 0 : index
    %c0_9 = arith.constant 0 : index
    %11 = vector.load %arg4[%c0_8, %c0_9] : memref<1x240xf32, #tpu.memory_space<vmem>>, vector<1x240xf32>
    %12 = vector.broadcast %11 : vector<1x240xf32> to vector<96x240xf32>
    %13 = arith.addf %10, %12 : vector<96x240xf32>
    %cst_10 = arith.constant 0.000000e+00 : f32
    %14 = vector.broadcast %cst_10 : f32 to vector<96x240xf32>
    %15 = arith.maximumf %13, %14 : vector<96x240xf32>
    %16 = vector.extract_strided_slice %15 {offsets = [0, 0], sizes = [64, 240], strides = [1, 1]} : vector<96x240xf32> to vector<64x240xf32>
    %17 = arith.truncf %16 : vector<64x240xf32> to vector<64x240xbf16>
    %c0_11 = arith.constant 0 : index
    %c0_12 = arith.constant 0 : index
    %c0_13 = arith.constant 0 : index
    %18 = vector.load %arg5[%c0_11, %c0_12, %c0_13] : memref<5x240x160xbf16, #tpu.memory_space<vmem>>, vector<1x240x160xbf16>
    %19 = vector.shape_cast %18 : vector<1x240x160xbf16> to vector<240x160xbf16>
    %cst_14 = arith.constant dense<0.000000e+00> : vector<64x160xf32>
    %20 = tpu.matmul %17, %19, %cst_14 {dimension_numbers = #tpu.dot_dimension_numbers<[1], [0], [0], [1], [0, 0, 1, 1], [], []>} : vector<64x240xbf16>, vector<240x160xbf16>, vector<64x160xf32> -> vector<64x160xf32>
    %21 = vector.extract_strided_slice %15 {offsets = [8, 0], sizes = [64, 240], strides = [1, 1]} : vector<96x240xf32> to vector<64x240xf32>
    %22 = arith.truncf %21 : vector<64x240xf32> to vector<64x240xbf16>
    %c1 = arith.constant 1 : index
    %c0_15 = arith.constant 0 : index
    %c0_16 = arith.constant 0 : index
    %23 = vector.load %arg5[%c1, %c0_15, %c0_16] : memref<5x240x160xbf16, #tpu.memory_space<vmem>>, vector<1x240x160xbf16>
    %24 = vector.shape_cast %23 : vector<1x240x160xbf16> to vector<240x160xbf16>
    %cst_17 = arith.constant dense<0.000000e+00> : vector<64x160xf32>
    %25 = tpu.matmul %22, %24, %cst_17 {dimension_numbers = #tpu.dot_dimension_numbers<[1], [0], [0], [1], [0, 0, 1, 1], [], []>} : vector<64x240xbf16>, vector<240x160xbf16>, vector<64x160xf32> -> vector<64x160xf32>
    %26 = arith.addf %20, %25 : vector<64x160xf32>
    %27 = vector.extract_strided_slice %15 {offsets = [16, 0], sizes = [64, 240], strides = [1, 1]} : vector<96x240xf32> to vector<64x240xf32>
    %28 = arith.truncf %27 : vector<64x240xf32> to vector<64x240xbf16>
    %c2 = arith.constant 2 : index
    %c0_18 = arith.constant 0 : index
    %c0_19 = arith.constant 0 : index
    %29 = vector.load %arg5[%c2, %c0_18, %c0_19] : memref<5x240x160xbf16, #tpu.memory_space<vmem>>, vector<1x240x160xbf16>
    %30 = vector.shape_cast %29 : vector<1x240x160xbf16> to vector<240x160xbf16>
    %cst_20 = arith.constant dense<0.000000e+00> : vector<64x160xf32>
    %31 = tpu.matmul %28, %30, %cst_20 {dimension_numbers = #tpu.dot_dimension_numbers<[1], [0], [0], [1], [0, 0, 1, 1], [], []>} : vector<64x240xbf16>, vector<240x160xbf16>, vector<64x160xf32> -> vector<64x160xf32>
    %32 = arith.addf %26, %31 : vector<64x160xf32>
    %33 = vector.extract_strided_slice %15 {offsets = [24, 0], sizes = [64, 240], strides = [1, 1]} : vector<96x240xf32> to vector<64x240xf32>
    %34 = arith.truncf %33 : vector<64x240xf32> to vector<64x240xbf16>
    %c3 = arith.constant 3 : index
    %c0_21 = arith.constant 0 : index
    %c0_22 = arith.constant 0 : index
    %35 = vector.load %arg5[%c3, %c0_21, %c0_22] : memref<5x240x160xbf16, #tpu.memory_space<vmem>>, vector<1x240x160xbf16>
    %36 = vector.shape_cast %35 : vector<1x240x160xbf16> to vector<240x160xbf16>
    %cst_23 = arith.constant dense<0.000000e+00> : vector<64x160xf32>
    %37 = tpu.matmul %34, %36, %cst_23 {dimension_numbers = #tpu.dot_dimension_numbers<[1], [0], [0], [1], [0, 0, 1, 1], [], []>} : vector<64x240xbf16>, vector<240x160xbf16>, vector<64x160xf32> -> vector<64x160xf32>
    %38 = arith.addf %32, %37 : vector<64x160xf32>
    %39 = vector.extract_strided_slice %15 {offsets = [32, 0], sizes = [64, 240], strides = [1, 1]} : vector<96x240xf32> to vector<64x240xf32>
    %40 = arith.truncf %39 : vector<64x240xf32> to vector<64x240xbf16>
    %c4 = arith.constant 4 : index
    %c0_24 = arith.constant 0 : index
    %c0_25 = arith.constant 0 : index
    %41 = vector.load %arg5[%c4, %c0_24, %c0_25] : memref<5x240x160xbf16, #tpu.memory_space<vmem>>, vector<1x240x160xbf16>
    %42 = vector.shape_cast %41 : vector<1x240x160xbf16> to vector<240x160xbf16>
    %cst_26 = arith.constant dense<0.000000e+00> : vector<64x160xf32>
    %43 = tpu.matmul %40, %42, %cst_26 {dimension_numbers = #tpu.dot_dimension_numbers<[1], [0], [0], [1], [0, 0, 1, 1], [], []>} : vector<64x240xbf16>, vector<240x160xbf16>, vector<64x160xf32> -> vector<64x160xf32>
    %44 = arith.addf %38, %43 : vector<64x160xf32>
    %c0_27 = arith.constant 0 : index
    %c0_28 = arith.constant 0 : index
    %45 = vector.load %arg6[%c0_27, %c0_28] : memref<1x160xf32, #tpu.memory_space<vmem>>, vector<1x160xf32>
    %46 = vector.broadcast %45 : vector<1x160xf32> to vector<64x160xf32>
    %47 = arith.addf %44, %46 : vector<64x160xf32>
    %c0_29 = arith.constant 0 : index
    %c0_30 = arith.constant 0 : index
    %48 = vector.load %arg8[%c0_29, %c0_30] : memref<1x50xf32, #tpu.memory_space<vmem>>, vector<1x50xf32>
    %49 = vector.extract_strided_slice %47 {offsets = [0, 0], sizes = [8, 160], strides = [1, 1]} : vector<64x160xf32> to vector<8x160xf32>
    %50 = vector.extract_strided_slice %47 {offsets = [8, 0], sizes = [8, 160], strides = [1, 1]} : vector<64x160xf32> to vector<8x160xf32>
    %51 = arith.maximumf %49, %50 : vector<8x160xf32>
    %52 = vector.extract_strided_slice %51 {offsets = [0, 20], sizes = [8, 140], strides = [1, 1]} : vector<8x160xf32> to vector<8x140xf32>
    %53 = vector.extract_strided_slice %51 {offsets = [0, 0], sizes = [8, 20], strides = [1, 1]} : vector<8x160xf32> to vector<8x20xf32>
    %54 = tpu.concatenate %52, %53 in 1 : vector<8x140xf32>, vector<8x20xf32> -> vector<8x160xf32>
    %55 = arith.maximumf %51, %54 : vector<8x160xf32>
    %cst_31 = arith.constant 0.000000e+00 : f32
    %56 = vector.broadcast %cst_31 : f32 to vector<8x160xf32>
    %57 = arith.maximumf %55, %56 : vector<8x160xf32>
    %58 = arith.truncf %57 : vector<8x160xf32> to vector<8x160xbf16>
    %c0_32 = arith.constant 0 : index
    %c0_33 = arith.constant 0 : index
    %c0_34 = arith.constant 0 : index
    %59 = vector.load %arg7[%c0_32, %c0_33, %c0_34] : memref<4x160x50xbf16, #tpu.memory_space<vmem>>, vector<1x160x50xbf16>
    %60 = vector.shape_cast %59 : vector<1x160x50xbf16> to vector<160x50xbf16>
    %cst_35 = arith.constant dense<0.000000e+00> : vector<8x50xf32>
    %61 = tpu.matmul %58, %60, %cst_35 {dimension_numbers = #tpu.dot_dimension_numbers<[1], [0], [0], [1], [0, 0, 1, 1], [], []>} : vector<8x160xbf16>, vector<160x50xbf16>, vector<8x50xf32> -> vector<8x50xf32>
    %62 = vector.broadcast %48 : vector<1x50xf32> to vector<8x50xf32>
    %63 = arith.addf %62, %61 : vector<8x50xf32>
    %64 = vector.extract_strided_slice %47 {offsets = [16, 0], sizes = [8, 160], strides = [1, 1]} : vector<64x160xf32> to vector<8x160xf32>
    %65 = vector.extract_strided_slice %47 {offsets = [24, 0], sizes = [8, 160], strides = [1, 1]} : vector<64x160xf32> to vector<8x160xf32>
    %66 = arith.maximumf %64, %65 : vector<8x160xf32>
    %67 = vector.extract_strided_slice %66 {offsets = [0, 20], sizes = [8, 140], strides = [1, 1]} : vector<8x160xf32> to vector<8x140xf32>
    %68 = vector.extract_strided_slice %66 {offsets = [0, 0], sizes = [8, 20], strides = [1, 1]} : vector<8x160xf32> to vector<8x20xf32>
    %69 = tpu.concatenate %67, %68 in 1 : vector<8x140xf32>, vector<8x20xf32> -> vector<8x160xf32>
    %70 = arith.maximumf %66, %69 : vector<8x160xf32>
    %cst_36 = arith.constant 0.000000e+00 : f32
    %71 = vector.broadcast %cst_36 : f32 to vector<8x160xf32>
    %72 = arith.maximumf %70, %71 : vector<8x160xf32>
    %73 = arith.truncf %72 : vector<8x160xf32> to vector<8x160xbf16>
    %c1_37 = arith.constant 1 : index
    %c0_38 = arith.constant 0 : index
    %c0_39 = arith.constant 0 : index
    %74 = vector.load %arg7[%c1_37, %c0_38, %c0_39] : memref<4x160x50xbf16, #tpu.memory_space<vmem>>, vector<1x160x50xbf16>
    %75 = vector.shape_cast %74 : vector<1x160x50xbf16> to vector<160x50xbf16>
    %cst_40 = arith.constant dense<0.000000e+00> : vector<8x50xf32>
    %76 = tpu.matmul %73, %75, %cst_40 {dimension_numbers = #tpu.dot_dimension_numbers<[1], [0], [0], [1], [0, 0, 1, 1], [], []>} : vector<8x160xbf16>, vector<160x50xbf16>, vector<8x50xf32> -> vector<8x50xf32>
    %77 = arith.addf %63, %76 : vector<8x50xf32>
    %78 = vector.extract_strided_slice %47 {offsets = [32, 0], sizes = [8, 160], strides = [1, 1]} : vector<64x160xf32> to vector<8x160xf32>
    %79 = vector.extract_strided_slice %47 {offsets = [40, 0], sizes = [8, 160], strides = [1, 1]} : vector<64x160xf32> to vector<8x160xf32>
    %80 = arith.maximumf %78, %79 : vector<8x160xf32>
    %81 = vector.extract_strided_slice %80 {offsets = [0, 20], sizes = [8, 140], strides = [1, 1]} : vector<8x160xf32> to vector<8x140xf32>
    %82 = vector.extract_strided_slice %80 {offsets = [0, 0], sizes = [8, 20], strides = [1, 1]} : vector<8x160xf32> to vector<8x20xf32>
    %83 = tpu.concatenate %81, %82 in 1 : vector<8x140xf32>, vector<8x20xf32> -> vector<8x160xf32>
    %84 = arith.maximumf %80, %83 : vector<8x160xf32>
    %cst_41 = arith.constant 0.000000e+00 : f32
    %85 = vector.broadcast %cst_41 : f32 to vector<8x160xf32>
    %86 = arith.maximumf %84, %85 : vector<8x160xf32>
    %87 = arith.truncf %86 : vector<8x160xf32> to vector<8x160xbf16>
    %c2_42 = arith.constant 2 : index
    %c0_43 = arith.constant 0 : index
    %c0_44 = arith.constant 0 : index
    %88 = vector.load %arg7[%c2_42, %c0_43, %c0_44] : memref<4x160x50xbf16, #tpu.memory_space<vmem>>, vector<1x160x50xbf16>
    %89 = vector.shape_cast %88 : vector<1x160x50xbf16> to vector<160x50xbf16>
    %cst_45 = arith.constant dense<0.000000e+00> : vector<8x50xf32>
    %90 = tpu.matmul %87, %89, %cst_45 {dimension_numbers = #tpu.dot_dimension_numbers<[1], [0], [0], [1], [0, 0, 1, 1], [], []>} : vector<8x160xbf16>, vector<160x50xbf16>, vector<8x50xf32> -> vector<8x50xf32>
    %91 = arith.addf %77, %90 : vector<8x50xf32>
    %92 = vector.extract_strided_slice %47 {offsets = [48, 0], sizes = [8, 160], strides = [1, 1]} : vector<64x160xf32> to vector<8x160xf32>
    %93 = vector.extract_strided_slice %47 {offsets = [56, 0], sizes = [8, 160], strides = [1, 1]} : vector<64x160xf32> to vector<8x160xf32>
    %94 = arith.maximumf %92, %93 : vector<8x160xf32>
    %95 = vector.extract_strided_slice %94 {offsets = [0, 20], sizes = [8, 140], strides = [1, 1]} : vector<8x160xf32> to vector<8x140xf32>
    %96 = vector.extract_strided_slice %94 {offsets = [0, 0], sizes = [8, 20], strides = [1, 1]} : vector<8x160xf32> to vector<8x20xf32>
    %97 = tpu.concatenate %95, %96 in 1 : vector<8x140xf32>, vector<8x20xf32> -> vector<8x160xf32>
    %98 = arith.maximumf %94, %97 : vector<8x160xf32>
    %cst_46 = arith.constant 0.000000e+00 : f32
    %99 = vector.broadcast %cst_46 : f32 to vector<8x160xf32>
    %100 = arith.maximumf %98, %99 : vector<8x160xf32>
    %101 = arith.truncf %100 : vector<8x160xf32> to vector<8x160xbf16>
    %c3_47 = arith.constant 3 : index
    %c0_48 = arith.constant 0 : index
    %c0_49 = arith.constant 0 : index
    %102 = vector.load %arg7[%c3_47, %c0_48, %c0_49] : memref<4x160x50xbf16, #tpu.memory_space<vmem>>, vector<1x160x50xbf16>
    %103 = vector.shape_cast %102 : vector<1x160x50xbf16> to vector<160x50xbf16>
    %cst_50 = arith.constant dense<0.000000e+00> : vector<8x50xf32>
    %104 = tpu.matmul %101, %103, %cst_50 {dimension_numbers = #tpu.dot_dimension_numbers<[1], [0], [0], [1], [0, 0, 1, 1], [], []>} : vector<8x160xbf16>, vector<160x50xbf16>, vector<8x50xf32> -> vector<8x50xf32>
    %105 = arith.addf %91, %104 : vector<8x50xf32>
    %cst_51 = arith.constant 0.000000e+00 : f32
    %106 = vector.broadcast %cst_51 : f32 to vector<8x50xf32>
    %107 = arith.maximumf %105, %106 : vector<8x50xf32>
    %c0_52 = arith.constant 0 : index
    %c0_53 = arith.constant 0 : index
    %108 = vector.load %arg9[%c0_52, %c0_53] : memref<50x10xf32, #tpu.memory_space<vmem>>, vector<50x10xf32>
    %cst_54 = arith.constant dense<0.000000e+00> : vector<8x10xf32>
    %109 = tpu.matmul %107, %108, %cst_54 {dimension_numbers = #tpu.dot_dimension_numbers<[1], [0], [0], [1], [0, 0, 1, 1], [], []>} : vector<8x50xf32>, vector<50x10xf32>, vector<8x10xf32> -> vector<8x10xf32>
    %c0_55 = arith.constant 0 : index
    %c0_56 = arith.constant 0 : index
    %110 = vector.load %arg10[%c0_55, %c0_56] : memref<1x10xf32, #tpu.memory_space<vmem>>, vector<1x10xf32>
    %111 = vector.broadcast %110 : vector<1x10xf32> to vector<8x10xf32>
    %112 = arith.addf %109, %111 : vector<8x10xf32>
    %cst_57 = arith.constant dense<0xFF800000> : vector<8xf32>
    %113 = vector.multi_reduction <maximumf>, %112, %cst_57 [1] : vector<8x10xf32> to vector<8xf32>
    %114 = vector.shape_cast %113 : vector<8xf32> to vector<8x1xf32>
    %115 = vector.broadcast %114 : vector<8x1xf32> to vector<8x10xf32>
    %116 = arith.subf %112, %115 : vector<8x10xf32>
    %117 = math.exp %116 : vector<8x10xf32>
    %cst_58 = arith.constant dense<0.000000e+00> : vector<8xf32>
    %118 = vector.multi_reduction <add>, %117, %cst_58 [1] : vector<8x10xf32> to vector<8xf32>
    %119 = vector.shape_cast %118 : vector<8xf32> to vector<8x1xf32>
    %120 = math.log %119 : vector<8x1xf32>
    %121 = vector.broadcast %120 : vector<8x1xf32> to vector<8x10xf32>
    %122 = arith.subf %116, %121 : vector<8x10xf32>
    %c0_59 = arith.constant 0 : index
    %c0_60 = arith.constant 0 : index
    %123 = vector.load %arg11[%c0_59, %c0_60] : memref<8x10xf32, #tpu.memory_space<vmem>>, vector<8x10xf32>
    tpu.vector_store %arg11[%c0_59, %c0_60], %122 {strides = array<i32>} : memref<8x10xf32, #tpu.memory_space<vmem>>, vector<8x10xf32>,
    return
  }
  func.func @transform_0(%arg0: i32) -> (i32, i32) {
    %c0_i32 = arith.constant 0 : i32
    %c0_i32_0 = arith.constant 0 : i32
    return %arg0, %c0_i32 : i32, i32
  }
  func.func @transform_1(%arg0: i32) -> (i32, i32) {
    %c0_i32 = arith.constant 0 : i32
    %c0_i32_0 = arith.constant 0 : i32
    return %arg0, %c0_i32 : i32, i32
  }
  func.func @transform_2(%arg0: i32) -> (i32, i32) {
    %c0_i32 = arith.constant 0 : i32
    %c0_i32_0 = arith.constant 0 : i32
    %c0_i32_1 = arith.constant 0 : i32
    return %c0_i32, %c0_i32_0 : i32, i32
  }
  func.func @transform_3(%arg0: i32) -> (i32, i32) {
    %c0_i32 = arith.constant 0 : i32
    %c0_i32_0 = arith.constant 0 : i32
    %c0_i32_1 = arith.constant 0 : i32
    return %c0_i32, %c0_i32_0 : i32, i32
  }
  func.func @transform_4(%arg0: i32) -> (i32, i32, i32) {
    %c0_i32 = arith.constant 0 : i32
    %c0_i32_0 = arith.constant 0 : i32
    %c0_i32_1 = arith.constant 0 : i32
    %c0_i32_2 = arith.constant 0 : i32
    return %c0_i32, %c0_i32_0, %c0_i32_1 : i32, i32, i32
  }
  func.func @transform_5(%arg0: i32) -> (i32, i32) {
    %c0_i32 = arith.constant 0 : i32
    %c0_i32_0 = arith.constant 0 : i32
    %c0_i32_1 = arith.constant 0 : i32
    return %c0_i32, %c0_i32_0 : i32, i32
  }
  func.func @transform_6(%arg0: i32) -> (i32, i32, i32) {
    %c0_i32 = arith.constant 0 : i32
    %c0_i32_0 = arith.constant 0 : i32
    %c0_i32_1 = arith.constant 0 : i32
    %c0_i32_2 = arith.constant 0 : i32
    return %c0_i32, %c0_i32_0, %c0_i32_1 : i32, i32, i32
  }
  func.func @transform_7(%arg0: i32) -> (i32, i32) {
    %c0_i32 = arith.constant 0 : i32
    %c0_i32_0 = arith.constant 0 : i32
    %c0_i32_1 = arith.constant 0 : i32
    return %c0_i32, %c0_i32_0 : i32, i32
  }
  func.func @transform_8(%arg0: i32) -> (i32, i32) {
    %c0_i32 = arith.constant 0 : i32
    %c0_i32_0 = arith.constant 0 : i32
    %c0_i32_1 = arith.constant 0 : i32
    return %c0_i32, %c0_i32_0 : i32, i32
  }
  func.func @transform_9(%arg0: i32) -> (i32, i32) {
    %c0_i32 = arith.constant 0 : i32
    %c0_i32_0 = arith.constant 0 : i32
    %c0_i32_1 = arith.constant 0 : i32
    return %c0_i32, %c0_i32_0 : i32, i32
  }
  func.func @transform_10(%arg0: i32) -> (i32, i32) {
    %c0_i32 = arith.constant 0 : i32
    %c0_i32_0 = arith.constant 0 : i32
    return %arg0, %c0_i32 : i32, i32
  }
}

</mosaic_0001>

<bundles_post_ra>
// kernel: net_forward.1
= control target key start
LH: loop header
LB: loop body
LE: loop exit
PB: predicated region body
PF: predicated region fallthrough
CT: control target
= control target key end

     0   :  { %vm227_vm0 = vcmask 1045504   ;;  %vm208_vm1 = vcmask 97280   ;;  %s4517_s15 = smov 102   ;;  %vm726_vm2 = vcmask 965632   ;;  %vm799_vm3 = vcmask 834560   ;;  %s4519_s11 = smov 12   ;;  %s6734_s2 = inlined_call_operand.vmem [shape: bf16[140,240], index: 2, kind: input, shape index: {}]   ;;  %s6735_s0 = inlined_call_operand.vmem [shape: bf16[96,140], index: 0, kind: input, shape index: {}]   ;;  %s6736_s1 = inlined_call_operand.vmem [shape: bf16[96,140], index: 1, kind: input, shape index: {}]   ;;  %s6737_s4 = inlined_call_operand.vmem [shape: bf16[5,240,160], index: 4, kind: input, shape index: {}]   ;;  %s6738_s3 = inlined_call_operand.vmem [shape: f32[1,240], index: 3, kind: input, shape index: {}]   ;;  %s6739_s5 = inlined_call_operand.vmem [shape: f32[1,160], index: 5, kind: input, shape index: {}]   ;;  %s6740_s6 = inlined_call_operand.vmem [shape: bf16[4,160,50], index: 6, kind: input, shape index: {}]   ;;  %s6741_s7 = inlined_call_operand.vmem [shape: f32[1,50], index: 7, kind: input, shape index: {}]   ;;  %s6742_s9 = inlined_call_operand.vmem [shape: f32[1,10], index: 9, kind: input, shape index: {}]   ;;  %s6743_s8 = inlined_call_operand.vmem [shape: f32[50,10], index: 8, kind: input, shape index: {}]   ;;  %s6744_s10 = inlined_call_operand.vmem [shape: f32[8,10], index: 10, kind: output, shape index: {}]  }
   0x1   :  { %v3197_v0 = vld [vmem:[%s6734_s2 + $0x70] sm:$0xf]  ;;  %v4296_v1 = vld [vmem:[%s6734_s2 + $0x74] sm:$0xf0]  ;;  %v4295_v2 = vld [vmem:[%s6734_s2 + $0x74] sm:$0xf] }
   0x2   :  { %v3198_v3 = vor.u32 %v4296_v1, %v3197_v0  ;;  %v3199_v4 = vld [vmem:[%s6734_s2 + $0x78] sm:$0xf0]  ;;  %v4297_v5 = vld [vmem:[%s6734_s2 + $0x84] sm:$0xf]  ;;  %v3207_v6 = vld [vmem:[%s6734_s2 + $0x88] sm:$0x30] }
   0x3   :  { %v4593_v7 = vor.u32 %v4295_v2, %v3199_v4  ;;  %v3210_v8 = vor.u32 %v4297_v5, %v3207_v6  ;;  %v3189_v9 = vld [vmem:[%s6734_s2 + $0x60] sm:$0xf]  ;;  %v4294_v10 = vld [vmem:[%s6734_s2 + $0x64] sm:$0xf0]  ;;  %v4293_v11 = vld [vmem:[%s6734_s2 + $0x64] sm:$0xf] }
   0x4   :  { %234 = vmatpush.bf16.msra.mxu0 %v3198_v3  ;;  %v3190_v12 = vor.u32 %v4294_v10, %v3189_v9  ;;  %v3191_v13 = vld [vmem:[%s6734_s2 + $0x68] sm:$0xf0]  ;;  %v4269_v14 = vld [vmem:[%s6735_s0 + $0x4] sm:$0xf]  ;;  %v3205_v19 = vld [vmem:[%s6734_s2 + $0x80] sm:$0xf] }
   0x5   :  { %v3095_v15 = vld [vmem:[%s6735_s0 + $0x8] sm:$0xf0]  ;;  %312 = vmatpush.bf16.msra.mxu2 %v4593_v7  ;;  %v4615_v16 = vsel %vm227_vm0, %v3210_v8, 0  ;;  %v4617_v17 = vor.u32 %v4293_v11, %v3191_v13  ;;  %v4298_v20 = vld [vmem:[%s6734_s2 + $0x84] sm:$0x30]  ;;  %vm1117_vm4 = vcmask 916480  }
   0x6   :  { %v3098_v18 = vor.u32 %v4269_v14, %v3095_v15  ;;  %358 = vmatpush.bf16.msra.mxu3 %v4615_v16  ;;  %v3206_v21 = vor.u32 %v4298_v20, %v3205_v19  ;;  %v3181_v22 = vld [vmem:[%s6734_s2 + $0x50] sm:$0xf]  ;;  %v4292_v23 = vld [vmem:[%s6734_s2 + $0x54] sm:$0xf0]  ;;  %v4291_v24 = vld [vmem:[%s6734_s2 + $0x54] sm:$0xf] }
   0x7   :  { %v3183_v25 = vld [vmem:[%s6734_s2 + $0x58] sm:$0xf0]  ;;  %v3182_v27 = vor.u32 %v4292_v23, %v3181_v22  ;;  %v3173_v29 = vld [vmem:[%s6734_s2 + $0x40] sm:$0xf]  ;;  %v4290_v30 = vld [vmem:[%s6734_s2 + $0x44] sm:$0xf0] }
   0x8   :  { %235 = vmatpush.bf16.msra.mxu0 %v3190_v12  ;;  %v229_v26 = vsel %vm227_vm0, %v3206_v21, 0  ;;  %v4641_v28 = vor.u32 %v4291_v24, %v3183_v25  ;;  %v4289_v31 = vld [vmem:[%s6734_s2 + $0x44] sm:$0xf]  ;;  %v3175_v32 = vld [vmem:[%s6734_s2 + $0x48] sm:$0xf0]  ;;  %v3174_v33 = vor.u32 %v4290_v30, %v3173_v29  ;;  %vm2509_vm5 = vcmask 883712  }
   0x9   :  { %313 = vmatpush.bf16.msra.mxu2 %v4617_v17  ;;  %3217 = vmatmul.msk.bf16.vlgmr.msra.gmra.mxu3 %vm208_vm1, %v3098_v18  ;;  %v4657_v34 = vor.u32 %v4289_v31, %v3175_v32  ;;  %v3165_v35 = vld [vmem:[%s6734_s2 + $0x30] sm:$0xf]  ;;  %v4288_v36 = vld [vmem:[%s6734_s2 + $0x34] sm:$0xf0]  ;;  %v4287_v37 = vld [vmem:[%s6734_s2 + $0x34] sm:$0xf] }
   0xa   :  { %280 = vmatpush.bf16.msra.mxu1 %v229_v26  ;;  %520 = vmatpush.bf16.msrb.mxu3 %v229_v26  ;;  %v3167_v38 = vld [vmem:[%s6734_s2 + $0x38] sm:$0xf0]  ;;  %v3166_v39 = vor.u32 %v4288_v36, %v3165_v35  ;;  %v3157_v41 = vld [vmem:[%s6734_s2 + $0x20] sm:$0xf]  ;;  %v4286_v42 = vld [vmem:[%s6734_s2 + $0x24] sm:$0xf0] }
   0xb   :  { %v3170_v40 = vor.u32 %v4287_v37, %v3167_v38  ;;  %v4285_v43 = vld [vmem:[%s6734_s2 + $0x24] sm:$0xf]  ;;  %v3159_v44 = vld [vmem:[%s6734_s2 + $0x28] sm:$0xf0]  ;;  %v4271_v45 = vld [vmem:[%s6735_s0 + $0x14] sm:$0xf]  ;;  %v3158_v47 = vor.u32 %v4286_v42, %v3157_v41 }
   0xc   :  { %236 = vmatpush.bf16.msra.mxu0 %v3182_v27  ;;  %v3103_v46 = vld [vmem:[%s6735_s0 + $0x18] sm:$0xf0]  ;;  %v3162_v48 = vor.u32 %v4285_v43, %v3159_v44  ;;  %v3149_v50 = vld [vmem:[%s6734_s2 + $0x10] sm:$0xf]  ;;  %v4284_v51 = vld [vmem:[%s6734_s2 + $0x14] sm:$0xf0] }
   0xd   :  { %314 = vmatpush.bf16.msra.mxu2 %v4641_v28  ;;  %3211 = vmatmul.msk.bf16.vlgmr.msra.gmra.mxu1 %vm208_vm1, %v3098_v18  ;;  %v3106_v49 = vor.u32 %v4271_v45, %v3103_v46  ;;  %v4283_v52 = vld [vmem:[%s6734_s2 + $0x14] sm:$0xf]  ;;  %v3151_v53 = vld [vmem:[%s6734_s2 + $0x18] sm:$0xf0]  ;;  %v3150_v54 = vor.u32 %v4284_v51, %v3149_v50  ;;  %v3141_v56 = vld [vmem:[%s6734_s2] sm:$0xf] }
   0xe   :  { %474 = vmatpush.bf16.msrb.mxu1 %v3198_v3  ;;  %v3154_v55 = vor.u32 %v4283_v52, %v3151_v53  ;;  %v4282_v57 = vld [vmem:[%s6734_s2 + $0x4] sm:$0xf0]  ;;  %v4281_v58 = vld [vmem:[%s6734_s2 + $0x4] sm:$0xf]  ;;  %v3143_v59 = vld [vmem:[%s6734_s2 + $0x8] sm:$0xf0] }
   0xf   :  { %v3142_v60 = vor.u32 %v4282_v57, %v3141_v56  ;;  %v3093_v61 = vld [vmem:[%s6735_s0] sm:$0xf]  ;;  %v4270_v62 = vld [vmem:[%s6735_s0 + $0x4] sm:$0xf0]  ;;  %v3146_v63 = vor.u32 %v4281_v58, %v3143_v59  ;;  %v4273_v1 = vld [vmem:[%s6735_s0 + $0x24] sm:$0xf] }
  0x10   :  { %237 = vmatpush.bf16.msra.mxu0 %v3174_v33  ;;  %v3094_v0 = vor.u32 %v4270_v62, %v3093_v61  ;;  %v3111_v2 = vld [vmem:[%s6735_s0 + $0x28] sm:$0xf0]  ;;  %v3101_v4 = vld [vmem:[%s6735_s0 + $0x10] sm:$0xf]  ;;  %v4272_v5 = vld [vmem:[%s6735_s0 + $0x14] sm:$0xf0] }
  0x11   :  { %315 = vmatpush.bf16.msra.mxu2 %v4657_v34  ;;  %v3114_v3 = vor.u32 %v4273_v1, %v3111_v2  ;;  %v3102_v6 = vor.u32 %v4272_v5, %v3101_v4  ;;  %v3119_v8 = vld [vmem:[%s6735_s0 + $0x38] sm:$0xf0]  ;;  %v3109_v10 = vld [vmem:[%s6735_s0 + $0x20] sm:$0xf]  ;;  %v4274_v11 = vld [vmem:[%s6735_s0 + $0x24] sm:$0xf0] }
  0x12   :  { %475 = vmatpush.bf16.msrb.mxu1 %v3190_v12  ;;  %v3110_v12 = vor.u32 %v4274_v11, %v3109_v10  ;;  %v4277_v13 = vld [vmem:[%s6735_s0 + $0x44] sm:$0xf]  ;;  %v3127_v14 = vld [vmem:[%s6735_s0 + $0x48] sm:$0xf0]  ;;  %v4279_v19 = vld [vmem:[%s6735_s0 + $0x54] sm:$0xf] }
  0x13   :  { %v3130_v15 = vor.u32 %v4277_v13, %v3127_v14  ;;  %v3135_v20 = vld [vmem:[%s6735_s0 + $0x58] sm:$0xf0]  ;;  %v3125_v22 = vld [vmem:[%s6735_s0 + $0x40] sm:$0xf]  ;;  %v4278_v23 = vld [vmem:[%s6735_s0 + $0x44] sm:$0xf0] }
  0x14   :  { %238 = vmatpush.bf16.msra.mxu0 %v3166_v39  ;;  %v3138_v21 = vor.u32 %v4279_v19, %v3135_v20  ;;  %v3126_v24 = vor.u32 %v4278_v23, %v3125_v22  ;;  %v4299_v25 = vld [vmem:[%s6736_s1 + $0x4] sm:$0xf]  ;;  %v3227_v26 = vld [vmem:[%s6736_s1 + $0x8] sm:$0xf0]  ;;  %v4300_v29 = vld [vmem:[%s6736_s1 + $0x4] sm:$0xf0] }
  0x15   :  { %316 = vmatpush.bf16.msra.mxu2 %v3170_v40  ;;  %v3133_v31 = vld [vmem:[%s6735_s0 + $0x50] sm:$0xf]  ;;  %v4280_v32 = vld [vmem:[%s6735_s0 + $0x54] sm:$0xf0]  ;;  %v3235_v35 = vld [vmem:[%s6736_s1 + $0x18] sm:$0xf0] }
  0x16   :  { %476 = vmatpush.bf16.msrb.mxu1 %v3182_v27  ;;  %v3230_v27 = vor.u32 %v4299_v25, %v3227_v26  ;;  %v3233_v37 = vld [vmem:[%s6736_s1 + $0x10] sm:$0xf]  ;;  %v4302_v38 = vld [vmem:[%s6736_s1 + $0x14] sm:$0xf0]  ;;  %v3243_v41 = vld [vmem:[%s6736_s1 + $0x28] sm:$0xf0] }
  0x17   :  { %v3241_v43 = vld [vmem:[%s6736_s1 + $0x20] sm:$0xf]  ;;  %v4304_v44 = vld [vmem:[%s6736_s1 + $0x24] sm:$0xf0]  ;;  %v3251_v50 = vld [vmem:[%s6736_s1 + $0x38] sm:$0xf0] }
  0x18   :  { %239 = vmatpush.bf16.msra.mxu0 %v3158_v47  ;;  %v3242_v45 = vor.u32 %v4304_v44, %v3241_v43  ;;  %v3249_v53 = vld [vmem:[%s6736_s1 + $0x30] sm:$0xf]  ;;  %v4307_v61 = vld [vmem:[%s6736_s1 + $0x44] sm:$0xf]  ;;  %v3259_v62 = vld [vmem:[%s6736_s1 + $0x48] sm:$0xf0] }
  0x19   :  { %317 = vmatpush.bf16.msra.mxu2 %v3162_v48  ;;  %3218 = vmatmul.msk.bf16.gmra.mxu3 %vm208_vm1, %v3106_v49  ;;  %v3257_v1 = vld [vmem:[%s6736_s1 + $0x40] sm:$0xf]  ;;  %v4308_v2 = vld [vmem:[%s6736_s1 + $0x44] sm:$0xf0]  ;;  %v4309_v13 = vld [vmem:[%s6736_s1 + $0x54] sm:$0xf] }
  0x1a   :  { %477 = vmatpush.bf16.msrb.mxu1 %v3174_v33  ;;  %v3134_v33 = vor.u32 %v4280_v32, %v3133_v31  ;;  %v3267_v14 = vld [vmem:[%s6736_s1 + $0x58] sm:$0xf0]  ;;  %vm2603_vm6 = vcmask 261120   ;;  %vm3049_vm7 = vcmask 1041408   ;;  %vm3045_vm8 = vcmask 408576  }
  0x1b   :  { %vm3073_vm9 = vcmask 80896  }
  0x1c   :  { %240 = vmatpush.bf16.msra.mxu0 %v3150_v54 }
  0x1d   :  { %318 = vmatpush.bf16.msra.mxu2 %v3154_v55  ;;  %3212 = vmatmul.msk.bf16.gmra.mxu1 %vm208_vm1, %v3106_v49  ;;  %v4305_v49 = vld [vmem:[%s6736_s1 + $0x34] sm:$0xf] }
  0x1e   :  { %478 = vmatpush.bf16.msrb.mxu1 %v3166_v39  ;;  %v3234_v39 = vor.u32 %v4302_v38, %v3233_v37  ;;  %v3254_v52 = vor.u32 %v4305_v49, %v3251_v50 }
  0x20   :  { %241 = vmatpush.bf16.msra.mxu0 %v3142_v60 }
  0x21   :  { %319 = vmatpush.bf16.msra.mxu2 %v3146_v63 }
  0x22   :  { %479 = vmatpush.bf16.msrb.mxu1 %v3158_v47 }
  0x23   :  { %242 = vmatmul.bf16.vlgmr.msra.gmra.mxu0 %v3094_v0 }
  0x24   :  { %552 = vmatpush.bf16.msrb.mxu0 %v4593_v7  ;;  %320 = vmatmul.bf16.vlgmr.msra.gmra.mxu2 %v3094_v0  ;;  %v4275_v7 = vld [vmem:[%s6735_s0 + $0x34] sm:$0xf]  ;;  %v3262_v0 = vor.u32 %v4307_v61, %v3259_v62 }
  0x25   :  { %598 = vmatpush.bf16.msrb.mxu2 %v4615_v16  ;;  %v3122_v9 = vor.u32 %v4275_v7, %v3119_v8  ;;  %v3117_v16 = vld [vmem:[%s6735_s0 + $0x30] sm:$0xf] }
  0x26   :  { %480 = vmatpush.bf16.msrb.mxu1 %v3150_v54  ;;  %v4306_v54 = vld [vmem:[%s6736_s1 + $0x34] sm:$0xf0] }
  0x28   :  { %553 = vmatpush.bf16.msrb.mxu0 %v4617_v17  ;;  %v4276_v17 = vld [vmem:[%s6735_s0 + $0x34] sm:$0xf0] }
  0x29   :  { %3219 = vmatmul.msk.bf16.gmra.mxu3 %vm208_vm1, %v3114_v3  ;;  %v3118_v18 = vor.u32 %v4276_v17, %v3117_v16  ;;  %v3270_v16 = vor.u32 %v4309_v13, %v3267_v14  ;;  %v3265_v17 = vld [vmem:[%s6736_s1 + $0x50] sm:$0xf] }
  0x2a   :  { %481 = vmatpush.bf16.msrb.mxu1 %v3142_v60 }
  0x2c   :  { %554 = vmatpush.bf16.msrb.mxu0 %v4641_v28  ;;  %v3225_v28 = vld [vmem:[%s6736_s1] sm:$0xf] }
  0x2d   :  { %3213 = vmatmul.msk.bf16.gmra.mxu1 %vm208_vm1, %v3114_v3  ;;  %v3226_v30 = vor.u32 %v4300_v29, %v3225_v28 }
  0x30   :  { %555 = vmatpush.bf16.msrb.mxu0 %v4657_v34  ;;  %v4301_v34 = vld [vmem:[%s6736_s1 + $0x14] sm:$0xf] }
  0x31   :  { %v3238_v36 = vor.u32 %v4301_v34, %v3235_v35 }
  0x33   :  { %247 = vmatmul.bf16.gmra.mxu0 %v3102_v6 }
  0x34   :  { %556 = vmatpush.bf16.msrb.mxu0 %v3170_v40  ;;  %325 = vmatmul.bf16.gmra.mxu2 %v3102_v6  ;;  %v4303_v40 = vld [vmem:[%s6736_s1 + $0x24] sm:$0xf]  ;;  %v3258_v6 = vor.u32 %v4308_v2, %v3257_v1 }
  0x35   :  { %v3246_v42 = vor.u32 %v4303_v40, %v3243_v41 }
  0x38   :  { %557 = vmatpush.bf16.msrb.mxu0 %v3162_v48 }
  0x39   :  { %3220 = vmatmul.msk.bf16.gmra.mxu3 %vm208_vm1, %v3122_v9 }
  0x3c   :  { %558 = vmatpush.bf16.msrb.mxu0 %v3154_v55  ;;  %v3250_v55 = vor.u32 %v4306_v54, %v3249_v53 }
  0x3d   :  { %3214 = vmatmul.msk.bf16.gmra.mxu1 %vm208_vm1, %v3122_v9 }
  0x40   :  { %559 = vmatpush.bf16.msrb.mxu0 %v3146_v63 }
  0x43   :  { %252 = vmatmul.bf16.gmra.mxu0 %v3110_v12 }
  0x44   :  { %330 = vmatmul.bf16.gmra.mxu2 %v3110_v12 }
  0x49   :  { %3221 = vmatmul.msk.bf16.gmra.mxu3 %vm208_vm1, %v3130_v15 }
  0x4d   :  { %3215 = vmatmul.msk.bf16.gmra.mxu1 %vm208_vm1, %v3130_v15 }
  0x53   :  { %257 = vmatmul.bf16.gmra.mxu0 %v3118_v18 }
  0x54   :  { %335 = vmatmul.bf16.gmra.mxu2 %v3118_v18  ;;  %v4310_v18 = vld [vmem:[%s6736_s1 + $0x54] sm:$0xf0]  ;;  %s4516_s1 = smov 118  }
  0x55   :  { %v3266_v22 = vor.u32 %v4310_v18, %v3265_v17 }
  0x59   :  { %3222 = vmatmul.msk.bf16.gmra.mxu3 %vm208_vm1, %v3138_v21 }
  0x5d   :  { %3216 = vmatmul.msk.bf16.gmra.mxu1 %vm208_vm1, %v3138_v21 }
  0x63   :  { %262 = vmatmul.bf16.gmra.mxu0 %v3126_v24 }
  0x64   :  { %340 = vmatmul.bf16.gmra.mxu2 %v3126_v24 }
  0x69   :  { %3271 = vmatmul.msk.bf16.vlgmr.msrb.gmra.mxu3 %vm208_vm1, %v3230_v27 }
  0x6d   :  { %482 = vmatmul.bf16.vlgmr.msrb.gmra.mxu1 %v3226_v30 }
  0x73   :  { %267 = vmatmul.bf16.gmra.mxu0 %v3134_v33 }
  0x74   :  { %345 = vmatmul.bf16.gmra.mxu2 %v3134_v33 }
  0x79   :  { %3272 = vmatmul.msk.bf16.gmra.mxu3 %vm208_vm1, %v3238_v36 }
  0x7d   :  { %487 = vmatmul.bf16.gmra.mxu1 %v3234_v39 }
  0x83   :  { %560 = vmatmul.bf16.vlgmr.msrb.gmra.mxu0 %v3226_v30 }
  0x84   :  { %3277 = vmatmul.msk.bf16.vlgmr.msrb.gmra.mxu2 %vm208_vm1, %v3230_v27 }
  0x89   :  { %3273 = vmatmul.msk.bf16.gmra.mxu3 %vm208_vm1, %v3246_v42 }
  0x8a   :  { %v282_v46 = vpop.f32.mrf.mxu1 }
  0x8c   :  { %v360_v47 = vpop.f32.mrf.mxu3 }
  0x8d   :  { %492 = vmatmul.bf16.gmra.mxu1 %v3242_v45 }
  0x92   :  { %v4829_v48 = vpop.f32.mrf.mxu1 }
  0x93   :  { %565 = vmatmul.bf16.gmra.mxu0 %v3234_v39 }
  0x94   :  { %v4837_v51 = vpop.f32.mrf.mxu3  ;;  %3278 = vmatmul.msk.bf16.gmra.mxu2 %vm208_vm1, %v3238_v36 }
  0x99   :  { %3274 = vmatmul.msk.bf16.gmra.mxu3 %vm208_vm1, %v3254_v52 }
  0x9a   :  { %v287_v56 = vpop.f32.mrf.mxu1 }
  0x9c   :  { %v365_v57 = vpop.f32.mrf.mxu3 }
  0x9d   :  { %497 = vmatmul.bf16.gmra.mxu1 %v3250_v55 }
  0xa0   :  { %v243_v58 = vpop.f32.mrf.mxu0 }
  0xa1   :  { %v4847_v59 = vadd.f32 %v282_v46, %v243_v58 }
  0xa2   :  { %v4849_v60 = vpop.f32.mrf.mxu1 }
  0xa3   :  { %570 = vmatmul.bf16.gmra.mxu0 %v3242_v45 }
  0xa4   :  { %v4857_v63 = vpop.f32.mrf.mxu3  ;;  %3279 = vmatmul.msk.bf16.gmra.mxu2 %vm208_vm1, %v3246_v42 }
  0xa7   :  { %v321_v3 = vpop.f32.mrf.mxu2 }
  0xa8   :  { %v4866_v4 = vadd.f32 %v360_v47, %v321_v3  ;;  %v4868_v5 = vpop.f32.mrf.mxu0 }
  0xa9   :  { %3275 = vmatmul.msk.bf16.gmra.mxu3 %vm208_vm1, %v3262_v0  ;;  %v285_v3 = vadd.f32 %v4829_v48, %v4868_v5 }
  0xaa   :  { %v292_v7 = vpop.f32.mrf.mxu1 }
  0xac   :  { %v370_v8 = vpop.f32.mrf.mxu3 }
  0xad   :  { %502 = vmatmul.bf16.gmra.mxu1 %v3258_v6 }
  0xaf   :  { %v4871_v9 = vpop.f32.mrf.mxu2 }
  0xb0   :  { %v248_v10 = vpop.f32.mrf.mxu0 }
  0xb1   :  { %v4873_v11 = vadd.f32 %v287_v56, %v248_v10 }
  0xb2   :  { %v4875_v12 = vpop.f32.mrf.mxu1 }
  0xb3   :  { %575 = vmatmul.bf16.gmra.mxu0 %v3250_v55 }
  0xb4   :  { %v4883_v15 = vpop.f32.mrf.mxu3  ;;  %3280 = vmatmul.msk.bf16.gmra.mxu2 %vm208_vm1, %v3254_v52 }
  0xb7   :  { %v326_v19 = vpop.f32.mrf.mxu2 }
  0xb8   :  { %v4892_v20 = vadd.f32 %v365_v57, %v326_v19  ;;  %v4894_v21 = vpop.f32.mrf.mxu0 }
  0xb9   :  { %3276 = vmatmul.msk.bf16.gmra.mxu3 %vm208_vm1, %v3270_v16 }
  0xba   :  { %v297_v23 = vpop.f32.mrf.mxu1 }
  0xbc   :  { %v375_v24 = vpop.f32.mrf.mxu3 }
  0xbd   :  { %507 = vmatmul.bf16.gmra.mxu1 %v3266_v22 }
  0xbf   :  { %v4897_v25 = vpop.f32.mrf.mxu2 }
  0xc0   :  { %v253_v26 = vpop.f32.mrf.mxu0 }
  0xc1   :  { %v4899_v27 = vadd.f32 %v292_v7, %v253_v26 }
  0xc2   :  { %v4901_v28 = vpop.f32.mrf.mxu1 }
  0xc3   :  { %580 = vmatmul.bf16.gmra.mxu0 %v3258_v6 }
  0xc4   :  { %v4903_v29 = vpop.f32.mrf.mxu3  ;;  %3281 = vmatmul.msk.bf16.gmra.mxu2 %vm208_vm1, %v3262_v0 }
  0xc7   :  { %v331_v30 = vpop.f32.mrf.mxu2 }
  0xc8   :  { %v4906_v31 = vadd.f32 %v370_v8, %v331_v30  ;;  %v4908_v32 = vpop.f32.mrf.mxu0 }
  0xca   :  { %v302_v33 = vpop.f32.mrf.mxu1 }
  0xcc   :  { %v380_v34 = vpop.f32.mrf.mxu3 }
  0xcf   :  { %v4910_v35 = vpop.f32.mrf.mxu2 }
  0xd0   :  { %v258_v36 = vpop.f32.mrf.mxu0 }
  0xd1   :  { %v4912_v37 = vadd.f32 %v297_v23, %v258_v36 }
  0xd2   :  { %v4914_v38 = vpop.f32.mrf.mxu1 }
  0xd3   :  { %585 = vmatmul.bf16.gmra.mxu0 %v3266_v22  ;;  %v290_v22 = vadd.f32 %v4849_v60, %v4894_v21  ;;  %v363_v60 = vadd.f32 %v4837_v51, %v4871_v9 }
  0xd4   :  { %v4916_v39 = vpop.f32.mrf.mxu3  ;;  %3282 = vmatmul.msk.bf16.gmra.mxu2 %vm208_vm1, %v3270_v16 }
  0xd7   :  { %v336_v40 = vpop.f32.mrf.mxu2 }
  0xd8   :  { %v4919_v41 = vadd.f32 %v375_v24, %v336_v40  ;;  %v4921_v42 = vpop.f32.mrf.mxu0 }
  0xda   :  { %v307_v43 = vpop.f32.mrf.mxu1 }
  0xdc   :  { %v385_v44 = vpop.f32.mrf.mxu3 }
  0xdf   :  { %v4923_v45 = vpop.f32.mrf.mxu2 }
  0xe0   :  { %v263_v46 = vpop.f32.mrf.mxu0 }
  0xe1   :  { %v4925_v47 = vadd.f32 %v302_v33, %v263_v46 }
  0xe2   :  { %v4927_v49 = vpop.f32.mrf.mxu1 }
  0xe4   :  { %v4929_v50 = vpop.f32.mrf.mxu3 }
  0xe7   :  { %v341_v52 = vpop.f32.mrf.mxu2 }
  0xe8   :  { %v4931_v53 = vadd.f32 %v380_v34, %v341_v52  ;;  %v4933_v54 = vpop.f32.mrf.mxu0 }
  0xea   :  { %v483_v55 = vpop.f32.mrf.mxu1 }
  0xec   :  { %v522_v56 = vpop.f32.mrf.mxu3 }
  0xed   :  { %v523_v57 = vadd.f32 %v522_v56, %v483_v55 }
  0xef   :  { %v4936_v58 = vmax.f32 %v4847_v59, %v523_v57  ;;  %v4938_v61 = vpop.f32.mrf.mxu2 }
  0xf0   :  { %v268_v62 = vpop.f32.mrf.mxu0 }
  0xf1   :  { %v4940_v0 = vadd.f32 %v307_v43, %v268_v62 }
  0xf2   :  { %v485_v1 = vpop.f32.mrf.mxu1 }
  0xf4   :  { %v524_v2 = vpop.f32.mrf.mxu3 }
  0xf5   :  { %v525_v6 = vadd.f32 %v524_v2, %v485_v1 }
  0xf7   :  { %v4944_v7 = vmax.f32 %v285_v3, %v525_v6  ;;  %v346_v8 = vpop.f32.mrf.mxu2  ;;  %v4369_v3 = vld [vmem:[%s6737_s4 + $0x1d4] sm:$0xf] }
  0xf8   :  { %v4946_v10 = vadd.f32 %v385_v44, %v346_v8  ;;  %v4948_v13 = vpop.f32.mrf.mxu0 }
  0xf9   :  { %682 = vrot.lane.b32.xlu2 %v4944_v7, %s4516_s1  ;;  %765 = vrot.lane.b32.xlu1 %v4944_v7, %s4517_s15 }
  0xfa   :  { %v488_v59 = vpop.f32.mrf.mxu1 }
  0xfc   :  { %v527_v14 = vpop.f32.mrf.mxu3 }
  0xfd   :  { %v528_v16 = vadd.f32 %v527_v14, %v488_v59 }
  0xff   :  { %v4955_v48 = vmax.f32 %v4873_v11, %v528_v16  ;;  %v4957_v5 = vpop.f32.mrf.mxu2 }
 0x100   :  { %v561_v17 = vpop.f32.mrf.mxu0 }
 0x101   :  { %686 = vrot.lane.b32.xlu2 %v4955_v48, %s4516_s1  ;;  %767 = vrot.lane.b32.xlu1 %v4955_v48, %s4517_s15 }
 0x102   :  { %v490_v18 = vpop.f32.mrf.mxu1 }
 0x104   :  { %v529_v19 = vpop.f32.mrf.mxu3 }
 0x105   :  { %v530_v23 = vadd.f32 %v529_v19, %v490_v18  ;;  %v4370_v18 = vld [vmem:[%s6737_s4 + $0x1d4] sm:$0xf0]  ;;  %v4355_v19 = vld [vmem:[%s6737_s4 + $0x164] sm:$0xf] }
 0x107   :  { %v4965_v24 = vmax.f32 %v290_v22, %v530_v23  ;;  %v600_v26 = vpop.f32.mrf.mxu2  ;;  %v3373_v22 = vld [vmem:[%s6737_s4 + $0x168] sm:$0xf0] }
 0x108   :  { %v601_v11 = vadd.f32 %v600_v26, %v561_v17  ;;  %v563_v30 = vpop.f32.mrf.mxu0  ;;  %v3427_v17 = vld [vmem:[%s6737_s4 + $0x1d0] sm:$0xf]  ;;  %v3376_v26 = vor.u32 %v4355_v19, %v3373_v22 }
 0x109   :  { %769 = vrot.lane.b32.xlu2 %v4965_v24, %s4517_s15 }
 0x10a   :  { %v4970_v33 = vmax.f32 %v4866_v4, %v601_v11  ;;  %v493_v34 = vpop.f32.mrf.mxu1  ;;  %v300_v11 = vadd.f32 %v4901_v28, %v4921_v42  ;;  %1188 = vmatpush.bf16.msra.mxu0 %v3376_v26 }
 0x10c   :  { %v532_v36 = vpop.f32.mrf.mxu3 }
 0x10d   :  { %v533_v40 = vadd.f32 %v532_v36, %v493_v34 }
 0x10f   :  { %v4973_v43 = vmax.f32 %v4899_v27, %v533_v40  ;;  %v602_v44 = vpop.f32.mrf.mxu2  ;;  %v295_v27 = vadd.f32 %v4875_v12, %v4908_v32  ;;  %v3429_v12 = vld [vmem:[%s6737_s4 + $0x1d8] sm:$0xf0] }
 0x110   :  { %v603_v21 = vadd.f32 %v602_v44, %v563_v30  ;;  %v566_v46 = vpop.f32.mrf.mxu0  ;;  %v3432_v32 = vor.u32 %v4369_v3, %v3429_v12  ;;  %v3371_v44 = vld [vmem:[%s6737_s4 + $0x160] sm:$0xf]  ;;  %v4368_v3 = vld [vmem:[%s6737_s4 + $0x1c4] sm:$0xf0] }
 0x111   :  { %694 = vrot.lane.b32.xlu2 %v4973_v43, %s4516_s1 }
 0x112   :  { %v4979_v52 = vmax.f32 %v363_v60, %v603_v21  ;;  %v495_v55 = vpop.f32.mrf.mxu1  ;;  %1218 = vmatpush.bf16.msra.mxu2 %v3432_v32  ;;  %v4356_v60 = vld [vmem:[%s6737_s4 + $0x164] sm:$0xf0]  ;;  %v368_v21 = vadd.f32 %v4857_v63, %v4897_v25  ;;  %v3421_v63 = vld [vmem:[%s6737_s4 + $0x1c8] sm:$0xf0]  ;;  %v4353_v25 = vld [vmem:[%s6737_s4 + $0x154] sm:$0xf] }
 0x113   :  { %v3372_v28 = vor.u32 %v4356_v60, %v3371_v44  ;;  %v4351_v44 = vld [vmem:[%s6737_s4 + $0x144] sm:$0xf]  ;;  %v3357_v60 = vld [vmem:[%s6737_s4 + $0x148] sm:$0xf0] }
 0x114   :  { %v534_v4 = vpop.f32.mrf.mxu3  ;;  %684 = vrot.lane.b32.xlu0 %v4979_v52, %s4516_s1 }
 0x115   :  { %v535_v56 = vadd.f32 %v534_v4, %v495_v55  ;;  %1130 = vmatpush.bf16.msra.mxu1 %v3372_v28  ;;  %v3355_v28 = vld [vmem:[%s6737_s4 + $0x140] sm:$0xf] }
 0x117   :  { %v4985_v57 = vmax.f32 %v295_v27, %v535_v56  ;;  %v605_v62 = vpop.f32.mrf.mxu2  ;;  %v4367_v56 = vld [vmem:[%s6737_s4 + $0x1c4] sm:$0xf] }
 0x118   :  { %v606_v51 = vadd.f32 %v605_v62, %v566_v46  ;;  %v568_v9 = vpop.f32.mrf.mxu0  ;;  %v3424_v62 = vor.u32 %v4367_v56, %v3421_v63 }
 0x119   :  { %773 = vrot.lane.b32.xlu2 %v4985_v57, %s4517_s15 }
 0x11a   :  { %v4990_v1 = vmax.f32 %v4892_v20, %v606_v51  ;;  %v498_v2 = vpop.f32.mrf.mxu1  ;;  %1219 = vmatpush.bf16.msra.mxu2 %v3424_v62 }
 0x11c   :  { %v537_v6 = vpop.f32.mrf.mxu3  ;;  %688 = vrot.lane.b32.xlu0 %v4990_v1, %s4516_s1 }
 0x11d   :  { %v538_v8 = vadd.f32 %v537_v6, %v498_v2  ;;  %v3419_v2 = vld [vmem:[%s6737_s4 + $0x1c0] sm:$0xf] }
 0x11e   :  { %v3420_v32 = vor.u32 %v4368_v3, %v3419_v2 }
 0x11f   :  { %v5001_v59 = vmax.f32 %v4912_v37, %v538_v8  ;;  %v607_v20 = vpop.f32.mrf.mxu2  ;;  %v3428_v37 = vor.u32 %v4370_v18, %v3427_v17 }
 0x120   :  { %v571_v14 = vpop.f32.mrf.mxu0  ;;  %v608_v34 = vadd.f32 %v607_v20, %v568_v9  ;;  %v3363_v20 = vld [vmem:[%s6737_s4 + $0x150] sm:$0xf] }
 0x121   :  { %702 = vrot.lane.b32.xlu2 %v5001_v59, %s4516_s1  ;;  %1160 = vmatpush.bf16.msra.mxu3 %v3428_v37  ;;  %v3413_v37 = vld [vmem:[%s6737_s4 + $0x1b8] sm:$0xf0] }
 0x122   :  { %v500_v16 = vpop.f32.mrf.mxu1  ;;  %v5033_v55 = vmax.f32 %v368_v21, %v608_v34 }
 0x124   :  { %v539_v23 = vpop.f32.mrf.mxu3  ;;  %771 = vrot.lane.b32.xlu0 %v4973_v43, %s4517_s15 }
 0x125   :  { %v540_v30 = vadd.f32 %v539_v23, %v500_v16  ;;  %1161 = vmatpush.bf16.msra.mxu3 %v3420_v32  ;;  %v4363_v32 = vld [vmem:[%s6737_s4 + $0x1a4] sm:$0xf] }
 0x127   :  { %v5021_v36 = vmax.f32 %v300_v11, %v540_v30  ;;  %v610_v40 = vpop.f32.mrf.mxu2  ;;  %v373_v11 = vadd.f32 %v4883_v15, %v4910_v35  ;;  %v3411_v15 = vld [vmem:[%s6737_s4 + $0x1b0] sm:$0xf]  ;;  %v4366_v35 = vld [vmem:[%s6737_s4 + $0x1b4] sm:$0xf0] }
 0x128   :  { %v611_v46 = vadd.f32 %v610_v40, %v571_v14  ;;  %v573_v42 = vpop.f32.mrf.mxu0  ;;  %v4354_v14 = vld [vmem:[%s6737_s4 + $0x154] sm:$0xf0] }
 0x129   :  { %777 = vrot.lane.b32.xlu2 %v5021_v36, %s4517_s15  ;;  %v3364_v17 = vor.u32 %v4354_v14, %v3363_v20  ;;  %v4350_v14 = vld [vmem:[%s6737_s4 + $0x134] sm:$0xf0] }
 0x12a   :  { %v5036_v4 = vmax.f32 %v4906_v31, %v611_v46  ;;  %v503_v27 = vpop.f32.mrf.mxu1  ;;  %v3365_v31 = vld [vmem:[%s6737_s4 + $0x158] sm:$0xf0]  ;;  %v3360_v46 = vor.u32 %v4351_v44, %v3357_v60  ;;  %v3341_v60 = vld [vmem:[%s6737_s4 + $0x128] sm:$0xf0] }
 0x12b   :  { %v3368_v9 = vor.u32 %v4353_v25, %v3365_v31  ;;  %1131 = vmatpush.bf16.msra.mxu1 %v3364_v17  ;;  %v4364_v17 = vld [vmem:[%s6737_s4 + $0x1a4] sm:$0xf0] }
 0x12c   :  { %v542_v51 = vpop.f32.mrf.mxu3  ;;  %692 = vrot.lane.b32.xlu0 %v5033_v55, %s4516_s1  ;;  %696 = vrot.lane.b32.xlu1 %v5036_v4, %s4516_s1 }
 0x12d   :  { %v543_v12 = vadd.f32 %v542_v51, %v503_v27  ;;  %1189 = vmatpush.bf16.msra.mxu0 %v3368_v9  ;;  %v305_v27 = vadd.f32 %v4914_v38, %v4933_v54  ;;  %v378_v9 = vadd.f32 %v4903_v29, %v4923_v45  ;;  %v4349_v54 = vld [vmem:[%s6737_s4 + $0x134] sm:$0xf]  ;;  %v3405_v45 = vld [vmem:[%s6737_s4 + $0x1a8] sm:$0xf0] }
 0x12e   :  { %v3408_v20 = vor.u32 %v4363_v32, %v3405_v45  ;;  %v4359_v32 = vld [vmem:[%s6737_s4 + $0x184] sm:$0xf] }
 0x12f   :  { %v5061_v6 = vmax.f32 %v4925_v47, %v543_v12  ;;  %v612_v8 = vpop.f32.mrf.mxu2  ;;  %v4365_v47 = vld [vmem:[%s6737_s4 + $0x1b4] sm:$0xf]  ;;  %v3349_v12 = vld [vmem:[%s6737_s4 + $0x138] sm:$0xf0] }
 0x130   :  { %v576_v16 = vpop.f32.mrf.mxu0  ;;  %v3416_v22 = vor.u32 %v4365_v47, %v3413_v37  ;;  %v613_v23 = vadd.f32 %v612_v8, %v573_v42  ;;  %v4352_v42 = vld [vmem:[%s6737_s4 + $0x144] sm:$0xf0]  ;;  %v3352_v29 = vor.u32 %v4349_v54, %v3349_v12  ;;  %v3347_v8 = vld [vmem:[%s6737_s4 + $0x130] sm:$0xf]  ;;  %v4345_v54 = vld [vmem:[%s6737_s4 + $0x114] sm:$0xf] }
 0x131   :  { %710 = vrot.lane.b32.xlu2 %v5061_v6, %s4516_s1  ;;  %1190 = vmatpush.bf16.msra.mxu0 %v3360_v46  ;;  %v3356_v63 = vor.u32 %v4352_v42, %v3355_v28  ;;  %v4361_v46 = vld [vmem:[%s6737_s4 + $0x194] sm:$0xf]  ;;  %v3333_v12 = vld [vmem:[%s6737_s4 + $0x118] sm:$0xf0] }
 0x132   :  { %v505_v18 = vpop.f32.mrf.mxu1  ;;  %1220 = vmatpush.bf16.msra.mxu2 %v3416_v22  ;;  %v5085_v34 = vmax.f32 %v373_v11, %v613_v23 }
 0x133   :  { %1132 = vmatpush.bf16.msra.mxu1 %v3356_v63  ;;  %v4362_v63 = vld [vmem:[%s6737_s4 + $0x194] sm:$0xf0] }
 0x134   :  { %v544_v19 = vpop.f32.mrf.mxu3  ;;  %775 = vrot.lane.b32.xlu0 %v5001_v59, %s4517_s15  ;;  %690 = vrot.lane.b32.xlu1 %v4965_v24, %s4516_s1 }
 0x135   :  { %v545_v21 = vadd.f32 %v544_v19, %v505_v18  ;;  %1191 = vmatpush.bf16.msra.mxu0 %v3352_v29  ;;  %v3348_v18 = vor.u32 %v4350_v14, %v3347_v8  ;;  %v3331_v29 = vld [vmem:[%s6737_s4 + $0x110] sm:$0xf]  ;;  %v4346_v8 = vld [vmem:[%s6737_s4 + $0x114] sm:$0xf0] }
 0x136   :  { %1221 = vmatpush.bf16.msra.mxu2 %v3408_v20  ;;  %v3332_v14 = vor.u32 %v4346_v8, %v3331_v29  ;;  %v4325_v29 = vld [vmem:[%s6737_s4 + $0x74] sm:$0xf] }
 0x137   :  { %v615_v26 = vpop.f32.mrf.mxu2  ;;  %v5114_v31 = vmax.f32 %v305_v27, %v545_v21  ;;  %1133 = vmatpush.bf16.msra.mxu1 %v3348_v18  ;;  %v310_v21 = vadd.f32 %v4927_v49, %v4948_v13  ;;  %v3339_v49 = vld [vmem:[%s6737_s4 + $0x120] sm:$0xf]  ;;  %v4348_v13 = vld [vmem:[%s6737_s4 + $0x124] sm:$0xf0] }
 0x138   :  { %v616_v30 = vadd.f32 %v615_v26, %v576_v16  ;;  %v578_v56 = vpop.f32.mrf.mxu0  ;;  %v3403_v16 = vld [vmem:[%s6737_s4 + $0x1a0] sm:$0xf]  ;;  %v3340_v27 = vor.u32 %v4348_v13, %v3339_v49  ;;  %v3317_v49 = vld [vmem:[%s6737_s4 + $0xf8] sm:$0xf0]  ;;  %v3315_v13 = vld [vmem:[%s6737_s4 + $0xf0] sm:$0xf] }
 0x139   :  { %678 = vrot.lane.b32.xlu2 %v4936_v58, %s4516_s1  ;;  %v3404_v19 = vor.u32 %v4364_v17, %v3403_v16 }
 0x13a   :  { %v5088_v40 = vmax.f32 %v4919_v41, %v616_v30  ;;  %v3412_v41 = vor.u32 %v4366_v35, %v3411_v15  ;;  %v508_v25 = vpop.f32.mrf.mxu1  ;;  %v3397_v15 = vld [vmem:[%s6737_s4 + $0x198] sm:$0xf0] }
 0x13b   :  { %v3400_v35 = vor.u32 %v4361_v46, %v3397_v15  ;;  %1134 = vmatpush.bf16.msra.mxu1 %v3340_v27  ;;  %v3379_v15 = vld [vmem:[%s6737_s4 + $0x170] sm:$0xf]  ;;  %v4342_v27 = vld [vmem:[%s6737_s4 + $0xf4] sm:$0xf0] }
 0x13c   :  { %700 = vrot.lane.b32.xlu0 %v5085_v34, %s4516_s1  ;;  %704 = vrot.lane.b32.xlu1 %v5088_v40, %s4516_s1  ;;  %v547_v62 = vpop.f32.mrf.mxu3 }
 0x13d   :  { %1162 = vmatpush.bf16.msra.mxu3 %v3412_v41  ;;  %v548_v38 = vadd.f32 %v547_v62, %v508_v25  ;;  %1222 = vmatpush.bf16.msra.mxu2 %v3400_v35  ;;  %v4358_v35 = vld [vmem:[%s6737_s4 + $0x174] sm:$0xf0] }
 0x13f   :  { %v617_v51 = vpop.f32.mrf.mxu2  ;;  %v5151_v47 = vmax.f32 %v4940_v0, %v548_v38  ;;  %v4347_v0 = vld [vmem:[%s6737_s4 + $0x124] sm:$0xf]  ;;  %1135 = vmatpush.bf16.msra.mxu1 %v3332_v14  ;;  %v4337_v14 = vld [vmem:[%s6737_s4 + $0xd4] sm:$0xf] }
 0x140   :  { %v618_v2 = vadd.f32 %v617_v51, %v578_v56  ;;  %v581_v37 = vpop.f32.mrf.mxu0  ;;  %v3395_v56 = vld [vmem:[%s6737_s4 + $0x190] sm:$0xf]  ;;  %v383_v51 = vadd.f32 %v4916_v39, %v4938_v61  ;;  %v3336_v39 = vor.u32 %v4345_v54, %v3333_v12  ;;  %v3389_v61 = vld [vmem:[%s6737_s4 + $0x188] sm:$0xf0]  ;;  %v836_v12 = vld [vmem:[%s6738_s3] sm:$0x3] }
 0x141   :  { %714 = vrot.lane.b32.xlu2 %v5114_v31, %s4516_s1  ;;  %1163 = vmatpush.bf16.msra.mxu3 %v3404_v19  ;;  %v3396_v62 = vor.u32 %v4362_v63, %v3395_v56  ;;  %v3392_v45 = vor.u32 %v4359_v32, %v3389_v61  ;;  %v3387_v19 = vld [vmem:[%s6737_s4 + $0x180] sm:$0xf]  ;;  %v3316_v63 = vor.u32 %v4342_v27, %v3315_v13  ;;  %v4340_v61 = vld [vmem:[%s6737_s4 + $0xe4] sm:$0xf0]  ;;  %v4335_v13 = vld [vmem:[%s6737_s4 + $0xc4] sm:$0xf] }
 0x142   :  { %v5120_v3 = vmax.f32 %v378_v9, %v618_v2  ;;  %v510_v23 = vpop.f32.mrf.mxu1  ;;  %v3541_v27 = vld [vmem:[%s6737_s4 + $0xc8] sm:$0xf0] }
 0x143   :  { %1223 = vmatpush.bf16.msra.mxu2 %v3392_v45 }
 0x144   :  { %708 = vrot.lane.b32.xlu0 %v5120_v3, %s4516_s1  ;;  %698 = vrot.lane.b32.xlu1 %v4985_v57, %s4516_s1  ;;  %v549_v26 = vpop.f32.mrf.mxu3 }
 0x145   :  { %v550_v44 = vadd.f32 %v549_v26, %v510_v23  ;;  %1164 = vmatpush.bf16.msra.mxu3 %v3396_v62  ;;  %v4339_v62 = vld [vmem:[%s6737_s4 + $0xe4] sm:$0xf] }
 0x147   :  { %v620_v22 = vpop.f32.mrf.mxu2  ;;  %v5176_v41 = vmax.f32 %v310_v21, %v550_v44  ;;  %v3325_v44 = vld [vmem:[%s6737_s4 + $0x108] sm:$0xf0]  ;;  %v3323_v21 = vld [vmem:[%s6737_s4 + $0x100] sm:$0xf] }
 0x148   :  { %v621_v11 = vadd.f32 %v620_v22, %v581_v37  ;;  %v583_v42 = vpop.f32.mrf.mxu0  ;;  %v4360_v37 = vld [vmem:[%s6737_s4 + $0x184] sm:$0xf0] }
 0x149   :  { %718 = vrot.lane.b32.xlu2 %v5151_v47, %s4516_s1  ;;  %v3388_v22 = vor.u32 %v4360_v37, %v3387_v19 }
 0x14a   :  { %v5156_v30 = vmax.f32 %v4931_v53, %v621_v11  ;;  %v3344_v53 = vor.u32 %v4347_v0, %v3341_v60  ;;  %v4343_v11 = vld [vmem:[%s6737_s4 + $0x104] sm:$0xf] }
 0x14b   :  { %1165 = vmatpush.bf16.msra.mxu3 %v3388_v22  ;;  %v3328_v0 = vor.u32 %v4343_v11, %v3325_v44  ;;  %v3499_v22 = vld [vmem:[%s6737_s4 + $0x70] sm:$0xf]  ;;  %v5316_v11 = vperm.slane %v836_v12, 0 }
 0x14c   :  { %779 = vrot.lane.b32.xlu0 %v5061_v6, %s4517_s15  ;;  %712 = vrot.lane.b32.xlu1 %v5156_v30, %s4516_s1 }
 0x14d   :  { %1192 = vmatpush.bf16.msra.mxu0 %v3344_v53  ;;  %v4344_v53 = vld [vmem:[%s6737_s4 + $0x104] sm:$0xf0] }
 0x14e   :  { %v3324_v46 = vor.u32 %v4344_v53, %v3323_v21 }
 0x14f   :  { %v622_v28 = vpop.f32.mrf.mxu2 }
 0x150   :  { %v623_v25 = vadd.f32 %v622_v28, %v583_v42  ;;  %v586_v9 = vpop.f32.mrf.mxu0  ;;  %1136 = vmatpush.bf16.msra.mxu1 %v3324_v46  ;;  %v4341_v28 = vld [vmem:[%s6737_s4 + $0xf4] sm:$0xf]  ;;  %v3380_v42 = vor.u32 %v4358_v35, %v3379_v15  ;;  %v4323_v46 = vld [vmem:[%s6737_s4 + $0x64] sm:$0xf]  ;;  %v3547_v15 = vld [vmem:[%s6737_s4 + $0xd0] sm:$0xf] }
 0x151   :  { %722 = vrot.lane.b32.xlu2 %v5176_v41, %s4516_s1  ;;  %1193 = vmatpush.bf16.msra.mxu0 %v3336_v39  ;;  %v3320_v56 = vor.u32 %v4341_v28, %v3317_v49  ;;  %v3555_v39 = vld [vmem:[%s6737_s4 + $0xe0] sm:$0xf]  ;;  %v4338_v49 = vld [vmem:[%s6737_s4 + $0xd4] sm:$0xf0] }
 0x152   :  { %v5198_v38 = vmax.f32 %v383_v51, %v623_v25  ;;  %1166 = vmatpush.bf16.msra.mxu3 %v3380_v42  ;;  %v3557_v51 = vld [vmem:[%s6737_s4 + $0xe8] sm:$0xf0]  ;;  %v3556_v8 = vor.u32 %v4340_v61, %v3555_v39 }
 0x153   :  { %v683_v25 = vpop.permute.xlu2 %682 }
 0x154   :  { %680 = vrot.lane.b32.xlu0 %v4970_v33, %s4516_s1  ;;  %706 = vrot.lane.b32.xlu1 %v5021_v36, %s4516_s1 }
 0x155   :  { %1194 = vmatpush.bf16.msra.mxu0 %v3328_v0  ;;  %1137 = vmatpush.bf16.msra.mxu1 %v3316_v63  ;;  %v5319_v0 = vperm.slane %v836_v12, 1 }
 0x156   :  { %1438 = vmatpush.bf16.msrb.mxu3 %v3556_v8  ;;  %v4321_v8 = vld [vmem:[%s6737_s4 + $0x54] sm:$0xf] }
 0x157   :  { %v625_v2 = vpop.f32.mrf.mxu2 }
 0x158   :  { %v626_v20 = vadd.f32 %v625_v2, %v586_v9  ;;  %v588_v17 = vpop.f32.mrf.mxu0  ;;  %v3560_v9 = vor.u32 %v4339_v62, %v3557_v51  ;;  %v3544_v62 = vor.u32 %v4335_v13, %v3541_v27  ;;  %v3491_v51 = vld [vmem:[%s6737_s4 + $0x60] sm:$0xf]  ;;  %v4334_v13 = vld [vmem:[%s6737_s4 + $0xb4] sm:$0xf0] }
 0x159   :  { %1195 = vmatpush.bf16.msra.mxu0 %v3320_v56  ;;  %v3475_v27 = vld [vmem:[%s6737_s4 + $0x40] sm:$0xf] }
 0x15a   :  { %v5223_v16 = vmax.f32 %v4946_v10, %v626_v20  ;;  %v388_v10 = vadd.f32 %v4929_v50, %v4957_v5  ;;  %v4357_v50 = vld [vmem:[%s6737_s4 + $0x174] sm:$0xf]  ;;  %v3381_v5 = vld [vmem:[%s6737_s4 + $0x178] sm:$0xf0] }
 0x15b   :  { %v3384_v60 = vor.u32 %v4357_v50, %v3381_v5  ;;  %v687_v2 = vpop.permute.xlu2 %686  ;;  %v3501_v20 = vld [vmem:[%s6737_s4 + $0x78] sm:$0xf0] }
 0x15c   :  { %716 = vrot.lane.b32.xlu0 %v5198_v38, %s4516_s1  ;;  %763 = vrot.lane.b32.xlu1 %v4936_v58, %s4517_s15  ;;  %v3504_v19 = vor.u32 %v4325_v29, %v3501_v20  ;;  %v3485_v20 = vld [vmem:[%s6737_s4 + $0x58] sm:$0xf0] }
 0x15d   :  { %1224 = vmatpush.bf16.msra.mxu2 %v3384_v60 }
 0x15e   :  { %1466 = vmatpush.bf16.msrb.mxu0 %v3504_v19  ;;  %v4336_v19 = vld [vmem:[%s6737_s4 + $0xc4] sm:$0xf0] }
 0x15f   :  { %v627_v18 = vpop.f32.mrf.mxu2 }
 0x160   :  { %v628_v23 = vadd.f32 %v627_v18, %v588_v17  ;;  %v3549_v17 = vld [vmem:[%s6737_s4 + $0xd8] sm:$0xf0] }
 0x161   :  { %1496 = vmatpush.bf16.msrb.mxu2 %v3560_v9  ;;  %v3552_v37 = vor.u32 %v4337_v14, %v3549_v17  ;;  %v4324_v9 = vld [vmem:[%s6737_s4 + $0x64] sm:$0xf0]  ;;  %v3539_v14 = vld [vmem:[%s6737_s4 + $0xc0] sm:$0xf] }
 0x162   :  { %v5237_v26 = vmax.f32 %v388_v10, %v628_v23  ;;  %v4326_v23 = vld [vmem:[%s6737_s4 + $0x74] sm:$0xf0] }
 0x163   :  { %v3500_v10 = vor.u32 %v4326_v23, %v3499_v22  ;;  %v770_v5 = vpop.permute.xlu2 %769  ;;  %v4322_v22 = vld [vmem:[%s6737_s4 + $0x54] sm:$0xf0]  ;;  %v3540_v23 = vor.u32 %v4336_v19, %v3539_v14  ;;  %v4331_v14 = vld [vmem:[%s6737_s4 + $0xa4] sm:$0xf]  ;;  %v3469_v19 = vld [vmem:[%s6737_s4 + $0x38] sm:$0xf0] }
 0x164   :  { %720 = vrot.lane.b32.xlu0 %v5223_v16, %s4516_s1  ;;  %781 = vrot.lane.b32.xlu1 %v5114_v31, %s4517_s15 }
 0x165   :  { %1497 = vmatpush.bf16.msrb.mxu2 %v3552_v37  ;;  %1408 = vmatpush.bf16.msrb.mxu1 %v3500_v10  ;;  %v3483_v37 = vld [vmem:[%s6737_s4 + $0x50] sm:$0xf] }
 0x166   :  { %v3484_v10 = vor.u32 %v4322_v22, %v3483_v37  ;;  %v3523_v37 = vld [vmem:[%s6737_s4 + $0xa0] sm:$0xf]  ;;  %v4332_v22 = vld [vmem:[%s6737_s4 + $0xa4] sm:$0xf0] }
 0x169   :  { %1498 = vmatpush.bf16.msrb.mxu2 %v3544_v62 }
 0x16b   :  { %v766_v54 = vpop.permute.xlu1 %765  ;;  %v695_v17 = vpop.permute.xlu2 %694 }
 0x16c   :  { %724 = vrot.lane.b32.xlu0 %v5237_v26, %s4516_s1  ;;  %783 = vrot.lane.b32.xlu1 %v5151_v47, %s4517_s15 }
 0x173   :  { %v768_v60 = vpop.permute.xlu1 %767  ;;  %v774_v62 = vpop.permute.xlu2 %773 }
 0x174   :  { %785 = vrot.lane.b32.xlu1 %v5176_v41, %s4517_s15 }
 0x186   :  { %v685_v32 = vpop.permute.xlu0 %684 }
 0x187   :  { %v728_v45 = vsel %vm726_vm2, %v683_v25, %v685_v32  ;;  %v801_v18 = vsel %vm799_vm3, %v685_v32, %v766_v54  ;;  %v3548_v25 = vor.u32 %v4338_v49, %v3547_v15  ;;  %v3477_v15 = vld [vmem:[%s6737_s4 + $0x48] sm:$0xf0] }
 0x188   :  { %v814_v44 = vmax.f32 %v4944_v7, %v728_v45  ;;  %v815_v50 = vmax.f32 %v4979_v52, %v801_v18  ;;  %v3493_v7 = vld [vmem:[%s6737_s4 + $0x68] sm:$0xf0]  ;;  %v3488_v18 = vor.u32 %v4321_v8, %v3485_v20 }
 0x189   :  { %v3496_v42 = vor.u32 %v4323_v46, %v3493_v7  ;;  %1439 = vmatpush.bf16.msrb.mxu3 %v3548_v25  ;;  %v4319_v7 = vld [vmem:[%s6737_s4 + $0x44] sm:$0xf] }
 0x18a   :  { %v5323_v21 = vadd.f32 %v5316_v11, %v814_v44  ;;  %v5335_v52 = vadd.f32 %v5319_v0, %v815_v50  ;;  %v4333_v44 = vld [vmem:[%s6737_s4 + $0xb4] sm:$0xf]  ;;  %v3533_v50 = vld [vmem:[%s6737_s4 + $0xb8] sm:$0xf0]  ;;  %v3480_v49 = vor.u32 %v4319_v7, %v3477_v15 }
 0x18b   :  { %1467 = vmatpush.bf16.msrb.mxu0 %v3496_v42 }
 0x18d   :  { %1440 = vmatpush.bf16.msrb.mxu3 %v3540_v23 }
 0x18e   :  { %v689_v53 = vpop.permute.xlu0 %688 }
 0x18f   :  { %v729_v35 = vsel %vm726_vm2, %v687_v2, %v689_v53  ;;  %v802_v28 = vsel %vm799_vm3, %v689_v53, %v768_v60  ;;  %v3492_v2 = vor.u32 %v4324_v9, %v3491_v51  ;;  %v3536_v60 = vor.u32 %v4333_v44, %v3533_v50  ;;  %1468 = vmatpush.bf16.msrb.mxu0 %v3488_v18 }
 0x190   :  { %v816_v56 = vmax.f32 %v4955_v48, %v729_v35  ;;  %v817_v63 = vmax.f32 %v4990_v1, %v802_v28  ;;  %v868_v48 = vmax.f32 %v5323_v21, 0.0  ;;  %v869_v1 = vmax.f32 %v5335_v52, 0.0  ;;  %v3531_v35 = vld [vmem:[%s6737_s4 + $0xb0] sm:$0xf]  ;;  %v4392_v21 = vld [vmem:[%s6737_s4 + $0x284] sm:$0xf0] }
 0x191   :  { %1409 = vmatpush.bf16.msrb.mxu1 %v3492_v2  ;;  %1499 = vmatpush.bf16.msrb.mxu2 %v3536_v60  ;;  %v3524_v50 = vor.u32 %v4332_v22, %v3523_v37  ;;  %v3467_v60 = vld [vmem:[%s6737_s4 + $0x30] sm:$0xf] }
 0x192   :  { %v5357_v54 = vadd.f32 %v5316_v11, %v816_v56  ;;  %v847_v12 = vadd.f32 %v5319_v0, %v817_v63  ;;  %v4320_v56 = vld [vmem:[%s6737_s4 + $0x44] sm:$0xf0]  ;;  %v3689_v52 = vld [vmem:[%s6737_s4 + $0x290] sm:$0xf] }
 0x193   :  { %1469 = vmatpush.bf16.msrb.mxu0 %v3480_v49  ;;  %v3476_v9 = vor.u32 %v4320_v56, %v3475_v27  ;;  %v4315_v27 = vld [vmem:[%s6737_s4 + $0x24] sm:$0xf]  ;;  %v3461_v56 = vld [vmem:[%s6737_s4 + $0x28] sm:$0xf0] }
 0x194   :  { %v870_v32 = vmax.f32 %v5357_v54, 0.0  ;;  %v871_v39 = vmax.f32 %v847_v12, 0.0  ;;  %v4329_v54 = vld [vmem:[%s6737_s4 + $0x94] sm:$0xf] }
 0x195   :  { %1410 = vmatpush.bf16.msrb.mxu1 %v3484_v10 }
 0x196   :  { %v928_v61 = vpack.c.bf16 %v870_v32, %v868_v48  ;;  %v929_v29 = vpack.c.bf16 %v871_v39, %v869_v1  ;;  %v772_v45 = vpop.permute.xlu0 %771 }
 0x198   :  { %1138 = vmatmul.bf16.vlgmr.msra.gmra.mxu1 %v928_v61  ;;  %3433 = vmatmul.msk.bf16.vlgmr.msra.gmra.mxu3 %vm1117_vm4, %v929_v29 }
 0x199   :  { %1196 = vmatmul.bf16.vlgmr.msra.gmra.mxu0 %v928_v61  ;;  %3437 = vmatmul.msk.bf16.vlgmr.msra.gmra.mxu2 %vm1117_vm4, %v929_v29 }
 0x19a   :  { %1411 = vmatpush.bf16.msrb.mxu1 %v3476_v9  ;;  %v4316_v9 = vld [vmem:[%s6737_s4 + $0x24] sm:$0xf0] }
 0x19e   :  { %v693_v53 = vpop.permute.xlu0 %692  ;;  %v697_v46 = vpop.permute.xlu1 %696 }
 0x19f   :  { %v803_v28 = vsel %vm799_vm3, %v693_v53, %v770_v5  ;;  %v804_v42 = vsel %vm799_vm3, %v697_v46, %v772_v45  ;;  %v3532_v5 = vor.u32 %v4334_v13, %v3531_v35  ;;  %v731_v51 = vsel %vm726_vm2, %v695_v17, %v697_v46  ;;  %v3525_v17 = vld [vmem:[%s6737_s4 + $0xa8] sm:$0xf0] }
 0x1a0   :  { %v819_v63 = vmax.f32 %v5033_v55, %v803_v28  ;;  %v821_v25 = vmax.f32 %v5036_v4, %v804_v42  ;;  %v820_v29 = vmax.f32 %v4973_v43, %v731_v51  ;;  %v4317_v43 = vld [vmem:[%s6737_s4 + $0x34] sm:$0xf]  ;;  %v3528_v18 = vor.u32 %v4331_v14, %v3525_v17  ;;  %v3459_v51 = vld [vmem:[%s6737_s4 + $0x20] sm:$0xf] }
 0x1a1   :  { %1441 = vmatpush.bf16.msrb.mxu3 %v3532_v5  ;;  %v3472_v44 = vor.u32 %v4317_v43, %v3469_v19  ;;  %v3517_v5 = vld [vmem:[%s6737_s4 + $0x98] sm:$0xf0]  ;;  %v3460_v14 = vor.u32 %v4316_v9, %v3459_v51  ;;  %v4327_v43 = vld [vmem:[%s6737_s4 + $0x84] sm:$0xf]  ;;  %v3443_v51 = vld [vmem:[%s6737_s4] sm:$0xf] }
 0x1a2   :  { %v849_v2 = vadd.f32 %v5319_v0, %v819_v63  ;;  %v5420_v12 = vadd.f32 %v5319_v0, %v821_v25  ;;  %v5450_v23 = vadd.f32 %v5316_v11, %v820_v29  ;;  %1500 = vmatpush.bf16.msrb.mxu2 %v3528_v18  ;;  %v3464_v25 = vor.u32 %v4315_v27, %v3461_v56  ;;  %v4330_v29 = vld [vmem:[%s6737_s4 + $0x94] sm:$0xf0]  ;;  %v3507_v18 = vld [vmem:[%s6737_s4 + $0x80] sm:$0xf] }
 0x1a3   :  { %1470 = vmatpush.bf16.msrb.mxu0 %v3472_v44  ;;  %v4328_v44 = vld [vmem:[%s6737_s4 + $0x84] sm:$0xf0]  ;;  %v4314_v56 = vld [vmem:[%s6737_s4 + $0x14] sm:$0xf0] }
 0x1a4   :  { %v873_v61 = vmax.f32 %v849_v2, 0.0  ;;  %v875_v55 = vmax.f32 %v5420_v12, 0.0  ;;  %v874_v15 = vmax.f32 %v5450_v23, 0.0 }
 0x1a5   :  { %1442 = vmatpush.bf16.msrb.mxu3 %v3524_v50 }
 0x1a6   :  { %v5424_v45 = vpack.c.bf16 %v873_v61, %v871_v39  ;;  %v5428_v4 = vpack.c.bf16 %v875_v55, %v873_v61  ;;  %v776_v8 = vpop.permute.xlu0 %775  ;;  %v691_v20 = vpop.permute.xlu1 %690 }
 0x1a7   :  { %v730_v39 = vsel %vm726_vm2, %v691_v20, %v693_v53  ;;  %v4318_v53 = vld [vmem:[%s6737_s4 + $0x34] sm:$0xf0]  ;;  %1471 = vmatpush.bf16.msrb.mxu0 %v3464_v25  ;;  %v3520_v20 = vor.u32 %v4329_v54, %v3517_v5 }
 0x1a8   :  { %v818_v10 = vmax.f32 %v4965_v24, %v730_v39  ;;  %3434 = vmatmul.msk.bf16.gmra.mxu3 %vm1117_vm4, %v5428_v4  ;;  %v3468_v46 = vor.u32 %v4318_v53, %v3467_v60  ;;  %v703_v24 = vpop.permute.xlu2 %702  ;;  %v3509_v39 = vld [vmem:[%s6737_s4 + $0x88] sm:$0xf0] }
 0x1a9   :  { %3438 = vmatmul.msk.bf16.gmra.mxu2 %vm1117_vm4, %v5428_v4 }
 0x1aa   :  { %v848_v7 = vadd.f32 %v5316_v11, %v818_v10  ;;  %1412 = vmatpush.bf16.msrb.mxu1 %v3468_v46  ;;  %1501 = vmatpush.bf16.msrb.mxu2 %v3520_v20  ;;  %v3512_v10 = vor.u32 %v4327_v43, %v3509_v39  ;;  %v4399_v43 = vld [vmem:[%s6737_s4 + $0x2c4] sm:$0xf]  ;;  %v3715_v39 = vld [vmem:[%s6737_s4 + $0x2c8] sm:$0xf0] }
 0x1ac   :  { %v872_v35 = vmax.f32 %v848_v7, 0.0 }
 0x1ae   :  { %v5467_v28 = vpack.c.bf16 %v872_v35, %v870_v32  ;;  %v5471_v42 = vpack.c.bf16 %v874_v15, %v872_v35  ;;  %v701_v49 = vpop.permute.xlu0 %700  ;;  %v705_v13 = vpop.permute.xlu1 %704  ;;  %1413 = vmatpush.bf16.msrb.mxu1 %v3460_v14  ;;  %v3508_v35 = vor.u32 %v4328_v44, %v3507_v18  ;;  %1502 = vmatpush.bf16.msrb.mxu2 %v3512_v10 }
 0x1af   :  { %v805_v32 = vsel %vm799_vm3, %v701_v49, %v774_v62  ;;  %v806_v63 = vsel %vm799_vm3, %v705_v13, %v776_v8  ;;  %v3515_v62 = vld [vmem:[%s6737_s4 + $0x90] sm:$0xf]  ;;  %v733_v8 = vsel %vm726_vm2, %v703_v24, %v705_v13  ;;  %v3453_v24 = vld [vmem:[%s6737_s4 + $0x18] sm:$0xf0] }
 0x1b0   :  { %v823_v2 = vmax.f32 %v5085_v34, %v805_v32  ;;  %v825_v61 = vmax.f32 %v5088_v40, %v806_v63  ;;  %1143 = vmatmul.bf16.gmra.mxu1 %v5471_v42  ;;  %1201 = vmatmul.bf16.gmra.mxu0 %v5471_v42  ;;  %v3516_v34 = vor.u32 %v4330_v29, %v3515_v62  ;;  %v778_v50 = vpop.permute.xlu2 %777  ;;  %v3451_v13 = vld [vmem:[%s6737_s4 + $0x10] sm:$0xf]  ;;  %v4312_v29 = vld [vmem:[%s6737_s4 + $0x4] sm:$0xf0] }
 0x1b1   :  { %v824_v37 = vmax.f32 %v5001_v59, %v733_v8  ;;  %v4313_v59 = vld [vmem:[%s6737_s4 + $0x14] sm:$0xf]  ;;  %v3452_v25 = vor.u32 %v4314_v56, %v3451_v13  ;;  %v3444_v8 = vor.u32 %v4312_v29, %v3443_v51  ;;  %v3659_v13 = vld [vmem:[%s6737_s4 + $0x258] sm:$0xf0]  ;;  %v4383_v29 = vld [vmem:[%s6737_s4 + $0x244] sm:$0xf] }
 0x1b2   :  { %v853_v40 = vadd.f32 %v5319_v0, %v823_v2  ;;  %v855_v17 = vadd.f32 %v5319_v0, %v825_v61  ;;  %1443 = vmatpush.bf16.msrb.mxu3 %v3516_v34  ;;  %v3456_v27 = vor.u32 %v4313_v59, %v3453_v24  ;;  %v4400_v59 = vld [vmem:[%s6737_s4 + $0x2c4] sm:$0xf0]  ;;  %v4385_v24 = vld [vmem:[%s6737_s4 + $0x254] sm:$0xf] }
 0x1b3   :  { %v5540_v54 = vadd.f32 %v5316_v11, %v824_v37  ;;  %1414 = vmatpush.bf16.msrb.mxu1 %v3452_v25 }
 0x1b4   :  { %v877_v19 = vmax.f32 %v853_v40, 0.0  ;;  %v879_v22 = vmax.f32 %v855_v17, 0.0  ;;  %1472 = vmatpush.bf16.msrb.mxu0 %v3456_v27 }
 0x1b5   :  { %v878_v9 = vmax.f32 %v5540_v54, 0.0 }
 0x1b6   :  { %v5521_v60 = vpack.c.bf16 %v877_v19, %v875_v55  ;;  %v5523_v53 = vpack.c.bf16 %v879_v22, %v877_v19  ;;  %v709_v46 = vpop.permute.xlu0 %708  ;;  %v699_v7 = vpop.permute.xlu1 %698  ;;  %1444 = vmatpush.bf16.msrb.mxu3 %v3508_v35  ;;  %v3718_v19 = vor.u32 %v4399_v43, %v3715_v39  ;;  %v4398_v43 = vld [vmem:[%s6737_s4 + $0x2b4] sm:$0xf0]  ;;  %v4395_v39 = vld [vmem:[%s6737_s4 + $0x2a4] sm:$0xf] }
 0x1b7   :  { %v807_v12 = vsel %vm799_vm3, %v709_v46, %v778_v50  ;;  %v732_v55 = vsel %vm726_vm2, %v699_v7, %v701_v49  ;;  %1415 = vmatpush.bf16.msrb.mxu1 %v3444_v8  ;;  %v3651_v8 = vld [vmem:[%s6737_s4 + $0x248] sm:$0xf0] }
 0x1b8   :  { %v827_v32 = vmax.f32 %v5120_v3, %v807_v12  ;;  %v822_v63 = vmax.f32 %v4985_v57, %v732_v55  ;;  %3435 = vmatmul.msk.bf16.gmra.mxu3 %vm1117_vm4, %v5523_v53  ;;  %v4311_v3 = vld [vmem:[%s6737_s4 + $0x4] sm:$0xf]  ;;  %v3445_v57 = vld [vmem:[%s6737_s4 + $0x8] sm:$0xf0]  ;;  %v711_v23 = vpop.permute.xlu2 %710  ;;  %1798 = vmatpush.bf16.msra.mxu2 %v3718_v19  ;;  %v4397_v12 = vld [vmem:[%s6737_s4 + $0x2b4] sm:$0xf] }
 0x1b9   :  { %3439 = vmatmul.msk.bf16.gmra.mxu2 %vm1117_vm4, %v5523_v53  ;;  %v3448_v62 = vor.u32 %v4311_v3, %v3445_v57  ;;  %v3707_v55 = vld [vmem:[%s6737_s4 + $0x2b8] sm:$0xf0] }
 0x1ba   :  { %v857_v49 = vadd.f32 %v5319_v0, %v827_v32  ;;  %v852_v5 = vadd.f32 %v5316_v11, %v822_v63  ;;  %v3710_v54 = vor.u32 %v4397_v12, %v3707_v55  ;;  %v3657_v32 = vld [vmem:[%s6737_s4 + $0x250] sm:$0xf]  ;;  %v4386_v63 = vld [vmem:[%s6737_s4 + $0x254] sm:$0xf0] }
 0x1bb   :  { %1473 = vmatpush.bf16.msrb.mxu0 %v3448_v62  ;;  %v3658_v25 = vor.u32 %v4386_v63, %v3657_v32  ;;  %v3641_v12 = vld [vmem:[%s6737_s4 + $0x230] sm:$0xf]  ;;  %v4382_v55 = vld [vmem:[%s6737_s4 + $0x234] sm:$0xf0] }
 0x1bc   :  { %v881_v2 = vmax.f32 %v857_v49, 0.0  ;;  %v876_v61 = vmax.f32 %v852_v5, 0.0  ;;  %1799 = vmatpush.bf16.msra.mxu2 %v3710_v54  ;;  %v3691_v54 = vld [vmem:[%s6737_s4 + $0x298] sm:$0xf0] }
 0x1bd   :  { %1710 = vmatpush.bf16.msra.mxu1 %v3658_v25 }
 0x1be   :  { %v5563_v20 = vpack.c.bf16 %v881_v2, %v879_v22  ;;  %v5567_v14 = vpack.c.bf16 %v876_v61, %v874_v15  ;;  %v5569_v34 = vpack.c.bf16 %v878_v9, %v876_v61  ;;  %v780_v40 = vpop.permute.xlu0 %779  ;;  %v713_v17 = vpop.permute.xlu1 %712 }
 0x1bf   :  { %v808_v18 = vsel %vm799_vm3, %v713_v17, %v780_v40  ;;  %v735_v37 = vsel %vm726_vm2, %v711_v23, %v713_v17  ;;  %v3705_v40 = vld [vmem:[%s6737_s4 + $0x2b0] sm:$0xf]  ;;  %v3654_v17 = vor.u32 %v4383_v29, %v3651_v8  ;;  %v4380_v29 = vld [vmem:[%s6737_s4 + $0x224] sm:$0xf0] }
 0x1c0   :  { %v829_v15 = vmax.f32 %v5156_v30, %v808_v18  ;;  %1148 = vmatmul.bf16.gmra.mxu1 %v5569_v34  ;;  %1206 = vmatmul.bf16.gmra.mxu0 %v5569_v34  ;;  %v828_v10 = vmax.f32 %v5061_v6, %v735_v37  ;;  %v3713_v30 = vld [vmem:[%s6737_s4 + $0x2c0] sm:$0xf]  ;;  %v679_v5 = vpop.permute.xlu2 %678  ;;  %v3699_v18 = vld [vmem:[%s6737_s4 + $0x2a8] sm:$0xf0] }
 0x1c1   :  { %v3714_v35 = vor.u32 %v4400_v59, %v3713_v30  ;;  %v3649_v37 = vld [vmem:[%s6737_s4 + $0x240] sm:$0xf]  ;;  %v3643_v30 = vld [vmem:[%s6737_s4 + $0x238] sm:$0xf0] }
 0x1c2   :  { %v5583_v22 = vadd.f32 %v5319_v0, %v829_v15  ;;  %v5611_v27 = vadd.f32 %v5316_v11, %v828_v10  ;;  %v3706_v15 = vor.u32 %v4398_v43, %v3705_v40  ;;  %v4384_v10 = vld [vmem:[%s6737_s4 + $0x244] sm:$0xf0]  ;;  %v3697_v59 = vld [vmem:[%s6737_s4 + $0x2a0] sm:$0xf] }
 0x1c3   :  { %1740 = vmatpush.bf16.msra.mxu3 %v3714_v35 }
 0x1c4   :  { %v883_v44 = vmax.f32 %v5583_v22, 0.0  ;;  %v882_v3 = vmax.f32 %v5611_v27, 0.0  ;;  %v4446_v22 = vld [vmem:[%s6737_s4 + $0x434] sm:$0xf0]  ;;  %v4015_v27 = vld [vmem:[%s6737_s4 + $0x488] sm:$0xf0] }
 0x1c6   :  { %v5589_v50 = vpack.c.bf16 %v883_v44, %v881_v2  ;;  %v707_v7 = vpop.permute.xlu1 %706  ;;  %v681_v49 = vpop.permute.xlu0 %680 }
 0x1c7   :  { %v734_v6 = vsel %vm726_vm2, %v707_v7, %v709_v46  ;;  %v3662_v46 = vor.u32 %v4385_v24, %v3659_v13  ;;  %v727_v51 = vsel %vm726_vm2, %v679_v5, %v681_v49  ;;  %v4381_v7 = vld [vmem:[%s6737_s4 + $0x234] sm:$0xf]  ;;  %v4396_v24 = vld [vmem:[%s6737_s4 + $0x2a4] sm:$0xf0]  ;;  %1741 = vmatpush.bf16.msra.mxu3 %v3706_v15  ;;  %v4379_v5 = vld [vmem:[%s6737_s4 + $0x224] sm:$0xf] }
 0x1c8   :  { %v826_v56 = vmax.f32 %v5021_v36, %v734_v6  ;;  %3436 = vmatmul.msk.bf16.gmra.mxu3 %vm1117_vm4, %v5589_v50  ;;  %v812_v19 = vmax.f32 %v4936_v58, %v727_v51  ;;  %v3702_v58 = vor.u32 %v4395_v39, %v3699_v18  ;;  %v3646_v35 = vor.u32 %v4381_v7, %v3643_v30  ;;  %v4394_v51 = vld [vmem:[%s6737_s4 + $0x294] sm:$0xf0]  ;;  %v4377_v18 = vld [vmem:[%s6737_s4 + $0x214] sm:$0xf] }
 0x1c9   :  { %3440 = vmatmul.msk.bf16.gmra.mxu2 %vm1117_vm4, %v5589_v50  ;;  %1768 = vmatpush.bf16.msra.mxu0 %v3662_v46  ;;  %v3698_v13 = vor.u32 %v4396_v24, %v3697_v59  ;;  %v3642_v46 = vor.u32 %v4382_v55, %v3641_v12  ;;  %v3690_v8 = vor.u32 %v4394_v51, %v3689_v52  ;;  %v4389_v30 = vld [vmem:[%s6737_s4 + $0x274] sm:$0xf]  ;;  %v3675_v24 = vld [vmem:[%s6737_s4 + $0x278] sm:$0xf0]  ;;  %v3673_v55 = vld [vmem:[%s6737_s4 + $0x270] sm:$0xf] }
 0x1ca   :  { %v856_v36 = vadd.f32 %v5316_v11, %v826_v56  ;;  %v4393_v56 = vld [vmem:[%s6737_s4 + $0x294] sm:$0xf]  ;;  %1800 = vmatpush.bf16.msra.mxu2 %v3702_v58  ;;  %v842_v32 = vadd.f32 %v5316_v11, %v812_v19  ;;  %v3627_v19 = vld [vmem:[%s6737_s4 + $0x218] sm:$0xf0]  ;;  %v4375_v58 = vld [vmem:[%s6737_s4 + $0x204] sm:$0xf] }
 0x1cb   :  { %v3694_v25 = vor.u32 %v4393_v56, %v3691_v54  ;;  %1742 = vmatpush.bf16.msra.mxu3 %v3698_v13  ;;  %v3630_v15 = vor.u32 %v4377_v18, %v3627_v19  ;;  %v3678_v13 = vor.u32 %v4389_v30, %v3675_v24  ;;  %v4390_v56 = vld [vmem:[%s6737_s4 + $0x274] sm:$0xf0]  ;;  %v4373_v54 = vld [vmem:[%s6737_s4 + $0x1f4] sm:$0xf]  ;;  %v4372_v18 = vld [vmem:[%s6737_s4 + $0x1e4] sm:$0xf0] }
 0x1cc   :  { %v880_v57 = vmax.f32 %v856_v36, 0.0  ;;  %v866_v36 = vmax.f32 %v842_v32, 0.0  ;;  %v3611_v32 = vld [vmem:[%s6737_s4 + $0x1f8] sm:$0xf0]  ;;  %v4374_v51 = vld [vmem:[%s6737_s4 + $0x1f4] sm:$0xf0] }
 0x1cd   :  { %1769 = vmatpush.bf16.msra.mxu0 %v3654_v17  ;;  %v3683_v17 = vld [vmem:[%s6737_s4 + $0x288] sm:$0xf0] }
 0x1ce   :  { %v5627_v2 = vpack.c.bf16 %v880_v57, %v878_v9  ;;  %v5631_v61 = vpack.c.bf16 %v882_v3, %v880_v57  ;;  %v764_v62 = vpop.permute.xlu1 %763  ;;  %1801 = vmatpush.bf16.msra.mxu2 %v3694_v25  ;;  %v3635_v57 = vld [vmem:[%s6737_s4 + $0x228] sm:$0xf0]  ;;  %v890_v39 = vpack.c.bf16 %v868_v48, %v866_v36  ;;  %v3625_v48 = vld [vmem:[%s6737_s4 + $0x210] sm:$0xf]  ;;  %v3614_v25 = vor.u32 %v4373_v54, %v3611_v32  ;;  %v3857_v54 = vld [vmem:[%s6737_s4 + $0x398] sm:$0xf0] }
 0x1cf   :  { %v800_v9 = vsel %vm799_vm3, %v681_v49, %v764_v62  ;;  %v3633_v62 = vld [vmem:[%s6737_s4 + $0x220] sm:$0xf]  ;;  %1743 = vmatpush.bf16.msra.mxu3 %v3690_v8  ;;  %v3603_v8 = vld [vmem:[%s6737_s4 + $0x1e8] sm:$0xf0]  ;;  %v3807_v32 = vld [vmem:[%s6737_s4 + $0x330] sm:$0xf] }
 0x1d0   :  { %v813_v23 = vmax.f32 %v4970_v33, %v800_v9  ;;  %1153 = vmatmul.bf16.gmra.mxu1 %v5631_v61  ;;  %1211 = vmatmul.bf16.gmra.mxu0 %v5631_v61  ;;  %v3650_v33 = vor.u32 %v4384_v10, %v3649_v37  ;;  %v3634_v40 = vor.u32 %v4380_v29, %v3633_v62  ;;  %v4391_v9 = vld [vmem:[%s6737_s4 + $0x284] sm:$0xf]  ;;  %v4378_v37 = vld [vmem:[%s6737_s4 + $0x214] sm:$0xf0] }
 0x1d1   :  { %1770 = vmatpush.bf16.msra.mxu0 %v3646_v35  ;;  %v3686_v43 = vor.u32 %v4391_v9, %v3683_v17  ;;  %v3626_v7 = vor.u32 %v4378_v37, %v3625_v48  ;;  %v4376_v35 = vld [vmem:[%s6737_s4 + $0x204] sm:$0xf0]  ;;  %v4371_v29 = vld [vmem:[%s6737_s4 + $0x1e4] sm:$0xf]  ;;  %v4429_v9 = vld [vmem:[%s6737_s4 + $0x3b4] sm:$0xf] }
 0x1d2   :  { %v843_v6 = vadd.f32 %v5319_v0, %v813_v23  ;;  %1711 = vmatpush.bf16.msra.mxu1 %v3650_v33  ;;  %v3681_v23 = vld [vmem:[%s6737_s4 + $0x280] sm:$0xf]  ;;  %v3619_v33 = vld [vmem:[%s6737_s4 + $0x208] sm:$0xf0]  ;;  %v3873_v17 = vld [vmem:[%s6737_s4 + $0x3b8] sm:$0xf0] }
 0x1d3   :  { %1802 = vmatpush.bf16.msra.mxu2 %v3686_v43  ;;  %v3682_v10 = vor.u32 %v4392_v21, %v3681_v23  ;;  %v3622_v59 = vor.u32 %v4375_v58, %v3619_v33  ;;  %v3876_v43 = vor.u32 %v4429_v9, %v3873_v17  ;;  %v3871_v23 = vld [vmem:[%s6737_s4 + $0x3b0] sm:$0xf]  ;;  %v4415_v21 = vld [vmem:[%s6737_s4 + $0x344] sm:$0xf]  ;;  %v3817_v37 = vld [vmem:[%s6737_s4 + $0x348] sm:$0xf0] }
 0x1d4   :  { %v867_v63 = vmax.f32 %v843_v6, 0.0  ;;  %v3617_v6 = vld [vmem:[%s6737_s4 + $0x200] sm:$0xf]  ;;  %v3865_v58 = vld [vmem:[%s6737_s4 + $0x3a8] sm:$0xf0] }
 0x1d5   :  { %1744 = vmatpush.bf16.msra.mxu3 %v3682_v10  ;;  %v3618_v12 = vor.u32 %v4376_v35, %v3617_v6  ;;  %v3820_v10 = vor.u32 %v4415_v21, %v3817_v37  ;;  %v3815_v33 = vld [vmem:[%s6737_s4 + $0x340] sm:$0xf]  ;;  %v4413_v6 = vld [vmem:[%s6737_s4 + $0x334] sm:$0xf]  ;;  %v3809_v35 = vld [vmem:[%s6737_s4 + $0x338] sm:$0xf0] }
 0x1d6   :  { %v891_v49 = vpack.c.bf16 %v869_v1, %v867_v63  ;;  %1712 = vmatpush.bf16.msra.mxu1 %v3642_v46  ;;  %v3638_v1 = vor.u32 %v4379_v5, %v3635_v57  ;;  %v3674_v46 = vor.u32 %v4390_v56, %v3673_v55  ;;  %v4387_v63 = vld [vmem:[%s6737_s4 + $0x264] sm:$0xf]  ;;  %v3665_v5 = vld [vmem:[%s6737_s4 + $0x260] sm:$0xf]  ;;  %v4388_v57 = vld [vmem:[%s6737_s4 + $0x264] sm:$0xf0] }
 0x1d7   :  { %1803 = vmatpush.bf16.msra.mxu2 %v3678_v13  ;;  %v3666_v52 = vor.u32 %v4388_v57, %v3665_v5  ;;  %v3863_v13 = vld [vmem:[%s6737_s4 + $0x3a0] sm:$0xf]  ;;  %v4428_v55 = vld [vmem:[%s6737_s4 + $0x3a4] sm:$0xf0]  ;;  %v3801_v5 = vld [vmem:[%s6737_s4 + $0x328] sm:$0xf0] }
 0x1d8   :  { %3561 = vmatmul.msk.bf16.vlgmr.msrb.gmra.mxu3 %vm1117_vm4, %v891_v49  ;;  %1771 = vmatpush.bf16.msra.mxu0 %v3638_v1  ;;  %v3609_v1 = vld [vmem:[%s6737_s4 + $0x1f0] sm:$0xf]  ;;  %v3864_v56 = vor.u32 %v4428_v55, %v3863_v13  ;;  %v3849_v9 = vld [vmem:[%s6737_s4 + $0x388] sm:$0xf0]  ;;  %v4424_v37 = vld [vmem:[%s6737_s4 + $0x384] sm:$0xf0] }
 0x1d9   :  { %3565 = vmatmul.msk.bf16.vlgmr.msrb.gmra.mxu2 %vm1117_vm4, %v891_v49  ;;  %1745 = vmatpush.bf16.msra.mxu3 %v3674_v46  ;;  %v3667_v49 = vld [vmem:[%s6737_s4 + $0x268] sm:$0xf0]  ;;  %v3610_v62 = vor.u32 %v4374_v51, %v3609_v1  ;;  %v4425_v46 = vld [vmem:[%s6737_s4 + $0x394] sm:$0xf]  ;;  %v4426_v1 = vld [vmem:[%s6737_s4 + $0x394] sm:$0xf0] }
 0x1da   :  { %1713 = vmatpush.bf16.msra.mxu1 %v3634_v40  ;;  %v3670_v36 = vor.u32 %v4387_v63, %v3667_v49  ;;  %v3606_v40 = vor.u32 %v4371_v29, %v3603_v8  ;;  %v3860_v63 = vor.u32 %v4425_v46, %v3857_v54  ;;  %v4412_v29 = vld [vmem:[%s6737_s4 + $0x324] sm:$0xf0]  ;;  %v4423_v8 = vld [vmem:[%s6737_s4 + $0x384] sm:$0xf]  ;;  %v3785_v13 = vld [vmem:[%s6737_s4 + $0x308] sm:$0xf0] }
 0x1db   :  { %v3852_v17 = vor.u32 %v4423_v8, %v3849_v9 }
 0x1dc   :  { %1772 = vmatpush.bf16.msra.mxu0 %v3630_v15  ;;  %1804 = vmatpush.bf16.msra.mxu2 %v3670_v36  ;;  %v4430_v15 = vld [vmem:[%s6737_s4 + $0x3b4] sm:$0xf0]  ;;  %v4411_v36 = vld [vmem:[%s6737_s4 + $0x324] sm:$0xf] }
 0x1dd   :  { %1746 = vmatpush.bf16.msra.mxu3 %v3666_v52  ;;  %v3872_v48 = vor.u32 %v4430_v15, %v3871_v23  ;;  %v3804_v57 = vor.u32 %v4411_v36, %v3801_v5  ;;  %v3855_v52 = vld [vmem:[%s6737_s4 + $0x390] sm:$0xf]  ;;  %v4408_v5 = vld [vmem:[%s6737_s4 + $0x304] sm:$0xf0] }
 0x1de   :  { %1714 = vmatpush.bf16.msra.mxu1 %v3626_v7  ;;  %v4427_v7 = vld [vmem:[%s6737_s4 + $0x3a4] sm:$0xf]  ;;  %v3856_v51 = vor.u32 %v4426_v1, %v3855_v52  ;;  %v4405_v52 = vld [vmem:[%s6737_s4 + $0x2f4] sm:$0xf]  ;;  %v3777_v1 = vld [vmem:[%s6737_s4 + $0x2f8] sm:$0xf0] }
 0x1df   :  { %v3868_v30 = vor.u32 %v4427_v7, %v3865_v58  ;;  %v3791_v58 = vld [vmem:[%s6737_s4 + $0x310] sm:$0xf] }
 0x1e0   :  { %1416 = vmatmul.bf16.vlgmr.msrb.gmra.mxu1 %v890_v39  ;;  %1474 = vmatmul.bf16.vlgmr.msrb.gmra.mxu0 %v890_v39  ;;  %v3601_v39 = vld [vmem:[%s6737_s4 + $0x1e0] sm:$0xf] }
 0x1e1   :  { %1773 = vmatpush.bf16.msra.mxu0 %v3622_v59  ;;  %2116 = vmatpush.bf16.msrb.mxu2 %v3876_v43  ;;  %v3602_v19 = vor.u32 %v4372_v18, %v3601_v39  ;;  %v4416_v59 = vld [vmem:[%s6737_s4 + $0x344] sm:$0xf0]  ;;  %v4409_v39 = vld [vmem:[%s6737_s4 + $0x314] sm:$0xf]  ;;  %v3793_v18 = vld [vmem:[%s6737_s4 + $0x318] sm:$0xf0] }
 0x1e2   :  { %1715 = vmatpush.bf16.msra.mxu1 %v3618_v12  ;;  %2058 = vmatpush.bf16.msrb.mxu3 %v3872_v48  ;;  %v3816_v24 = vor.u32 %v4416_v59, %v3815_v33  ;;  %v3812_v12 = vor.u32 %v4413_v6, %v3809_v35  ;;  %v3796_v23 = vor.u32 %v4409_v39, %v3793_v18  ;;  %v4410_v33 = vld [vmem:[%s6737_s4 + $0x314] sm:$0xf0]  ;;  %v4407_v35 = vld [vmem:[%s6737_s4 + $0x304] sm:$0xf] }
 0x1e3   :  { %v3792_v59 = vor.u32 %v4410_v33, %v3791_v58  ;;  %v3769_v58 = vld [vmem:[%s6737_s4 + $0x2e8] sm:$0xf0]  ;;  %v4417_v33 = vld [vmem:[%s6737_s4 + $0x354] sm:$0xf] }
 0x1e5   :  { %1774 = vmatpush.bf16.msra.mxu0 %v3614_v25  ;;  %2117 = vmatpush.bf16.msrb.mxu2 %v3868_v30  ;;  %v4414_v25 = vld [vmem:[%s6737_s4 + $0x334] sm:$0xf0]  ;;  %v4421_v30 = vld [vmem:[%s6737_s4 + $0x374] sm:$0xf] }
 0x1e6   :  { %1716 = vmatpush.bf16.msra.mxu1 %v3610_v62  ;;  %2059 = vmatpush.bf16.msrb.mxu3 %v3864_v56  ;;  %v3808_v49 = vor.u32 %v4414_v25, %v3807_v32  ;;  %v3799_v62 = vld [vmem:[%s6737_s4 + $0x320] sm:$0xf]  ;;  %v4422_v25 = vld [vmem:[%s6737_s4 + $0x374] sm:$0xf0] }
 0x1e8   :  { %3562 = vmatmul.msk.bf16.gmra.mxu3 %vm1117_vm4, %v5424_v45 }
 0x1e9   :  { %3566 = vmatmul.msk.bf16.gmra.mxu2 %vm1117_vm4, %v5424_v45  ;;  %1775 = vmatpush.bf16.msra.mxu0 %v3606_v40  ;;  %v3800_v40 = vor.u32 %v4412_v29, %v3799_v62  ;;  %v3780_v62 = vor.u32 %v4405_v52, %v3777_v1  ;;  %v3833_v29 = vld [vmem:[%s6737_s4 + $0x368] sm:$0xf0]  ;;  %v4401_v1 = vld [vmem:[%s6737_s4 + $0x2d4] sm:$0xf] }
 0x1ea   :  { %1717 = vmatpush.bf16.msra.mxu1 %v3602_v19  ;;  %2118 = vmatpush.bf16.msrb.mxu2 %v3860_v63  ;;  %v3839_v63 = vld [vmem:[%s6737_s4 + $0x370] sm:$0xf] }
 0x1eb   :  { %2060 = vmatpush.bf16.msrb.mxu3 %v3856_v51  ;;  %v3840_v36 = vor.u32 %v4422_v25, %v3839_v63  ;;  %v4419_v51 = vld [vmem:[%s6737_s4 + $0x364] sm:$0xf]  ;;  %v717_v63 = vpop.permute.xlu0 %716 }
 0x1ed   :  { %2086 = vmatpush.bf16.msrb.mxu0 %v3820_v10 }
 0x1ee   :  { %2028 = vmatpush.bf16.msrb.mxu1 %v3816_v24  ;;  %2119 = vmatpush.bf16.msrb.mxu2 %v3852_v17  ;;  %v3841_v24 = vld [vmem:[%s6737_s4 + $0x378] sm:$0xf0] }
 0x1ef   :  { %v3844_v6 = vor.u32 %v4421_v30, %v3841_v24 }
 0x1f0   :  { %1421 = vmatmul.bf16.gmra.mxu1 %v5467_v28  ;;  %1479 = vmatmul.bf16.gmra.mxu0 %v5467_v28 }
 0x1f1   :  { %2087 = vmatpush.bf16.msrb.mxu0 %v3812_v12  ;;  %v3788_v12 = vor.u32 %v4407_v35, %v3785_v13  ;;  %v3823_v35 = vld [vmem:[%s6737_s4 + $0x350] sm:$0xf]  ;;  %v4418_v13 = vld [vmem:[%s6737_s4 + $0x354] sm:$0xf0] }
 0x1f2   :  { %2029 = vmatpush.bf16.msrb.mxu1 %v3808_v49  ;;  %2120 = vmatpush.bf16.msrb.mxu2 %v3844_v6  ;;  %v3783_v49 = vld [vmem:[%s6737_s4 + $0x300] sm:$0xf] }
 0x1f5   :  { %2088 = vmatpush.bf16.msrb.mxu0 %v3804_v57  ;;  %v3784_v57 = vor.u32 %v4408_v5, %v3783_v49  ;;  %v4404_v5 = vld [vmem:[%s6737_s4 + $0x2e4] sm:$0xf0] }
 0x1f6   :  { %2030 = vmatpush.bf16.msrb.mxu1 %v3800_v40  ;;  %v3836_v40 = vor.u32 %v4419_v51, %v3833_v29  ;;  %v3761_v51 = vld [vmem:[%s6737_s4 + $0x2d8] sm:$0xf0]  ;;  %v4459_v29 = vld [vmem:[%s6737_s4 + $0x4a4] sm:$0xf] }
 0x1f8   :  { %3563 = vmatmul.msk.bf16.gmra.mxu3 %vm1117_vm4, %v5521_v60  ;;  %2121 = vmatpush.bf16.msrb.mxu2 %v3836_v40 }
 0x1f9   :  { %3567 = vmatmul.msk.bf16.gmra.mxu2 %vm1117_vm4, %v5521_v60  ;;  %2089 = vmatpush.bf16.msrb.mxu0 %v3796_v23  ;;  %v4406_v23 = vld [vmem:[%s6737_s4 + $0x2f4] sm:$0xf0] }
 0x1fa   :  { %2031 = vmatpush.bf16.msrb.mxu1 %v3792_v59  ;;  %v3825_v59 = vld [vmem:[%s6737_s4 + $0x358] sm:$0xf0] }
 0x1fb   :  { %v3828_v24 = vor.u32 %v4417_v33, %v3825_v59  ;;  %v4460_v59 = vld [vmem:[%s6737_s4 + $0x4a4] sm:$0xf0] }
 0x1fd   :  { %2090 = vmatpush.bf16.msrb.mxu0 %v3788_v12  ;;  %v782_v12 = vpop.permute.xlu1 %781  ;;  %2122 = vmatpush.bf16.msrb.mxu2 %v3828_v24  ;;  %v4445_v24 = vld [vmem:[%s6737_s4 + $0x434] sm:$0xf] }
 0x1fe   :  { %2032 = vmatpush.bf16.msrb.mxu1 %v3784_v57  ;;  %v809_v57 = vsel %vm799_vm3, %v717_v63, %v782_v12 }
 0x1ff   :  { %v831_v40 = vmax.f32 %v5198_v38, %v809_v57 }
 0x200   :  { %1426 = vmatmul.bf16.gmra.mxu1 %v5567_v14  ;;  %1484 = vmatmul.bf16.gmra.mxu0 %v5567_v14 }
 0x201   :  { %2091 = vmatpush.bf16.msrb.mxu0 %v3780_v62  ;;  %v3764_v62 = vor.u32 %v4401_v1, %v3761_v51 }
 0x208   :  { %3564 = vmatmul.msk.bf16.gmra.mxu3 %vm1117_vm4, %v5563_v20 }
 0x209   :  { %3568 = vmatmul.msk.bf16.gmra.mxu2 %vm1117_vm4, %v5563_v20 }
 0x210   :  { %1431 = vmatmul.bf16.gmra.mxu1 %v5627_v2  ;;  %1489 = vmatmul.bf16.gmra.mxu0 %v5627_v2 }
 0x215   :  { %v1139_v43 = vpop.f32.mrf.mxu1 }
 0x216   :  { %v1197_v19 = vpop.f32.mrf.mxu0 }
 0x218   :  { %3719 = vmatmul.msk.bf16.vlgmr.msra.gmra.mxu3 %vm1117_vm4, %v5424_v45 }
 0x219   :  { %3723 = vmatmul.msk.bf16.vlgmr.msra.gmra.mxu2 %vm1117_vm4, %v5424_v45  ;;  %v3847_v45 = vld [vmem:[%s6737_s4 + $0x380] sm:$0xf] }
 0x21a   :  { %v3848_v7 = vor.u32 %v4424_v37, %v3847_v45  ;;  %v4420_v45 = vld [vmem:[%s6737_s4 + $0x364] sm:$0xf0] }
 0x21b   :  { %v1168_v15 = vpop.f32.mrf.mxu3 }
 0x21c   :  { %v5902_v21 = vadd.f32 %v1168_v15, %v1139_v43  ;;  %v1226_v48 = vpop.f32.mrf.mxu2  ;;  %2061 = vmatpush.bf16.msrb.mxu3 %v3848_v7  ;;  %v3831_v15 = vld [vmem:[%s6737_s4 + $0x360] sm:$0xf]  ;;  %v4403_v7 = vld [vmem:[%s6737_s4 + $0x2e4] sm:$0xf] }
 0x21d   :  { %v5910_v10 = vadd.f32 %v1226_v48, %v1197_v19  ;;  %v1141_v55 = vpop.f32.mrf.mxu1  ;;  %v3775_v19 = vld [vmem:[%s6737_s4 + $0x2f0] sm:$0xf]  ;;  %v3832_v37 = vor.u32 %v4420_v45, %v3831_v15  ;;  %v3772_v30 = vor.u32 %v4403_v7, %v3769_v58  ;;  %v6035_v7 = vadd.f32 %v5319_v0, %v831_v40 }
 0x21e   :  { %v1199_v46 = vpop.f32.mrf.mxu0  ;;  %v3776_v48 = vor.u32 %v4406_v23, %v3775_v19  ;;  %v4402_v19 = vld [vmem:[%s6737_s4 + $0x2d4] sm:$0xf0]  ;;  %v4021_v40 = vld [vmem:[%s6737_s4 + $0x490] sm:$0xf] }
 0x21f   :  { %2092 = vmatpush.bf16.msrb.mxu0 %v3772_v30  ;;  %v4029_v30 = vld [vmem:[%s6737_s4 + $0x4a0] sm:$0xf]  ;;  %v885_v12 = vmax.f32 %v6035_v7, 0.0 }
 0x220   :  { %1718 = vmatmul.bf16.vlgmr.msra.gmra.mxu1 %v5467_v28  ;;  %1776 = vmatmul.bf16.vlgmr.msra.gmra.mxu0 %v5467_v28 }
 0x221   :  { %2062 = vmatpush.bf16.msrb.mxu3 %v3840_v36  ;;  %2033 = vmatpush.bf16.msrb.mxu1 %v3776_v48  ;;  %v3767_v36 = vld [vmem:[%s6737_s4 + $0x2e0] sm:$0xf] }
 0x222   :  { %v3768_v52 = vor.u32 %v4404_v5, %v3767_v36 }
 0x223   :  { %v1170_v56 = vpop.f32.mrf.mxu3  ;;  %2093 = vmatpush.bf16.msrb.mxu0 %v3764_v62  ;;  %v3973_v62 = vld [vmem:[%s6737_s4 + $0x430] sm:$0xf] }
 0x224   :  { %v5932_v54 = vadd.f32 %v1170_v56, %v1141_v55  ;;  %v1228_v32 = vpop.f32.mrf.mxu2  ;;  %v3824_v56 = vor.u32 %v4418_v13, %v3823_v35  ;;  %v3975_v35 = vld [vmem:[%s6737_s4 + $0x438] sm:$0xf0] }
 0x225   :  { %v5934_v28 = vadd.f32 %v1228_v32, %v1199_v46  ;;  %2063 = vmatpush.bf16.msrb.mxu3 %v3832_v37  ;;  %2034 = vmatpush.bf16.msrb.mxu1 %v3768_v52  ;;  %v715_v37 = vpop.permute.xlu2 %714  ;;  %v6071_v52 = vpack.c.bf16 %v885_v12, %v883_v44  ;;  %v3974_v44 = vor.u32 %v4446_v22, %v3973_v62 }
 0x226   :  { %v736_v33 = vsel %vm726_vm2, %v715_v37, %v717_v63  ;;  %v4023_v63 = vld [vmem:[%s6737_s4 + $0x498] sm:$0xf0] }
 0x227   :  { %v830_v13 = vmax.f32 %v5114_v31, %v736_v33 }
 0x228   :  { %3720 = vmatmul.msk.bf16.gmra.mxu3 %vm1117_vm4, %v5521_v60 }
 0x229   :  { %3724 = vmatmul.msk.bf16.gmra.mxu2 %vm1117_vm4, %v5521_v60  ;;  %2064 = vmatpush.bf16.msrb.mxu3 %v3824_v56  ;;  %v6065_v31 = vadd.f32 %v5316_v11, %v830_v13  ;;  %v3959_v13 = vld [vmem:[%s6737_s4 + $0x418] sm:$0xf0] }
 0x22b   :  { %v1173_v8 = vpop.f32.mrf.mxu3 }
 0x22c   :  { %v1231_v9 = vpop.f32.mrf.mxu2 }
 0x22d   :  { %v1144_v17 = vpop.f32.mrf.mxu1  ;;  %v1202_v43 = vpop.f32.mrf.mxu0 }
 0x22e   :  { %v5964_v39 = vadd.f32 %v1173_v8, %v1144_v17  ;;  %v5966_v18 = vadd.f32 %v1231_v9, %v1202_v43  ;;  %v4031_v8 = vld [vmem:[%s6737_s4 + $0x4a8] sm:$0xf0]  ;;  %v3759_v43 = vld [vmem:[%s6737_s4 + $0x2d0] sm:$0xf] }
 0x22f   :  { %v4034_v9 = vor.u32 %v4459_v29, %v4031_v8  ;;  %v3760_v15 = vor.u32 %v4402_v19, %v3759_v43  ;;  %v4443_v29 = vld [vmem:[%s6737_s4 + $0x424] sm:$0xf]  ;;  %v3967_v8 = vld [vmem:[%s6737_s4 + $0x428] sm:$0xf0]  ;;  %v4458_v43 = vld [vmem:[%s6737_s4 + $0x494] sm:$0xf0] }
 0x230   :  { %1723 = vmatmul.bf16.gmra.mxu1 %v5567_v14  ;;  %1781 = vmatmul.bf16.gmra.mxu0 %v5567_v14 }
 0x231   :  { %2434 = vmatpush.bf16.msra.mxu2 %v4034_v9  ;;  %2035 = vmatpush.bf16.msrb.mxu1 %v3760_v15  ;;  %v884_v9 = vmax.f32 %v6065_v31, 0.0 }
 0x233   :  { %v1175_v6 = vpop.f32.mrf.mxu3  ;;  %v6104_v37 = vpack.c.bf16 %v884_v9, %v882_v3  ;;  %v3965_v3 = vld [vmem:[%s6737_s4 + $0x420] sm:$0xf] }
 0x234   :  { %v1233_v55 = vpop.f32.mrf.mxu2 }
 0x235   :  { %v1146_v46 = vpop.f32.mrf.mxu1  ;;  %v1204_v32 = vpop.f32.mrf.mxu0  ;;  %2346 = vmatpush.bf16.msra.mxu1 %v3974_v44 }
 0x236   :  { %v6000_v25 = vadd.f32 %v1175_v6, %v1146_v46  ;;  %v6002_v49 = vadd.f32 %v1233_v55, %v1204_v32  ;;  %v4030_v6 = vor.u32 %v4460_v59, %v4029_v30  ;;  %v3978_v55 = vor.u32 %v4445_v24, %v3975_v35  ;;  %v4457_v32 = vld [vmem:[%s6737_s4 + $0x494] sm:$0xf]  ;;  %v4455_v59 = vld [vmem:[%s6737_s4 + $0x484] sm:$0xf] }
 0x237   :  { %v4026_v57 = vor.u32 %v4457_v32, %v4023_v63  ;;  %v4018_v24 = vor.u32 %v4455_v59, %v4015_v27  ;;  %v4441_v35 = vld [vmem:[%s6737_s4 + $0x414] sm:$0xf]  ;;  %v4013_v63 = vld [vmem:[%s6737_s4 + $0x480] sm:$0xf]  ;;  %v4454_v27 = vld [vmem:[%s6737_s4 + $0x474] sm:$0xf0] }
 0x238   :  { %3721 = vmatmul.msk.bf16.gmra.mxu3 %vm1117_vm4, %v5563_v20  ;;  %2404 = vmatpush.bf16.msra.mxu0 %v3978_v55 }
 0x239   :  { %3725 = vmatmul.msk.bf16.gmra.mxu2 %vm1117_vm4, %v5563_v20  ;;  %2376 = vmatpush.bf16.msra.mxu3 %v4030_v6  ;;  %v4444_v6 = vld [vmem:[%s6737_s4 + $0x424] sm:$0xf0] }
 0x23a   :  { %2435 = vmatpush.bf16.msra.mxu2 %v4026_v57  ;;  %v3966_v55 = vor.u32 %v4444_v6, %v3965_v3 }
 0x23b   :  { %v1178_v17 = vpop.f32.mrf.mxu3 }
 0x23c   :  { %v1236_v23 = vpop.f32.mrf.mxu2  ;;  %2347 = vmatpush.bf16.msra.mxu1 %v3966_v55 }
 0x23d   :  { %v1149_v48 = vpop.f32.mrf.mxu1  ;;  %v1207_v45 = vpop.f32.mrf.mxu0 }
 0x23e   :  { %v6037_v38 = vadd.f32 %v1178_v17, %v1149_v48  ;;  %v6039_v58 = vadd.f32 %v1236_v23, %v1207_v45  ;;  %v3970_v17 = vor.u32 %v4443_v29, %v3967_v8  ;;  %v4022_v23 = vor.u32 %v4458_v43, %v4021_v40  ;;  %2436 = vmatpush.bf16.msra.mxu2 %v4018_v24  ;;  %v3957_v29 = vld [vmem:[%s6737_s4 + $0x410] sm:$0xf]  ;;  %v4442_v8 = vld [vmem:[%s6737_s4 + $0x414] sm:$0xf0]  ;;  %v4453_v40 = vld [vmem:[%s6737_s4 + $0x474] sm:$0xf] }
 0x23f   :  { %v4007_v43 = vld [vmem:[%s6737_s4 + $0x478] sm:$0xf0] }
 0x240   :  { %1728 = vmatmul.bf16.gmra.mxu1 %v5627_v2  ;;  %1786 = vmatmul.bf16.gmra.mxu0 %v5627_v2 }
 0x241   :  { %2405 = vmatpush.bf16.msra.mxu0 %v3970_v17  ;;  %2377 = vmatpush.bf16.msra.mxu3 %v4022_v23  ;;  %v3958_v17 = vor.u32 %v4442_v8, %v3957_v29  ;;  %v3951_v23 = vld [vmem:[%s6737_s4 + $0x408] sm:$0xf0] }
 0x243   :  { %v1180_v56 = vpop.f32.mrf.mxu3  ;;  %2348 = vmatpush.bf16.msra.mxu1 %v3958_v17 }
 0x244   :  { %v1238_v46 = vpop.f32.mrf.mxu2 }
 0x245   :  { %v1151_v36 = vpop.f32.mrf.mxu1  ;;  %v1209_v5 = vpop.f32.mrf.mxu0 }
 0x246   :  { %v6073_v1 = vadd.f32 %v1180_v56, %v1151_v36  ;;  %v6075_v51 = vadd.f32 %v1238_v46, %v1209_v5  ;;  %v3962_v56 = vor.u32 %v4441_v35, %v3959_v13  ;;  %v4456_v36 = vld [vmem:[%s6737_s4 + $0x484] sm:$0xf0] }
 0x247   :  { %v4014_v62 = vor.u32 %v4456_v36, %v4013_v63  ;;  %v3999_v63 = vld [vmem:[%s6737_s4 + $0x468] sm:$0xf0]  ;;  %v3943_v36 = vld [vmem:[%s6737_s4 + $0x3f8] sm:$0xf0] }
 0x248   :  { %3722 = vmatmul.msk.bf16.gmra.mxu3 %vm1117_vm4, %v6071_v52  ;;  %2406 = vmatpush.bf16.msra.mxu0 %v3962_v56 }
 0x249   :  { %3726 = vmatmul.msk.bf16.gmra.mxu2 %vm1117_vm4, %v6071_v52  ;;  %2378 = vmatpush.bf16.msra.mxu3 %v4014_v62 }
 0x24b   :  { %v1183_v19 = vpop.f32.mrf.mxu3 }
 0x24c   :  { %v1241_v15 = vpop.f32.mrf.mxu2 }
 0x24d   :  { %v1154_v48 = vpop.f32.mrf.mxu1  ;;  %v1212_v45 = vpop.f32.mrf.mxu0 }
 0x24e   :  { %v6106_v33 = vadd.f32 %v1183_v19, %v1154_v48  ;;  %v6108_v30 = vadd.f32 %v1241_v15, %v1212_v45  ;;  %v4439_v19 = vld [vmem:[%s6737_s4 + $0x404] sm:$0xf]  ;;  %v4010_v15 = vor.u32 %v4453_v40, %v4007_v43 }
 0x24f   :  { %v3954_v48 = vor.u32 %v4439_v19, %v3951_v23 }
 0x250   :  { %1733 = vmatmul.bf16.gmra.mxu1 %v6104_v37  ;;  %1791 = vmatmul.bf16.gmra.mxu0 %v6104_v37 }
 0x251   :  { %2437 = vmatpush.bf16.msra.mxu2 %v4010_v15  ;;  %2407 = vmatpush.bf16.msra.mxu0 %v3954_v48  ;;  %v3997_v15 = vld [vmem:[%s6737_s4 + $0x460] sm:$0xf]  ;;  %v4452_v48 = vld [vmem:[%s6737_s4 + $0x464] sm:$0xf0] }
 0x253   :  { %v1185_v46 = vpop.f32.mrf.mxu3 }
 0x254   :  { %v1243_v32 = vpop.f32.mrf.mxu2 }
 0x255   :  { %v1156_v5 = vpop.f32.mrf.mxu1  ;;  %v1214_v57 = vpop.f32.mrf.mxu0 }
 0x256   :  { %v6136_v22 = vadd.f32 %v1185_v46, %v1156_v5  ;;  %v6138_v44 = vadd.f32 %v1243_v32, %v1214_v57  ;;  %v3949_v46 = vld [vmem:[%s6737_s4 + $0x400] sm:$0xf]  ;;  %v4440_v32 = vld [vmem:[%s6737_s4 + $0x404] sm:$0xf0] }
 0x258   :  { %3877 = vmatmul.msk.bf16.vlgmr.msrb.gmra.mxu3 %vm1117_vm4, %v5428_v4 }
 0x259   :  { %3881 = vmatmul.msk.bf16.vlgmr.msrb.gmra.mxu2 %vm1117_vm4, %v5428_v4  ;;  %v4005_v4 = vld [vmem:[%s6737_s4 + $0x470] sm:$0xf] }
 0x25a   :  { %v4006_v6 = vor.u32 %v4454_v27, %v4005_v4  ;;  %v3935_v4 = vld [vmem:[%s6737_s4 + $0x3e8] sm:$0xf0] }
 0x25b   :  { %v1446_v45 = vpop.f32.mrf.mxu3 }
 0x25c   :  { %v1504_v59 = vpop.f32.mrf.mxu2  ;;  %2379 = vmatpush.bf16.msra.mxu3 %v4006_v6 }
 0x25d   :  { %v1417_v3 = vpop.f32.mrf.mxu1  ;;  %v1475_v24 = vpop.f32.mrf.mxu0 }
 0x25e   :  { %v1418_v35 = vadd.f32 %v1417_v3, %v5902_v21  ;;  %v1476_v13 = vadd.f32 %v1475_v24, %v5910_v10  ;;  %v4451_v21 = vld [vmem:[%s6737_s4 + $0x464] sm:$0xf]  ;;  %v3950_v10 = vor.u32 %v4440_v32, %v3949_v46  ;;  %v4449_v24 = vld [vmem:[%s6737_s4 + $0x454] sm:$0xf] }
 0x25f   :  { %v4002_v5 = vor.u32 %v4451_v21, %v3999_v63  ;;  %v3989_v63 = vld [vmem:[%s6737_s4 + $0x450] sm:$0xf] }
 0x260   :  { %v6170_v55 = vadd.f32 %v1446_v45, %v1418_v35  ;;  %v6172_v56 = vadd.f32 %v1504_v59, %v1476_v13  ;;  %2036 = vmatmul.bf16.vlgmr.msrb.gmra.mxu1 %v5471_v42  ;;  %2094 = vmatmul.bf16.vlgmr.msrb.gmra.mxu0 %v5471_v42  ;;  %v4437_v42 = vld [vmem:[%s6737_s4 + $0x3f4] sm:$0xf]  ;;  %v4438_v45 = vld [vmem:[%s6737_s4 + $0x3f4] sm:$0xf0]  ;;  %v4435_v59 = vld [vmem:[%s6737_s4 + $0x3e4] sm:$0xf] }
 0x261   :  { %v3946_v57 = vor.u32 %v4437_v42, %v3943_v36  ;;  %2349 = vmatpush.bf16.msra.mxu1 %v3950_v10  ;;  %2438 = vmatpush.bf16.msra.mxu2 %v4002_v5  ;;  %v3938_v3 = vor.u32 %v4435_v59, %v3935_v4  ;;  %v4450_v42 = vld [vmem:[%s6737_s4 + $0x454] sm:$0xf0] }
 0x263   :  { %v1448_v62 = vpop.f32.mrf.mxu3  ;;  %2408 = vmatpush.bf16.msra.mxu0 %v3946_v57  ;;  %v3990_v57 = vor.u32 %v4450_v42, %v3989_v63 }
 0x264   :  { %v1506_v29 = vpop.f32.mrf.mxu2 }
 0x265   :  { %v1419_v8 = vpop.f32.mrf.mxu1  ;;  %v1477_v40 = vpop.f32.mrf.mxu0 }
 0x266   :  { %v1420_v17 = vadd.f32 %v1419_v8, %v5932_v54  ;;  %v1478_v43 = vadd.f32 %v1477_v40, %v5934_v28  ;;  %v3941_v54 = vld [vmem:[%s6737_s4 + $0x3f0] sm:$0xf]  ;;  %v3998_v28 = vor.u32 %v4452_v48, %v3997_v15  ;;  %v3927_v8 = vld [vmem:[%s6737_s4 + $0x3d8] sm:$0xf0]  ;;  %v3983_v40 = vld [vmem:[%s6737_s4 + $0x448] sm:$0xf0] }
 0x267   :  { %v3942_v27 = vor.u32 %v4438_v45, %v3941_v54  ;;  %2409 = vmatpush.bf16.msra.mxu0 %v3938_v3  ;;  %v3981_v48 = vld [vmem:[%s6737_s4 + $0x440] sm:$0xf]  ;;  %v4448_v54 = vld [vmem:[%s6737_s4 + $0x444] sm:$0xf0]  ;;  %v721_v3 = vpop.permute.xlu0 %720 }
 0x268   :  { %v6196_v19 = vadd.f32 %v1448_v62, %v1420_v17  ;;  %v6198_v23 = vadd.f32 %v1506_v29, %v1478_v43  ;;  %3878 = vmatmul.msk.bf16.gmra.mxu3 %vm1117_vm4, %v5523_v53  ;;  %v4433_v62 = vld [vmem:[%s6737_s4 + $0x3d4] sm:$0xf]  ;;  %v3982_v59 = vor.u32 %v4448_v54, %v3981_v48 }
 0x269   :  { %3882 = vmatmul.msk.bf16.gmra.mxu2 %vm1117_vm4, %v5523_v53  ;;  %v3991_v53 = vld [vmem:[%s6737_s4 + $0x458] sm:$0xf0]  ;;  %2380 = vmatpush.bf16.msra.mxu3 %v3998_v28  ;;  %v3930_v17 = vor.u32 %v4433_v62, %v3927_v8  ;;  %v784_v28 = vpop.permute.xlu1 %783 }
 0x26a   :  { %v3994_v35 = vor.u32 %v4449_v24, %v3991_v53  ;;  %2350 = vmatpush.bf16.msra.mxu1 %v3942_v27 }
 0x26b   :  { %v1451_v6 = vpop.f32.mrf.mxu3  ;;  %2410 = vmatpush.bf16.msra.mxu0 %v3930_v17 }
 0x26c   :  { %v1509_v13 = vpop.f32.mrf.mxu2  ;;  %2439 = vmatpush.bf16.msra.mxu2 %v3994_v35  ;;  %v3925_v35 = vld [vmem:[%s6737_s4 + $0x3d0] sm:$0xf] }
 0x26d   :  { %v1422_v46 = vpop.f32.mrf.mxu1  ;;  %v1480_v32 = vpop.f32.mrf.mxu0  ;;  %2381 = vmatpush.bf16.msra.mxu3 %v3990_v57 }
 0x26e   :  { %v1423_v21 = vadd.f32 %v1422_v46, %v5964_v39  ;;  %v1481_v10 = vadd.f32 %v1480_v32, %v5966_v18  ;;  %v3933_v39 = vld [vmem:[%s6737_s4 + $0x3e0] sm:$0xf]  ;;  %v4436_v18 = vld [vmem:[%s6737_s4 + $0x3e4] sm:$0xf0] }
 0x26f   :  { %v3934_v29 = vor.u32 %v4436_v18, %v3933_v39  ;;  %v3917_v39 = vld [vmem:[%s6737_s4 + $0x3c0] sm:$0xf]  ;;  %v4432_v18 = vld [vmem:[%s6737_s4 + $0x3c4] sm:$0xf0] }
 0x270   :  { %v6236_v36 = vadd.f32 %v1451_v6, %v1423_v21  ;;  %v6238_v5 = vadd.f32 %v1509_v13, %v1481_v10  ;;  %2041 = vmatmul.bf16.gmra.mxu1 %v5569_v34  ;;  %2099 = vmatmul.bf16.gmra.mxu0 %v5569_v34  ;;  %v4447_v34 = vld [vmem:[%s6737_s4 + $0x444] sm:$0xf]  ;;  %v810_v6 = vsel %vm799_vm3, %v721_v3, %v784_v28  ;;  %v4434_v13 = vld [vmem:[%s6737_s4 + $0x3d4] sm:$0xf0]  ;;  %v3919_v21 = vld [vmem:[%s6737_s4 + $0x3c8] sm:$0xf0] }
 0x271   :  { %v3986_v43 = vor.u32 %v4447_v34, %v3983_v40  ;;  %2351 = vmatpush.bf16.msra.mxu1 %v3934_v29  ;;  %2382 = vmatpush.bf16.msra.mxu3 %v3982_v59  ;;  %v833_v63 = vmax.f32 %v5223_v16, %v810_v6  ;;  %v3918_v62 = vor.u32 %v4432_v18, %v3917_v39  ;;  %v719_v34 = vpop.permute.xlu2 %718 }
 0x272   :  { %v737_v17 = vsel %vm726_vm2, %v719_v34, %v721_v3 }
 0x273   :  { %v1453_v15 = vpop.f32.mrf.mxu3  ;;  %2440 = vmatpush.bf16.msra.mxu2 %v3986_v43  ;;  %v832_v48 = vmax.f32 %v5151_v47, %v737_v17 }
 0x274   :  { %v1511_v45 = vpop.f32.mrf.mxu2 }
 0x275   :  { %v1424_v4 = vpop.f32.mrf.mxu1  ;;  %v1482_v27 = vpop.f32.mrf.mxu0 }
 0x276   :  { %v1425_v24 = vadd.f32 %v1424_v4, %v6000_v25  ;;  %v1483_v53 = vadd.f32 %v1482_v27, %v6002_v49  ;;  %v3926_v25 = vor.u32 %v4434_v13, %v3925_v35  ;;  %v4431_v49 = vld [vmem:[%s6737_s4 + $0x3c4] sm:$0xf] }
 0x277   :  { %v3922_v10 = vor.u32 %v4431_v49, %v3919_v21 }
 0x278   :  { %v6275_v46 = vadd.f32 %v1453_v15, %v1425_v24  ;;  %v6277_v32 = vadd.f32 %v1511_v45, %v1483_v53  ;;  %3879 = vmatmul.msk.bf16.gmra.mxu3 %vm1117_vm4, %v5589_v50  ;;  %2352 = vmatpush.bf16.msra.mxu1 %v3926_v25 }
 0x279   :  { %3883 = vmatmul.msk.bf16.gmra.mxu2 %vm1117_vm4, %v5589_v50  ;;  %2411 = vmatpush.bf16.msra.mxu0 %v3922_v10  ;;  %v6297_v50 = vadd.f32 %v5319_v0, %v833_v63 }
 0x27b   :  { %v1456_v42 = vpop.f32.mrf.mxu3  ;;  %v887_v54 = vmax.f32 %v6297_v50, 0.0 }
 0x27c   :  { %v1514_v57 = vpop.f32.mrf.mxu2  ;;  %2353 = vmatpush.bf16.msra.mxu1 %v3918_v62 }
 0x27d   :  { %v1427_v29 = vpop.f32.mrf.mxu1  ;;  %v1485_v8 = vpop.f32.mrf.mxu0  ;;  %v1843_v4 = vpack.c.bf16 %v887_v54, %v885_v12 }
 0x27e   :  { %v1428_v16 = vadd.f32 %v1427_v29, %v6037_v38  ;;  %v1486_v40 = vadd.f32 %v1485_v8, %v6039_v58  ;;  %v6311_v58 = vadd.f32 %v5316_v11, %v832_v48 }
 0x280   :  { %v6302_v43 = vadd.f32 %v1456_v42, %v1428_v16  ;;  %v6304_v15 = vadd.f32 %v1514_v57, %v1486_v40  ;;  %2046 = vmatmul.bf16.gmra.mxu1 %v5631_v61  ;;  %2104 = vmatmul.bf16.gmra.mxu0 %v5631_v61  ;;  %v886_v24 = vmax.f32 %v6311_v58, 0.0 }
 0x283   :  { %v1458_v28 = vpop.f32.mrf.mxu3 }
 0x284   :  { %v1516_v45 = vpop.f32.mrf.mxu2 }
 0x285   :  { %v1429_v38 = vpop.f32.mrf.mxu1  ;;  %v1487_v59 = vpop.f32.mrf.mxu0 }
 0x286   :  { %v1430_v27 = vadd.f32 %v1429_v38, %v6073_v1  ;;  %v1488_v61 = vadd.f32 %v1487_v59, %v6075_v51  ;;  %v1842_v51 = vpack.c.bf16 %v886_v24, %v884_v9  ;;  %v786_v59 = vpop.permute.xlu1 %785 }
 0x288   :  { %v6319_v3 = vadd.f32 %v1458_v28, %v1430_v27  ;;  %v6321_v47 = vadd.f32 %v1516_v45, %v1488_v61  ;;  %3880 = vmatmul.msk.bf16.gmra.mxu3 %vm1117_vm4, %v1843_v4  ;;  %v725_v61 = vpop.permute.xlu0 %724 }
 0x289   :  { %3884 = vmatmul.msk.bf16.gmra.mxu2 %vm1117_vm4, %v1843_v4 }
 0x28b   :  { %v1461_v53 = vpop.f32.mrf.mxu3 }
 0x28c   :  { %v1519_v6 = vpop.f32.mrf.mxu2 }
 0x28d   :  { %v1432_v7 = vpop.f32.mrf.mxu1  ;;  %v1490_v35 = vpop.f32.mrf.mxu0 }
 0x28e   :  { %v1433_v12 = vadd.f32 %v1432_v7, %v6106_v33  ;;  %v1491_v1 = vadd.f32 %v1490_v35, %v6108_v30 }
 0x290   :  { %v6332_v13 = vadd.f32 %v1461_v53, %v1433_v12  ;;  %v6334_v25 = vadd.f32 %v1519_v6, %v1491_v1  ;;  %2051 = vmatmul.bf16.gmra.mxu1 %v1842_v51  ;;  %2109 = vmatmul.bf16.gmra.mxu0 %v1842_v51  ;;  %v811_v6 = vsel %vm799_vm3, %v725_v61, %v786_v59  ;;  %v723_v1 = vpop.permute.xlu2 %722 }
 0x293   :  { %v1463_v49 = vpop.f32.mrf.mxu3 }
 0x294   :  { %v1521_v21 = vpop.f32.mrf.mxu2 }
 0x295   :  { %v1434_v10 = vpop.f32.mrf.mxu1  ;;  %v1492_v63 = vpop.f32.mrf.mxu0 }
 0x296   :  { %v1435_v42 = vadd.f32 %v1434_v10, %v6136_v22  ;;  %v1493_v33 = vadd.f32 %v1492_v63, %v6138_v44 }
 0x298   :  { %v6338_v30 = vadd.f32 %v1463_v49, %v1435_v42  ;;  %v6340_v31 = vadd.f32 %v1521_v21, %v1493_v33  ;;  %4035 = vmatmul.msk.bf16.vlgmr.msra.gmra.mxu3 %vm1117_vm4, %v5521_v60 }
 0x299   :  { %4039 = vmatmul.msk.bf16.vlgmr.msra.gmra.mxu2 %vm1117_vm4, %v5521_v60 }
 0x29b   :  { %v1748_v9 = vpop.f32.mrf.mxu3 }
 0x29c   :  { %v1806_v39 = vpop.f32.mrf.mxu2 }
 0x29d   :  { %v1719_v18 = vpop.f32.mrf.mxu1  ;;  %v1777_v57 = vpop.f32.mrf.mxu0 }
 0x29e   :  { %v1749_v62 = vadd.f32 %v1748_v9, %v1719_v18  ;;  %v1807_v29 = vadd.f32 %v1806_v39, %v1777_v57 }
 0x2a0   :  { %v6347_v22 = vadd.f32 %v1749_v62, %v6170_v55  ;;  %v6350_v44 = vadd.f32 %v1807_v29, %v6172_v56  ;;  %2354 = vmatmul.bf16.vlgmr.msra.gmra.mxu1 %v5567_v14  ;;  %2412 = vmatmul.bf16.vlgmr.msra.gmra.mxu0 %v5567_v14 }
 0x2a3   :  { %v6354_v8 = vpop.f32.mrf.mxu3 }
 0x2a4   :  { %v6356_v34 = vpop.f32.mrf.mxu2 }
 0x2a5   :  { %v6358_v60 = vpop.f32.mrf.mxu1  ;;  %v6360_v16 = vpop.f32.mrf.mxu0 }
 0x2a8   :  { %4036 = vmatmul.msk.bf16.gmra.mxu3 %vm1117_vm4, %v5563_v20 }
 0x2a9   :  { %4040 = vmatmul.msk.bf16.gmra.mxu2 %vm1117_vm4, %v5563_v20 }
 0x2ab   :  { %v1753_v55 = vpop.f32.mrf.mxu3 }
 0x2ac   :  { %v1811_v56 = vpop.f32.mrf.mxu2 }
 0x2ad   :  { %v1724_v40 = vpop.f32.mrf.mxu1  ;;  %v1782_v17 = vpop.f32.mrf.mxu0 }
 0x2ae   :  { %v1754_v48 = vadd.f32 %v1753_v55, %v1724_v40  ;;  %v1812_v14 = vadd.f32 %v1811_v56, %v1782_v17 }
 0x2b0   :  { %v6367_v28 = vadd.f32 %v1754_v48, %v6236_v36  ;;  %v6370_v45 = vadd.f32 %v1812_v14, %v6238_v5  ;;  %2359 = vmatmul.bf16.gmra.mxu1 %v5627_v2  ;;  %2417 = vmatmul.bf16.gmra.mxu0 %v5627_v2  ;;  %v835_v2 = vmax.f32 %v5237_v26, %v811_v6 }
 0x2b2   :  { %v865_v51 = vadd.f32 %v5319_v0, %v835_v2 }
 0x2b3   :  { %v6374_v38 = vpop.f32.mrf.mxu3 }
 0x2b4   :  { %v1813_v20 = vpop.f32.mrf.mxu2 }
 0x2b5   :  { %v6376_v4 = vpop.f32.mrf.mxu1  ;;  %v1784_v27 = vpop.f32.mrf.mxu0 }
 0x2b6   :  { %v1814_v53 = vadd.f32 %v1813_v20, %v1784_v27 }
 0x2b8   :  { %v6380_v36 = vadd.f32 %v1814_v53, %v6277_v32  ;;  %4037 = vmatmul.msk.bf16.gmra.mxu3 %vm1117_vm4, %v6071_v52  ;;  %v738_v32 = vsel %vm726_vm2, %v723_v1, %v725_v61 }
 0x2b9   :  { %4041 = vmatmul.msk.bf16.gmra.mxu2 %vm1117_vm4, %v6071_v52  ;;  %v834_v26 = vmax.f32 %v5176_v41, %v738_v32  ;;  %v889_v52 = vmax.f32 %v865_v51, 0.0 }
 0x2bb   :  { %v1758_v5 = vpop.f32.mrf.mxu3  ;;  %v864_v39 = vadd.f32 %v5316_v11, %v834_v26 }
 0x2bc   :  { %v1816_v7 = vpop.f32.mrf.mxu2 }
 0x2bd   :  { %v1729_v35 = vpop.f32.mrf.mxu1  ;;  %v1787_v12 = vpop.f32.mrf.mxu0  ;;  %v888_v41 = vmax.f32 %v864_v39, 0.0 }
 0x2be   :  { %v1759_v49 = vadd.f32 %v1758_v5, %v1729_v35  ;;  %v1817_v21 = vadd.f32 %v1816_v7, %v1787_v12 }
 0x2bf   :  { %v2160_v11 = vpack.c.bf16 %v888_v41, %v886_v24 }
 0x2c0   :  { %v6390_v10 = vadd.f32 %v1759_v49, %v6302_v43  ;;  %v6393_v63 = vadd.f32 %v1817_v21, %v6304_v15  ;;  %2364 = vmatmul.bf16.gmra.mxu1 %v6104_v37  ;;  %2422 = vmatmul.bf16.gmra.mxu0 %v6104_v37  ;;  %v2161_v43 = vpack.c.bf16 %v889_v52, %v887_v54 }
 0x2c3   :  { %v6398_v42 = vpop.f32.mrf.mxu3 }
 0x2c4   :  { %v1818_v0 = vpop.f32.mrf.mxu2 }
 0x2c5   :  { %v6400_v33 = vpop.f32.mrf.mxu1  ;;  %v1789_v9 = vpop.f32.mrf.mxu0 }
 0x2c6   :  { %v1819_v15 = vadd.f32 %v1818_v0, %v1789_v9 }
 0x2c8   :  { %v6406_v18 = vadd.f32 %v1819_v15, %v6321_v47  ;;  %4038 = vmatmul.msk.bf16.gmra.mxu3 %vm1117_vm4, %v2161_v43 }
 0x2c9   :  { %4042 = vmatmul.msk.bf16.gmra.mxu2 %vm1117_vm4, %v2161_v43 }
 0x2cb   :  { %v1763_v37 = vpop.f32.mrf.mxu3 }
 0x2cc   :  { %v1821_v57 = vpop.f32.mrf.mxu2 }
 0x2cd   :  { %v1734_v62 = vpop.f32.mrf.mxu1  ;;  %v1792_v29 = vpop.f32.mrf.mxu0 }
 0x2ce   :  { %v1764_v55 = vadd.f32 %v1763_v37, %v1734_v62  ;;  %v1822_v56 = vadd.f32 %v1821_v57, %v1792_v29 }
 0x2d0   :  { %v1838_v50 = vadd.f32 %v1764_v55, %v6332_v13  ;;  %v1839_v54 = vadd.f32 %v1822_v56, %v6334_v25  ;;  %2369 = vmatmul.bf16.gmra.mxu1 %v2160_v11  ;;  %2427 = vmatmul.bf16.gmra.mxu0 %v2160_v11 }
 0x2d3   :  { %v1765_v47 = vpop.f32.mrf.mxu3 }
 0x2d4   :  { %v1823_v40 = vpop.f32.mrf.mxu2 }
 0x2d5   :  { %v1736_v17 = vpop.f32.mrf.mxu1  ;;  %v1794_v48 = vpop.f32.mrf.mxu0 }
 0x2d6   :  { %v1766_v14 = vadd.f32 %v1765_v47, %v1736_v17  ;;  %v1824_v59 = vadd.f32 %v1823_v40, %v1794_v48 }
 0x2d8   :  { %v6415_v20 = vadd.f32 %v1766_v14, %v6338_v30  ;;  %v6418_v27 = vadd.f32 %v1824_v59, %v6340_v31 }
 0x2db   :  { %v2066_v58 = vpop.f32.mrf.mxu3 }
 0x2dc   :  { %v2124_v24 = vpop.f32.mrf.mxu2 }
 0x2dd   :  { %v2037_v61 = vpop.f32.mrf.mxu1  ;;  %v2095_v13 = vpop.f32.mrf.mxu0 }
 0x2de   :  { %v2067_v53 = vadd.f32 %v2066_v58, %v2037_v61  ;;  %v2125_v25 = vadd.f32 %v2124_v24, %v2095_v13 }
 0x2e0   :  { %v6421_v6 = vadd.f32 %v2067_v53, %v6347_v22  ;;  %v6424_v2 = vadd.f32 %v2125_v25, %v6350_v44  ;;  %v1756_v22 = vadd.f32 %v6374_v38, %v6376_v4 }
 0x2e2   :  { %v1832_v39 = vadd.f32 %v1756_v22, %v6275_v46 }
 0x2e3   :  { %v2068_v5 = vpop.f32.mrf.mxu3 }
 0x2e4   :  { %v2126_v7 = vpop.f32.mrf.mxu2 }
 0x2e5   :  { %v2039_v35 = vpop.f32.mrf.mxu1  ;;  %v2097_v30 = vpop.f32.mrf.mxu0 }
 0x2eb   :  { %v2071_v12 = vpop.f32.mrf.mxu3 }
 0x2ec   :  { %v2129_v1 = vpop.f32.mrf.mxu2 }
 0x2ed   :  { %v2042_v31 = vpop.f32.mrf.mxu1  ;;  %v2100_v51 = vpop.f32.mrf.mxu0 }
 0x2ee   :  { %v2072_v49 = vadd.f32 %v2071_v12, %v2042_v31  ;;  %v2130_v21 = vadd.f32 %v2129_v1, %v2100_v51  ;;  %v1751_v1 = vadd.f32 %v6354_v8, %v6358_v60  ;;  %v2127_v31 = vadd.f32 %v2126_v7, %v2097_v30 }
 0x2f0   :  { %v6427_v32 = vadd.f32 %v2072_v49, %v6367_v28  ;;  %v6430_v26 = vadd.f32 %v2130_v21, %v6370_v45  ;;  %v2478_v49 = vld [vmem:[%s6739_s5] sm:$0x3]  ;;  %v1828_v22 = vadd.f32 %v1751_v1, %v6196_v19  ;;  %s4518_s5 = smov 108  }
 0x2f1   :  { %v6476_v8 = vperm.slane %v2478_v49, 0  ;;  %v6478_v60 = vperm.slane %v2478_v49, 1 }
 0x2f3   :  { %v2073_v44 = vpop.f32.mrf.mxu3 }
 0x2f4   :  { %v6434_v52 = vpop.f32.mrf.mxu2 }
 0x2f5   :  { %v2044_v0 = vpop.f32.mrf.mxu1  ;;  %v6436_v9 = vpop.f32.mrf.mxu0 }
 0x2f6   :  { %v2074_v43 = vadd.f32 %v2073_v44, %v2044_v0 }
 0x2f8   :  { %v6439_v15 = vadd.f32 %v2074_v43, %v1832_v39 }
 0x2fb   :  { %v2076_v41 = vpop.f32.mrf.mxu3 }
 0x2fc   :  { %v2134_v28 = vpop.f32.mrf.mxu2 }
 0x2fd   :  { %v2047_v37 = vpop.f32.mrf.mxu1  ;;  %v2105_v57 = vpop.f32.mrf.mxu0 }
 0x2fe   :  { %v2077_v45 = vadd.f32 %v2076_v41, %v2047_v37  ;;  %v2135_v62 = vadd.f32 %v2134_v28, %v2105_v57 }
 0x300   :  { %v6442_v29 = vadd.f32 %v2077_v45, %v6390_v10  ;;  %v6445_v38 = vadd.f32 %v2135_v62, %v6393_v63 }
 0x303   :  { %v6447_v4 = vpop.f32.mrf.mxu3 }
 0x304   :  { %v6449_v55 = vpop.f32.mrf.mxu2 }
 0x305   :  { %v6451_v46 = vpop.f32.mrf.mxu1  ;;  %v6453_v56 = vpop.f32.mrf.mxu0 }
 0x30b   :  { %v2081_v11 = vpop.f32.mrf.mxu3 }
 0x30c   :  { %v2139_v47 = vpop.f32.mrf.mxu2 }
 0x30d   :  { %v2052_v40 = vpop.f32.mrf.mxu1  ;;  %v2110_v17 = vpop.f32.mrf.mxu0 }
 0x30e   :  { %v2082_v48 = vadd.f32 %v2081_v11, %v2052_v40  ;;  %v2140_v14 = vadd.f32 %v2139_v47, %v2110_v17  ;;  %v2132_v17 = vadd.f32 %v6434_v52, %v6436_v9 }
 0x310   :  { %v6455_v59 = vadd.f32 %v2082_v48, %v1838_v50  ;;  %v6457_v10 = vadd.f32 %v2140_v14, %v1839_v54  ;;  %v1809_v50 = vadd.f32 %v6356_v34, %v6360_v16  ;;  %v2069_v54 = vadd.f32 %v2068_v5, %v2039_v35 }
 0x312   :  { %v1829_v44 = vadd.f32 %v1809_v50, %v6198_v23  ;;  %v2146_v43 = vadd.f32 %v2069_v54, %v1828_v22 }
 0x313   :  { %v6459_v63 = vpop.f32.mrf.mxu3 }
 0x314   :  { %v6461_v58 = vpop.f32.mrf.mxu2  ;;  %v2147_v41 = vadd.f32 %v2127_v31, %v1829_v44 }
 0x315   :  { %v6463_v24 = vpop.f32.mrf.mxu1  ;;  %v6465_v61 = vpop.f32.mrf.mxu0 }
 0x31b   :  { %v2384_v13 = vpop.f32.mrf.mxu3 }
 0x31c   :  { %v2442_v53 = vpop.f32.mrf.mxu2 }
 0x31d   :  { %v2355_v25 = vpop.f32.mrf.mxu1  ;;  %v2413_v12 = vpop.f32.mrf.mxu0 }
 0x31e   :  { %v2385_v51 = vadd.f32 %v2384_v13, %v2355_v25  ;;  %v2443_v21 = vadd.f32 %v2442_v53, %v2413_v12  ;;  %v2151_v25 = vadd.f32 %v2132_v17, %v6380_v36 }
 0x320   :  { %v2462_v5 = vadd.f32 %v2385_v51, %v6421_v6  ;;  %v2463_v7 = vadd.f32 %v2443_v21, %v6424_v2 }
 0x322   :  { %v2484_v23 = vadd.f32 %v6476_v8, %v2462_v5  ;;  %v2485_v37 = vadd.f32 %v6478_v60, %v2463_v7 }
 0x323   :  { %v2386_v0 = vpop.f32.mrf.mxu3 }
 0x324   :  { %v2444_v39 = vpop.f32.mrf.mxu2 }
 0x325   :  { %v2357_v34 = vpop.f32.mrf.mxu1  ;;  %v2415_v16 = vpop.f32.mrf.mxu0 }
 0x326   :  { %v2387_v35 = vadd.f32 %v2386_v0, %v2357_v34  ;;  %v2445_v30 = vadd.f32 %v2444_v39, %v2415_v16  ;;  %v2137_v16 = vadd.f32 %v6449_v55, %v6453_v56  ;;  %v4470_v55 = vld [vmem:[%s6740_s6 + $0x48] sm:$0xff] }
 0x327   :  { %2626 = vmatpush.bf16.msrb.mxu3 %v4470_v55 }
 0x328   :  { %v2464_v28 = vadd.f32 %v2387_v35, %v2146_v43  ;;  %v2465_v19 = vadd.f32 %v2445_v30, %v2147_v41  ;;  %v2079_v41 = vadd.f32 %v6447_v4, %v6451_v46 }
 0x32a   :  { %v2486_v57 = vadd.f32 %v6476_v8, %v2464_v28  ;;  %v2487_v45 = vadd.f32 %v6478_v60, %v2465_v19 }
 0x32b   :  { %v2389_v62 = vpop.f32.mrf.mxu3 }
 0x32c   :  { %v2447_v11 = vpop.f32.mrf.mxu2  ;;  %v6486_v47 = vmax.f32 %v2485_v37, %v2487_v45  ;;  %v6488_v40 = vmax.f32 %v2484_v23, %v2486_v57  ;;  %v2155_v57 = vadd.f32 %v2137_v16, %v6406_v18  ;;  %v4487_v16 = vld [vmem:[%s6740_s6 + $0xd0] sm:$0xff] }
 0x32d   :  { %v2360_v6 = vpop.f32.mrf.mxu1  ;;  %v2418_v2 = vpop.f32.mrf.mxu0 }
 0x32e   :  { %2507 = vrot.lane.b32.xlu0 %v6486_v47, %s4518_s5  ;;  %2505 = vrot.lane.b32.xlu2 %v6488_v40, %s4518_s5  ;;  %v2390_v48 = vadd.f32 %v2389_v62, %v2360_v6  ;;  %v2448_v14 = vadd.f32 %v2447_v11, %v2418_v2 }
 0x32f   :  { %2513 = vrot.lane.b32.xlu1 %v6488_v40, %s4519_s11 }
 0x330   :  { %v2466_v50 = vadd.f32 %v2390_v48, %v6427_v32  ;;  %v2467_v54 = vadd.f32 %v2448_v14, %v6430_v26  ;;  %v2084_v14 = vadd.f32 %v6459_v63, %v6463_v24 }
 0x332   :  { %v2488_v22 = vadd.f32 %v6476_v8, %v2466_v50  ;;  %v2489_v52 = vadd.f32 %v6478_v60, %v2467_v54  ;;  %v2158_v50 = vadd.f32 %v2084_v14, %v6415_v20  ;;  %v4496_v14 = vld [vmem:[%s6740_s6 + $0x118] sm:$0xff] }
 0x333   :  { %v2391_v13 = vpop.f32.mrf.mxu3 }
 0x334   :  { %v2449_v53 = vpop.f32.mrf.mxu2 }
 0x335   :  { %v2362_v12 = vpop.f32.mrf.mxu1  ;;  %v2420_v1 = vpop.f32.mrf.mxu0 }
 0x336   :  { %v2392_v31 = vadd.f32 %v2391_v13, %v2362_v12  ;;  %v2450_v51 = vadd.f32 %v2449_v53, %v2420_v1  ;;  %v2142_v13 = vadd.f32 %v6461_v58, %v6465_v61 }
 0x338   :  { %v2468_v49 = vadd.f32 %v2392_v31, %v6439_v15  ;;  %v2469_v21 = vadd.f32 %v2450_v51, %v2151_v25  ;;  %v1761_v15 = vadd.f32 %v6398_v42, %v6400_v33  ;;  %v2159_v54 = vadd.f32 %v2142_v13, %v6418_v27  ;;  %v4482_v13 = vld [vmem:[%s6740_s6 + $0xa8] sm:$0xff] }
 0x33a   :  { %v2490_v9 = vadd.f32 %v6476_v8, %v2468_v49  ;;  %v2491_v44 = vadd.f32 %v6478_v60, %v2469_v21  ;;  %v1836_v7 = vadd.f32 %v1761_v15, %v6319_v3  ;;  %v4468_v3 = vld [vmem:[%s6740_s6 + $0x38] sm:$0xff]  ;;  %v4463_v15 = vld [vmem:[%s6740_s6 + $0x10] sm:$0xff] }
 0x33b   :  { %v2394_v36 = vpop.f32.mrf.mxu3  ;;  %2607 = vmatpush.bf16.msrb.mxu1 %v4468_v3 }
 0x33c   :  { %v2452_v0 = vpop.f32.mrf.mxu2  ;;  %v6506_v39 = vmax.f32 %v2489_v52, %v2491_v44  ;;  %v6508_v32 = vmax.f32 %v2488_v22, %v2490_v9  ;;  %v2154_v28 = vadd.f32 %v2079_v41, %v1836_v7  ;;  %v4465_v44 = vld [vmem:[%s6740_s6 + $0x20] sm:$0xff]  ;;  %v4462_v41 = vld [vmem:[%s6740_s6 + $0x8] sm:$0xff] }
 0x33d   :  { %v2365_v26 = vpop.f32.mrf.mxu1  ;;  %v2423_v43 = vpop.f32.mrf.mxu0  ;;  %v4486_v7 = vld [vmem:[%s6740_s6 + $0xc8] sm:$0xff] }
 0x33e   :  { %2643 = vrot.lane.b32.xlu2 %v6506_v39, %s4518_s5  ;;  %v2395_v34 = vadd.f32 %v2394_v36, %v2365_v26  ;;  %v2453_v5 = vadd.f32 %v2452_v0, %v2423_v43  ;;  %v4464_v36 = vld [vmem:[%s6740_s6 + $0x18] sm:$0xff]  ;;  %v4469_v26 = vld [vmem:[%s6740_s6 + $0x40] sm:$0xff]  ;;  %v4478_v43 = vld [vmem:[%s6740_s6 + $0x88] sm:$0xff] }
 0x33f   :  { %v4488_v0 = vld [vmem:[%s6740_s6 + $0xd8] sm:$0xff]  ;;  %2627 = vmatpush.bf16.msrb.mxu3 %v4469_v26  ;;  %2742 = vmatpush.bf16.msrb.mxu0 %v4478_v43 }
 0x340   :  { %v2470_v19 = vadd.f32 %v2395_v34, %v6442_v29  ;;  %v2471_v42 = vadd.f32 %v2453_v5, %v6445_v38  ;;  %2874 = vmatpush.bf16.msrb.mxu2 %v4488_v0  ;;  %v4461_v34 = vld [vmem:[%s6740_s6] sm:$0xff] }
 0x341   :  { %v4477_v5 = vld [vmem:[%s6740_s6 + $0x80] sm:$0xff] }
 0x342   :  { %v2492_v29 = vadd.f32 %v6476_v8, %v2470_v19  ;;  %v2493_v56 = vadd.f32 %v6478_v60, %v2471_v42  ;;  %v4484_v19 = vld [vmem:[%s6740_s6 + $0xb8] sm:$0xff] }
 0x343   :  { %v2396_v35 = vpop.f32.mrf.mxu3  ;;  %2743 = vmatpush.bf16.msrb.mxu0 %v4477_v5 }
 0x344   :  { %v2454_v30 = vpop.f32.mrf.mxu2  ;;  %2875 = vmatpush.bf16.msrb.mxu2 %v4487_v16 }
 0x345   :  { %v2367_v23 = vpop.f32.mrf.mxu1  ;;  %v2425_v37 = vpop.f32.mrf.mxu0 }
 0x346   :  { %v2397_v33 = vadd.f32 %v2396_v35, %v2367_v23  ;;  %v2455_v4 = vadd.f32 %v2454_v30, %v2425_v37  ;;  %v4476_v35 = vld [vmem:[%s6740_s6 + $0x78] sm:$0xff]  ;;  %v4485_v30 = vld [vmem:[%s6740_s6 + $0xc0] sm:$0xff]  ;;  %v4490_v37 = vld [vmem:[%s6740_s6 + $0xe8] sm:$0xff] }
 0x347   :  { %2744 = vmatpush.bf16.msrb.mxu0 %v4476_v35  ;;  %v4480_v23 = vld [vmem:[%s6740_s6 + $0x98] sm:$0xff]  ;;  %2893 = vmatpush.bf16.msra.mxu3 %v4490_v37 }
 0x348   :  { %v2472_v46 = vadd.f32 %v2397_v33, %v2154_v28  ;;  %v2473_v45 = vadd.f32 %v2455_v4, %v2155_v57  ;;  %2876 = vmatpush.bf16.msrb.mxu2 %v4486_v7  ;;  %v4475_v28 = vld [vmem:[%s6740_s6 + $0x70] sm:$0xff]  ;;  %v4474_v57 = vld [vmem:[%s6740_s6 + $0x68] sm:$0xff] }
 0x34a   :  { %v2494_v18 = vadd.f32 %v6476_v8, %v2472_v46  ;;  %v2495_v38 = vadd.f32 %v6478_v60, %v2473_v45  ;;  %v4479_v45 = vld [vmem:[%s6740_s6 + $0x90] sm:$0xff] }
 0x34b   :  { %v2399_v62 = vpop.f32.mrf.mxu3  ;;  %2745 = vmatpush.bf16.msrb.mxu0 %v4475_v28 }
 0x34c   :  { %v2457_v11 = vpop.f32.mrf.mxu2  ;;  %v6532_v6 = vmax.f32 %v2493_v56, %v2495_v38  ;;  %v6534_v2 = vmax.f32 %v2492_v29, %v2494_v18  ;;  %2877 = vmatpush.bf16.msrb.mxu2 %v4485_v30  ;;  %v4489_v18 = vld [vmem:[%s6740_s6 + $0xe0] sm:$0xff] }
 0x34d   :  { %v2370_v17 = vpop.f32.mrf.mxu1  ;;  %v2428_v48 = vpop.f32.mrf.mxu0  ;;  %2894 = vmatpush.bf16.msra.mxu3 %v4489_v18  ;;  %v3034_v18 = vld [vmem:[%s6743_s8] sm:$0xff] }
 0x34e   :  { %2775 = vrot.lane.b32.xlu0 %v6532_v6, %s4518_s5  ;;  %2780 = vrot.lane.b32.xlu1 %v6534_v2, %s4519_s11  ;;  %v2400_v53 = vadd.f32 %v2399_v62, %v2370_v17  ;;  %v2458_v25 = vadd.f32 %v2457_v11, %v2428_v48  ;;  %v4498_v62 = vld [vmem:[%s6740_s6 + $0x128] sm:$0xff]  ;;  %v4497_v48 = vld [vmem:[%s6740_s6 + $0x120] sm:$0xff] }
 0x34f   :  { %2746 = vmatpush.bf16.msrb.mxu0 %v4474_v57 }
 0x350   :  { %v2474_v49 = vadd.f32 %v2400_v53, %v6455_v59  ;;  %v2475_v21 = vadd.f32 %v2458_v25, %v6457_v10  ;;  %2878 = vmatpush.bf16.msrb.mxu2 %v4484_v19  ;;  %v4500_v53 = vld [vmem:[%s6740_s6 + $0x138] sm:$0xff] }
 0x351   :  { %v4472_v25 = vld [vmem:[%s6740_s6 + $0x58] sm:$0xff] }
 0x352   :  { %v2496_v24 = vadd.f32 %v6476_v8, %v2474_v49  ;;  %v2497_v61 = vadd.f32 %v6478_v60, %v2475_v21  ;;  %v4492_v49 = vld [vmem:[%s6740_s6 + $0xf8] sm:$0xff] }
 0x353   :  { %v2401_v12 = vpop.f32.mrf.mxu3 }
 0x354   :  { %v2459_v1 = vpop.f32.mrf.mxu2 }
 0x355   :  { %v2372_v31 = vpop.f32.mrf.mxu1  ;;  %v2430_v51 = vpop.f32.mrf.mxu0 }
 0x356   :  { %v2402_v22 = vadd.f32 %v2401_v12, %v2372_v31  ;;  %v2460_v52 = vadd.f32 %v2459_v1, %v2430_v51  ;;  %2648 = vrot.lane.b32.xlu0 %v6508_v32, %s4519_s11  ;;  %v4495_v12 = vld [vmem:[%s6740_s6 + $0x110] sm:$0xff]  ;;  %v4493_v51 = vld [vmem:[%s6740_s6 + $0x100] sm:$0xff] }
 0x357   :  { %v4471_v1 = vld [vmem:[%s6740_s6 + $0x50] sm:$0xff] }
 0x358   :  { %v2476_v63 = vadd.f32 %v2402_v22, %v2158_v50  ;;  %v2477_v58 = vadd.f32 %v2460_v52, %v2159_v54  ;;  %v4494_v50 = vld [vmem:[%s6740_s6 + $0x108] sm:$0xff]  ;;  %v4481_v54 = vld [vmem:[%s6740_s6 + $0xa0] sm:$0xff]  ;;  %v4499_v31 = vld [vmem:[%s6740_s6 + $0x130] sm:$0xff] }
 0x35a   :  { %v2498_v20 = vadd.f32 %v6476_v8, %v2476_v63  ;;  %v2499_v27 = vadd.f32 %v6478_v60, %v2477_v58  ;;  %v4467_v8 = vld [vmem:[%s6740_s6 + $0x30] sm:$0xff]  ;;  %v4466_v60 = vld [vmem:[%s6740_s6 + $0x28] sm:$0xff] }
 0x35b   :  { %2608 = vmatpush.bf16.msrb.mxu1 %v4467_v8  ;;  %v4491_v63 = vld [vmem:[%s6740_s6 + $0xf0] sm:$0xff] }
 0x35c   :  { %v6554_v9 = vmax.f32 %v2496_v24, %v2498_v20  ;;  %v6556_v59 = vmax.f32 %v2497_v61, %v2499_v27 }
 0x35e   :  { %2641 = vrot.lane.b32.xlu0 %v6508_v32, %s4518_s5  ;;  %2912 = vrot.lane.b32.xlu2 %v6554_v9, %s4519_s11  ;;  %v4505_v10 = vpack.i.bf16 %v6556_v59, %v6534_v2 }
 0x35f   :  { %2609 = vmatpush.bf16.msrb.mxu1 %v4466_v60 }
 0x360   :  { %4506 = vrot.lane.b32.xlu1 %v4505_v10, %s4518_s5 }
 0x363   :  { %2610 = vmatpush.bf16.msrb.mxu1 %v4465_v44 }
 0x367   :  { %2611 = vmatpush.bf16.msrb.mxu1 %v4464_v36 }
 0x368   :  { %2905 = vrot.lane.b32.xlu1 %v6554_v9, %s4518_s5 }
 0x36b   :  { %2612 = vmatpush.bf16.msrb.mxu1 %v4463_v15 }
 0x36f   :  { %2613 = vmatpush.bf16.msrb.mxu1 %v4462_v41 }
 0x373   :  { %2614 = vmatpush.bf16.msrb.mxu1 %v4461_v34 }
 0x377   :  { %2761 = vmatpush.bf16.msra.mxu1 %v4480_v23 }
 0x37b   :  { %2762 = vmatpush.bf16.msra.mxu1 %v4479_v45  ;;  %v3040_v45 = vld [vmem:[%s6743_s8 + $0x30] sm:$0x3] }
 0x388   :  { %v2506_v42 = vpop.permute.xlu2 %2505 }
 0x398   :  { %v2644_v20 = vpop.permute.xlu2 %2643 }
 0x3a0   :  { %v2508_v33 = vpop.permute.xlu0 %2507 }
 0x3a1   :  { %v2510_v4 = vsel %vm2509_vm5, %v2506_v42, %v2508_v33  ;;  %v2514_v46 = vpop.permute.xlu1 %2513 }
 0x3a2   :  { %v2517_v55 = vmax.f32 %v6488_v40, %v2510_v4  ;;  %v2516_v3 = vsel %vm208_vm1, %v2508_v33, %v2514_v46  ;;  %v4483_v40 = vld [vmem:[%s6740_s6 + $0xb0] sm:$0xff] }
 0x3a3   :  { %v2518_v29 = vmax.f32 %v6486_v47, %v2516_v3  ;;  %v4473_v47 = vld [vmem:[%s6740_s6 + $0x60] sm:$0xff]  ;;  %2879 = vmatpush.bf16.msrb.mxu2 %v4483_v40  ;;  %v3037_v3 = vld [vmem:[%s6743_s8 + $0x18] sm:$0xff] }
 0x3a4   :  { %v2519_v56 = vmax.f32 %v2517_v55, 0.0  ;;  %2747 = vmatpush.bf16.msrb.mxu0 %v4473_v47  ;;  %v3039_v55 = vld [vmem:[%s6743_s8 + $0x28] sm:$0xff] }
 0x3a5   :  { %v2520_v38 = vmax.f32 %v2518_v29, 0.0  ;;  %v3036_v29 = vld [vmem:[%s6743_s8 + $0x10] sm:$0xff] }
 0x3a6   :  { %v2521_v11 = vpack.c.bf16 %v2519_v56, %v2519_v56  ;;  %v3035_v56 = vld [vmem:[%s6743_s8 + $0x8] sm:$0xff] }
 0x3a7   :  { %v2522_v17 = vpack.c.bf16 %v2520_v38, %v2520_v38  ;;  %2880 = vmatpush.bf16.msrb.mxu2 %v4482_v13 }
 0x3a8   :  { %2615 = vmatmul.bf16.vlgmr.msrb.gmra.mxu1 %v2521_v11  ;;  %2748 = vmatpush.bf16.msrb.mxu0 %v4472_v25 }
 0x3a9   :  { %4083 = vmatmul.msk.bf16.vlgmr.msrb.gmra.mxu3 %vm2603_vm6, %v2522_v17  ;;  %3006 = vmatpush.bf16.msrb.mxu1 %v4498_v62 }
 0x3aa   :  { %3025 = vmatpush.bf16.msrb.mxu3 %v4500_v53 }
 0x3ab   :  { %2881 = vmatpush.bf16.msrb.mxu2 %v4481_v54 }
 0x3ac   :  { %2749 = vmatpush.bf16.msrb.mxu0 %v4471_v1 }
 0x3ad   :  { %3007 = vmatpush.bf16.msrb.mxu1 %v4497_v48  ;;  %v4510_v48 = vld [vmem:[%s6741_s7] ss:$0 sm:$0xff] }
 0x3ae   :  { %3026 = vmatpush.bf16.msrb.mxu3 %v4499_v31 }
 0x3b0   :  { %4267 = vmatpush.msk.msra.mxu0 %vm3049_vm7, %v3040_v45 }
 0x3b1   :  { %3008 = vmatpush.bf16.msrb.mxu1 %v4496_v14 }
 0x3b2   :  { %3063 = vmatpush.msra.mxu0 %v3039_v55 }
 0x3b5   :  { %3009 = vmatpush.bf16.msrb.mxu1 %v4495_v12 }
 0x3b8   :  { %v2913_v41 = vpop.permute.xlu2 %2912 }
 0x3b9   :  { %3010 = vmatpush.bf16.msrb.mxu1 %v4494_v50 }
 0x3bd   :  { %3011 = vmatpush.bf16.msrb.mxu1 %v4493_v51 }
 0x3c0   :  { %v2776_v21 = vpop.permute.xlu0 %2775  ;;  %v2781_v22 = vpop.permute.xlu1 %2780 }
 0x3c1   :  { %v2783_v52 = vsel %vm208_vm1, %v2776_v21, %v2781_v22  ;;  %3012 = vmatpush.bf16.msrb.mxu1 %v4492_v49 }
 0x3c2   :  { %v2785_v58 = vmax.f32 %v6532_v6, %v2783_v52 }
 0x3c4   :  { %v2787_v24 = vmax.f32 %v2785_v58, 0.0  ;;  %v4511_v58 = vld [vmem:[%s6742_s9] ss:$0 sm:$0xff] }
 0x3c5   :  { %3013 = vmatpush.bf16.msrb.mxu1 %v4491_v63 }
 0x3c6   :  { %v2789_v61 = vpack.c.bf16 %v2787_v24, %v2787_v24 }
 0x3c8   :  { %v2649_v27 = vpop.permute.xlu0 %2648  ;;  %4205 = vmatmul.msk.bf16.vlgmr.msra.gmra.mxu3 %vm2603_vm6, %v2789_v61 }
 0x3c9   :  { %v2651_v10 = vsel %vm208_vm1, %v2644_v20, %v2649_v27 }
 0x3ca   :  { %v2653_v8 = vmax.f32 %v6506_v39, %v2651_v10 }
 0x3cc   :  { %v2655_v60 = vmax.f32 %v2653_v8, 0.0 }
 0x3ce   :  { %v2657_v44 = vpack.c.bf16 %v2655_v60, %v2655_v60 }
 0x3d0   :  { %v2642_v36 = vpop.permute.xlu0 %2641  ;;  %4144 = vmatmul.msk.bf16.vlgmr.msra.gmra.mxu1 %vm2603_vm6, %v2657_v44 }
 0x3d1   :  { %v2645_v0 = vsel %vm2509_vm5, %v2642_v36, %v2644_v20 }
 0x3d2   :  { %v2652_v6 = vmax.f32 %v6508_v32, %v2645_v0  ;;  %v4507_v26 = vpop.permute.xlu1 %4506 }
 0x3d3   :  { %v4509_v43 = vunpack.i.h.bf16 %v4507_v26  ;;  %v4508_v15 = vunpack.i.l.bf16 %v4507_v26 }
 0x3d4   :  { %v2654_v34 = vmax.f32 %v2652_v6, 0.0 }
 0x3d5   :  { %v2915_v16 = vsel %vm208_vm1, %v4509_v43, %v2913_v41  ;;  %v2777_v5 = vsel %vm2509_vm5, %v4508_v15, %v2776_v21 }
 0x3d6   :  { %v2656_v7 = vpack.c.bf16 %v2654_v34, %v2654_v34  ;;  %v2917_v39 = vmax.f32 %v6556_v59, %v2915_v16  ;;  %v2784_v35 = vmax.f32 %v6534_v2, %v2777_v5 }
 0x3d8   :  { %v2919_v30 = vmax.f32 %v2917_v39, 0.0  ;;  %v2786_v28 = vmax.f32 %v2784_v35, 0.0  ;;  %2750 = vmatmul.bf16.vlgmr.msrb.gmra.mxu0 %v2656_v7 }
 0x3da   :  { %v2921_v19 = vpack.c.bf16 %v2919_v30, %v2919_v30  ;;  %v2788_v23 = vpack.c.bf16 %v2786_v28, %v2786_v28  ;;  %v2906_v32 = vpop.permute.xlu1 %2905 }
 0x3db   :  { %v2909_v37 = vsel %vm2509_vm5, %v2906_v32, %v4509_v43 }
 0x3dc   :  { %v2916_v57 = vmax.f32 %v6554_v9, %v2909_v37  ;;  %2882 = vmatmul.bf16.vlgmr.msrb.gmra.mxu2 %v2788_v23  ;;  %4266 = vmatmul.msk.bf16.vlgmr.msrb.gmra.mxu3 %vm2603_vm6, %v2921_v19  ;;  %v3038_v9 = vld [vmem:[%s6743_s8 + $0x20] sm:$0xff] }
 0x3dd   :  { %3064 = vmatpush.msra.mxu0 %v3038_v9 }
 0x3de   :  { %v2918_v42 = vmax.f32 %v2916_v57, 0.0 }
 0x3df   :  { %3065 = vmatpush.msra.mxu0 %v3037_v3 }
 0x3e0   :  { %v2920_v33 = vpack.c.bf16 %v2918_v42, %v2918_v42 }
 0x3e1   :  { %3066 = vmatpush.msra.mxu0 %v3036_v29 }
 0x3e2   :  { %3014 = vmatmul.bf16.vlgmr.msrb.gmra.mxu1 %v2920_v33 }
 0x3e3   :  { %3067 = vmatpush.msra.mxu0 %v3035_v56 }
 0x3e5   :  { %3068 = vmatpush.msra.mxu0 %v3034_v18 }
 0x425   :  { %v2616_v4 = vpop.f32.mrf.mxu1 }
 0x42c   :  { %v2629_v59 = vpop.f32.mrf.mxu3 }
 0x42d   :  { %v2618_v46 = vpop.f32.mrf.mxu1  ;;  %v2630_v17 = vadd.f32 %v2629_v59, %v2616_v4 }
 0x42f   :  { %v2636_v53 = vadd.f32 %v4510_v48, %v2630_v17 }
 0x434   :  { %v2631_v2 = vpop.f32.mrf.mxu3 }
 0x44b   :  { %v2896_v38 = vpop.f32.mrf.mxu3 }
 0x44d   :  { %v2764_v62 = vpop.f32.mrf.mxu1 }
 0x453   :  { %v2898_v11 = vpop.f32.mrf.mxu3 }
 0x455   :  { %v2751_v40 = vpop.f32.mrf.mxu0  ;;  %v2766_v47 = vpop.f32.mrf.mxu1 }
 0x456   :  { %v2765_v14 = vadd.f32 %v2764_v62, %v2751_v40 }
 0x458   :  { %v2768_v1 = vadd.f32 %v2765_v14, %v2636_v53 }
 0x45d   :  { %v2753_v13 = vpop.f32.mrf.mxu0 }
 0x45f   :  { %v2883_v25 = vpop.f32.mrf.mxu2  ;;  %v3015_v12 = vpop.f32.mrf.mxu1 }
 0x460   :  { %v2897_v50 = vadd.f32 %v2896_v38, %v2883_v25  ;;  %v3028_v54 = vpop.f32.mrf.mxu3 }
 0x461   :  { %v3029_v51 = vadd.f32 %v3028_v54, %v3015_v12 }
 0x462   :  { %v2900_v31 = vadd.f32 %v2897_v50, %v2768_v1 }
 0x464   :  { %v3032_v49 = vadd.f32 %v3029_v51, %v2900_v31 }
 0x466   :  { %v3033_v21 = vmax.f32 %v3032_v49, 0.0 }
 0x467   :  { %v2885_v22 = vpop.f32.mrf.mxu2  ;;  %v3017_v52 = vpop.f32.mrf.mxu1 }
 0x468   :  { %v3030_v63 = vpop.f32.mrf.mxu3  ;;  %4268 = vmatmul.msk.f32.vlgmr.msra.gmra.mxu0 %vm3045_vm8, %v3033_v21 }
 0x4e5   :  { %v3070_v24 = vpop.f32.mrf.mxu0 }
 0x4e6   :  { %v3071_v61 = vadd.f32 %v4511_v58, %v3070_v24 }
 0x4e8   :  { %v3074_v20 = vsel %vm3073_vm9, %v3071_v61, -inf }
 0x4e9   :  { %3075 = vmax.xlane.f32.xlu2 %v3074_v20 }
 0x55c   :  { %v3076_v27 = vpop.xlane.xlu2 %3075 }
 0x55d   :  { %v3077_v10 = vsub.f32 %v3071_v61, %v3076_v27 }
 0x55f   :  { %v3078_v8 = vmul.f32 1.442695, %v3077_v10 }
 0x561   :  { %4512 = vpow2.f32 %v3078_v8 }
 0x567   :  { %v4513_v60 = vpop.eup %4512 }
 0x568   :  { %v3080_v44 = vsel %vm3073_vm9, %v4513_v60, 0.0 }
 0x569   :  { %3081 = vadd.xlane.f32.xlu0 %v3080_v44 }
 0x5dc   :  { %v3082_v36 = vpop.xlane.xlu0 %3081 }
 0x5dd   :  { %4514 = vlog2.f32 %v3082_v36 }
 0x5e3   :  { %v4515_v0 = vpop.eup %4514 }
 0x5e4   :  { %v3084_v6 = vmul.f32 0.6931472, %v4515_v0 }
 0x5e6   :  { %v3085_v26 = vsub.f32 %v3077_v10, %v3084_v6 }
 0x5e8   :  { %3086 = vst.msk [vmem:[%s6744_s10] sm:$0xff] %vm3073_vm9, %v3085_v26 }

</bundles_post_ra>
